<compile_context>
chip_gen: v7x
topology: tpu7x:2x2x1
jax: 0.10.0
libtpu: 0.0.40
codegen_flags: <defaults>
</compile_context>

<pallas_src>
import jax
import jax.numpy as jnp
from jax.experimental import pallas as pl
from jax.experimental.pallas import tpu as pltpu

EPS = 1e-5          # nn.BatchNorm2d default eps
NEG_SLOPE = 0.01    # nn.LeakyReLU default negative_slope


# ---------------------------------------------------------------------------
# small helpers
# ---------------------------------------------------------------------------
def _pad128(n):
    return ((n + 127) // 128) * 128


def _pad_to(a, shape):
    pads = [(0, s - d) for d, s in zip(a.shape, shape)]
    return jnp.pad(a, pads)


def _pick_tile(m, target):
    """Largest multiple of 8 <= target that divides m (fallback: m)."""
    t = min(target, m)
    t = max(8, (t // 8) * 8)
    while t >= 8:
        if m % t == 0:
            return t
        t -= 8
    return m


def _mosaic_params(sem):
    cls = getattr(pltpu, "CompilerParams", None) or getattr(pltpu, "TPUCompilerParams", None)
    return cls(dimension_semantics=sem) if cls is not None else None


def _fold_bn(psum, psq, count, gamma, beta):
    """Fold per-tile partial sums into a single per-channel scale/shift.

    Tiny O(C) glue done in plain JAX between pallas_calls so the normalize pass
    inside the next kernel is one fused multiply-add (no per-tile reductions).
    """
    s = jnp.sum(psum, axis=0)                          # (1, Cp)
    q = jnp.sum(psq, axis=0)                           # (1, Cp)
    mean = s / count
    var = jnp.maximum(q / count - mean * mean, 0.0)    # biased variance (train-mode BN)
    scale = gamma * jax.lax.rsqrt(var + EPS)
    shift = beta - mean * scale
    return scale, shift


# ---------------------------------------------------------------------------
# Pallas kernels
# ---------------------------------------------------------------------------
def _conv1x1_stats_kernel(x_ref, w_ref, y_ref, ps_ref, pq_ref):
    """conv1 (1x1 as matmul) + per-tile BN statistics (sum, sum of squares)."""
    y = jnp.dot(x_ref[...], w_ref[...], preferred_element_type=jnp.float32)
    y_ref[...] = y.astype(y_ref.dtype)
    ps_ref[...] = jnp.sum(y, axis=0, keepdims=True).reshape(ps_ref.shape)
    pq_ref[...] = jnp.sum(y * y, axis=0, keepdims=True).reshape(pq_ref.shape)


def _bn_act_conv1x1_stats_kernel(x_ref, sc_ref, sh_ref, w_ref, y_ref, ps_ref, pq_ref):
    """(folded BN as scale/shift) -> LeakyReLU -> 1x1 conv matmul -> partial stats."""
    a = x_ref[...].astype(jnp.float32) * sc_ref[...] + sh_ref[...]
    a = jnp.where(a > 0, a, NEG_SLOPE * a)
    y = jnp.dot(a.astype(jnp.bfloat16), w_ref[...], preferred_element_type=jnp.float32)
    y_ref[...] = y.astype(y_ref.dtype)
    ps_ref[...] = jnp.sum(y, axis=0, keepdims=True).reshape(ps_ref.shape)
    pq_ref[...] = jnp.sum(y * y, axis=0, keepdims=True).reshape(pq_ref.shape)


def _bn_act_conv3x3_stats_kernel(x_ref, sc_ref, sh_ref, w_ref, y_ref, ps_ref, pq_ref,
                                 pad_ref):
    """(folded BN) -> LeakyReLU -> 3x3 conv (pad=1, stride=1) as 9 accumulated
    shifted matmuls from a halo'd VMEM scratch -> partial BN statistics."""
    _, H, W, Cp = x_ref.shape
    a = x_ref[0].astype(jnp.float32)
    a = a * sc_ref[...].reshape(1, 1, Cp) + sh_ref[...].reshape(1, 1, Cp)
    a = jnp.where(a > 0, a, NEG_SLOPE * a).astype(jnp.bfloat16)

    # halo'd activation tile: zero border == conv padding=1
    pad_ref[...] = jnp.zeros_like(pad_ref)
    pad_ref[1:H + 1, 1:W + 1, :] = a

    acc = None
    for t in range(9):                       # unrolled: 9 MXU matmuls, f32 accumulate
        dh, dw = divmod(t, 3)
        win = pad_ref[dh:dh + H, dw:dw + W, :].reshape(H * W, Cp)
        y = jnp.dot(win, w_ref[t], preferred_element_type=jnp.float32)
        acc = y if acc is None else acc + y

    y_ref[...] = acc.astype(y_ref.dtype)
    ps_ref[...] = jnp.sum(acc, axis=0, keepdims=True).reshape(ps_ref.shape)
    pq_ref[...] = jnp.sum(acc * acc, axis=0, keepdims=True).reshape(pq_ref.shape)


def _bn_res_act_kernel(x_ref, sc_ref, sh_ref, res_ref, o_ref):
    """(folded BN3) -> + identity residual -> LeakyReLU (f32 epilogue)."""
    y = x_ref[...].astype(jnp.float32) * sc_ref[...] + sh_ref[...]
    y = y + res_ref[...].astype(jnp.float32)
    o_ref[...] = jnp.where(y > 0, y, NEG_SLOPE * y).astype(o_ref.dtype)


# ---------------------------------------------------------------------------
# pallas_call wrappers
# ---------------------------------------------------------------------------
def _conv1x1_stats(x2d, w, tm):
    M, Kp = x2d.shape
    Np = w.shape[1]
    g = M // tm
    return pl.pallas_call(
        _conv1x1_stats_kernel,
        grid=(g,),
        in_specs=[pl.BlockSpec((tm, Kp), lambda i: (i, 0)),
                  pl.BlockSpec((Kp, Np), lambda i: (0, 0))],
        out_specs=(pl.BlockSpec((tm, Np), lambda i: (i, 0)),
                   pl.BlockSpec((1, 1, Np), lambda i: (i, 0, 0)),
                   pl.BlockSpec((1, 1, Np), lambda i: (i, 0, 0))),
        out_shape=(jax.ShapeDtypeStruct((M, Np), jnp.bfloat16),
                   jax.ShapeDtypeStruct((g, 1, Np), jnp.float32),
                   jax.ShapeDtypeStruct((g, 1, Np), jnp.float32)),
        compiler_params=_mosaic_params(("parallel",)),
    )(x2d, w)


def _bn_act_conv1x1_stats(x2d, sc, sh, w, tm):
    M, Kp = x2d.shape
    Np = w.shape[1]
    g = M // tm
    return pl.pallas_call(
        _bn_act_conv1x1_stats_kernel,
        grid=(g,),
        in_specs=[pl.BlockSpec((tm, Kp), lambda i: (i, 0)),
                  pl.BlockSpec((1, Kp), lambda i: (0, 0)),
                  pl.BlockSpec((1, Kp), lambda i: (0, 0)),
                  pl.BlockSpec((Kp, Np), lambda i: (0, 0))],
        out_specs=(pl.BlockSpec((tm, Np), lambda i: (i, 0)),
                   pl.BlockSpec((1, 1, Np), lambda i: (i, 0, 0)),
                   pl.BlockSpec((1, 1, Np), lambda i: (i, 0, 0))),
        out_shape=(jax.ShapeDtypeStruct((M, Np), jnp.bfloat16),
                   jax.ShapeDtypeStruct((g, 1, Np), jnp.float32),
                   jax.ShapeDtypeStruct((g, 1, Np), jnp.float32)),
        compiler_params=_mosaic_params(("parallel",)),
    )(x2d, sc, sh, w)


def _bn_act_conv3x3_stats(x4d, sc, sh, w2):
    N, H, W, Cp = x4d.shape
    M = N * H * W
    return pl.pallas_call(
        _bn_act_conv3x3_stats_kernel,
        grid=(N,),
        in_specs=[pl.BlockSpec((1, H, W, Cp), lambda n: (n, 0, 0, 0)),
                  pl.BlockSpec((1, Cp), lambda n: (0, 0)),
                  pl.BlockSpec((1, Cp), lambda n: (0, 0)),
                  pl.BlockSpec((9, Cp, Cp), lambda n: (0, 0, 0))],
        out_specs=(pl.BlockSpec((H * W, Cp), lambda n: (n, 0)),
                   pl.BlockSpec((1, 1, Cp), lambda n: (n, 0, 0)),
                   pl.BlockSpec((1, 1, Cp), lambda n: (n, 0, 0))),
        out_shape=(jax.ShapeDtypeStruct((M, Cp), jnp.bfloat16),
                   jax.ShapeDtypeStruct((N, 1, Cp), jnp.float32),
                   jax.ShapeDtypeStruct((N, 1, Cp), jnp.float32)),
        scratch_shapes=[pltpu.VMEM((H + 2, W + 2, Cp), jnp.bfloat16)],
        compiler_params=_mosaic_params(("parallel",)),
    )(x4d, sc, sh, w2)


def _bn_res_act(x2d, sc, sh, res2d, tm):
    M, Np = x2d.shape
    g = M // tm
    return pl.pallas_call(
        _bn_res_act_kernel,
        grid=(g,),
        in_specs=[pl.BlockSpec((tm, Np), lambda i: (i, 0)),
                  pl.BlockSpec((1, Np), lambda i: (0, 0)),
                  pl.BlockSpec((1, Np), lambda i: (0, 0)),
                  pl.BlockSpec((tm, Np), lambda i: (i, 0))],
        out_specs=pl.BlockSpec((tm, Np), lambda i: (i, 0)),
        out_shape=jax.ShapeDtypeStruct((M, Np), jnp.float32),
        compiler_params=_mosaic_params(("parallel",)),
    )(x2d, sc, sh, res2d)


# ---------------------------------------------------------------------------
# BottleNeck forward
# ---------------------------------------------------------------------------
def bottleneck_forward(x_nchw, params, stride=1, block_rows=256):
    # block_rows: sweep 512-1024 at production sizes; also the place to raise
    # pltpu.CompilerParams(vmem_limit_bytes=...) / pl.Buffered(3) if DMA-exposed.
    C = params["outplanes"]
    Cin = params["inplanes"]
    assert stride == 1 and Cin == 4 * C, \
        "downsample=None identity skip requires stride=1 and inplanes == 4*outplanes"
    Cin_p, Cp, C4p = _pad128(Cin), _pad128(C), _pad128(4 * C)

    # Layout glue: NCHW -> NHWC, lane-pad channels to 128, bf16 for the MXU.
    # TODO(synk): an NHWC-native API would remove the two transpose passes.
    x = jnp.transpose(x_nchw, (0, 2, 3, 1))
    N, H, W, _ = x.shape
    M = N * H * W
    x2d = _pad_to(x.astype(jnp.bfloat16), (N, H, W, Cin_p)).reshape(M, Cin_p)

    TM = _pick_tile(M, block_rows)

    # conv1 (1x1) + partial BN1 stats
    y1, ps1, pq1 = _conv1x1_stats(x2d, params["w1"], TM)
    sc1, sh1 = _fold_bn(ps1, pq1, M, params["g1"], params["b1"])

    # bn1+LeakyReLU fused with conv2 (3x3, pad=1) as 9 accumulated taps + BN2 stats
    y2, ps2, pq2 = _bn_act_conv3x3_stats(y1.reshape(N, H, W, Cp), sc1, sh1, params["w2"])
    sc2, sh2 = _fold_bn(ps2, pq2, M, params["g2"], params["b2"])

    # bn2+LeakyReLU fused with conv3 (1x1) + BN3 stats
    y3, ps3, pq3 = _bn_act_conv1x1_stats(y2, sc2, sh2, params["w3"], TM)
    sc3, sh3 = _fold_bn(ps3, pq3, M, params["g3"], params["b3"])

    # bn3 + identity residual + LeakyReLU
    out2d = _bn_res_act(y3, sc3, sh3, x2d, TM)

    out = out2d.reshape(N, H, W, C4p)[..., :4 * C]
    return jnp.transpose(out, (0, 3, 1, 2))          # back to NCHW, f32
    # TODO(synk): BatchNorm running_mean/running_var buffer updates (training-time
    # side effect) are not modeled; they do not affect the forward output.


# ---------------------------------------------------------------------------
# Parameters (conv weights in matmul layout, lane-padded, bf16) + f32 reference copies
# ---------------------------------------------------------------------------
def make_params(key, inplanes, outplanes):
    assert inplanes == 4 * outplanes, "identity skip requires inplanes == 4*outplanes"
    C = outplanes
    k1, k2, k3 = jax.random.split(key, 3)
    # matmul layouts:  w1 (cin, cout) ; w2 (kh, kw, cin, cout) == torch (cout,cin,kh,kw).transpose(2,3,1,0)
    #                  w3 (cin, cout)
    w1 = 0.1 * jax.random.normal(k1, (inplanes, C), jnp.float32)
    w2 = 0.1 * jax.random.normal(k2, (3, 3, C, C), jnp.float32)
    w3 = 0.1 * jax.random.normal(k3, (C, 4 * C), jnp.float32)
    g1 = jnp.ones((C,), jnp.float32);     b1 = jnp.zeros((C,), jnp.float32)
    g2 = jnp.ones((C,), jnp.float32);     b2 = jnp.zeros((C,), jnp.float32)
    g3 = jnp.ones((4 * C,), jnp.float32); b3 = jnp.zeros((4 * C,), jnp.float32)

    Cin_p, Cp, C4p = _pad128(inplanes), _pad128(C), _pad128(4 * C)
    return {
        "inplanes": inplanes, "outplanes": C,
        "w1": _pad_to(w1, (Cin_p, Cp)).astype(jnp.bfloat16),
        "w2": _pad_to(w2, (3, 3, Cp, Cp)).reshape(9, Cp, Cp).astype(jnp.bfloat16),
        "w3": _pad_to(w3, (Cp, C4p)).astype(jnp.bfloat16),
        "g1": _pad_to(g1.reshape(1, C), (1, Cp)),      "b1": _pad_to(b1.reshape(1, C), (1, Cp)),
        "g2": _pad_to(g2.reshape(1, C), (1, Cp)),      "b2": _pad_to(b2.reshape(1, C), (1, Cp)),
        "g3": _pad_to(g3.reshape(1, 4 * C), (1, C4p)), "b3": _pad_to(b3.reshape(1, 4 * C), (1, C4p)),
        "ref": {"w1": w1, "w2": w2, "w3": w3,
                "g1": g1, "b1": b1, "g2": g2, "b2": b2, "g3": g3, "b3": b3},
    }


# ---------------------------------------------------------------------------
# Pure-JAX f32 reference (mirrors the PyTorch forward) for a correctness check
# ---------------------------------------------------------------------------
def _reference_forward(x_nchw, params):
    r = params["ref"]
    x = jnp.transpose(x_nchw, (0, 2, 3, 1)).astype(jnp.float32)

    def bn(y, g, b):
        m = jnp.mean(y, axis=(0, 1, 2), keepdims=True)
        v = jnp.mean((y - m) ** 2, axis=(0, 1, 2), keepdims=True)
        return (y - m) * jax.lax.rsqrt(v + EPS) * g + b

    def act(y):
        return jnp.where(y > 0, y, NEG_SLOPE * y)

    a = act(bn(jnp.einsum("nhwc,cd->nhwd", x, r["w1"]), r["g1"], r["b1"]))
    a = act(bn(jax.lax.conv_general_dilated(
        a, r["w2"], window_strides=(1, 1), padding="SAME",
        dimension_numbers=("NHWC", "HWIO", "NHWC")), r["g2"], r["b2"]))
    a = bn(jnp.einsum("nhwc,cd->nhwd", a, r["w3"]), r["g3"], r["b3"])
    out = act(a + x)
    return jnp.transpose(out, (0, 3, 1, 2))


if __name__ == "__main__":
    key = jax.random.PRNGKey(0)
    kx, kp = jax.random.split(key)

    inplanes, outplanes = 16, 4          # identity skip needs inplanes == 4*outplanes
    N, H, W = 2, 16, 16
    x = jax.random.normal(kx, (N, inplanes, H, W), jnp.float32)   # NCHW input
    params = make_params(kp, inplanes, outplanes)

    fwd = jax.jit(lambda inp: bottleneck_forward(inp, params, stride=1, block_rows=256))
    y = jax.block_until_ready(fwd(x))

    assert y.shape == (N, 4 * outplanes, H, W), y.shape
    assert bool(jnp.all(jnp.isfinite(y)))

    # Correctness vs. a pure-JAX f32 reference (tolerance covers bf16 MXU inputs).
    ref = _reference_forward(x, params)
    err = float(jnp.max(jnp.abs(y - ref)))
    assert err < 0.2, f"max abs err vs reference: {err}"

    print("KERNEL_OK")
</pallas_src>

<mosaic_0001>
module attributes {stable_mosaic.version = 11 : i64} {
  func.func @_conv1x1_stats_kernel(%arg0: i32, %arg1: memref<256x128xbf16, #tpu.memory_space<vmem>>, %arg2: memref<128x128xbf16, #tpu.memory_space<vmem>>, %arg3: memref<256x128xbf16, #tpu.memory_space<vmem>>, %arg4: memref<1x1x128xf32, #tpu.memory_space<vmem>>, %arg5: memref<1x1x128xf32, #tpu.memory_space<vmem>>) attributes {dimension_semantics = [#tpu.dimension_semantics<parallel>], iteration_bounds = array<i64: 2>, scalar_prefetch = 0 : i64, scratch_operands = 0 : i64, tpu.core_type = #tpu.core_type<tc>, window_params = [{transform_indices = @transform_0, window_bounds = array<i64: 256, 128>}, {pipeline_mode = #tpu.pipeline_mode<synchronous>, transform_indices = @transform_1, window_bounds = array<i64: 128, 128>}, {transform_indices = @transform_2, window_bounds = array<i64: 256, 128>}, {transform_indices = @transform_3, window_bounds = array<i64: 1, 1, 128>}, {transform_indices = @transform_4, window_bounds = array<i64: 1, 1, 128>}]} {
    %c0 = arith.constant 0 : index
    %c0_0 = arith.constant 0 : index
    %0 = vector.load %arg1[%c0, %c0_0] : memref<256x128xbf16, #tpu.memory_space<vmem>>, vector<256x128xbf16>
    %c0_1 = arith.constant 0 : index
    %c0_2 = arith.constant 0 : index
    %1 = vector.load %arg2[%c0_1, %c0_2] : memref<128x128xbf16, #tpu.memory_space<vmem>>, vector<128x128xbf16>
    %cst = arith.constant dense<0.000000e+00> : vector<256x128xf32>
    %2 = tpu.matmul %0, %1, %cst {dimension_numbers = #tpu.dot_dimension_numbers<[1], [0], [0], [1], [0, 0, 1, 1], [], []>} : vector<256x128xbf16>, vector<128x128xbf16>, vector<256x128xf32> -> vector<256x128xf32>
    %3 = arith.truncf %2 : vector<256x128xf32> to vector<256x128xbf16>
    %c0_3 = arith.constant 0 : index
    %c0_4 = arith.constant 0 : index
    %4 = vector.load %arg3[%c0_3, %c0_4] : memref<256x128xbf16, #tpu.memory_space<vmem>>, vector<256x128xbf16>
    tpu.vector_store %arg3[%c0_3, %c0_4], %3 {strides = array<i32>} : memref<256x128xbf16, #tpu.memory_space<vmem>>, vector<256x128xbf16>,
    %cst_5 = arith.constant dense<0.000000e+00> : vector<128xf32>
    %5 = vector.multi_reduction <add>, %2, %cst_5 [0] : vector<256x128xf32> to vector<128xf32>
    %6 = vector.shape_cast %5 : vector<128xf32> to vector<1x128xf32>
    %7 = vector.shape_cast %6 : vector<1x128xf32> to vector<1x1x128xf32>
    %c0_6 = arith.constant 0 : index
    %c0_7 = arith.constant 0 : index
    %c0_8 = arith.constant 0 : index
    %8 = vector.load %arg4[%c0_6, %c0_7, %c0_8] : memref<1x1x128xf32, #tpu.memory_space<vmem>>, vector<1x1x128xf32>
    tpu.vector_store %arg4[%c0_6, %c0_7, %c0_8], %7 {strides = array<i32>} : memref<1x1x128xf32, #tpu.memory_space<vmem>>, vector<1x1x128xf32>,
    %9 = arith.mulf %2, %2 : vector<256x128xf32>
    %cst_9 = arith.constant dense<0.000000e+00> : vector<128xf32>
    %10 = vector.multi_reduction <add>, %9, %cst_9 [0] : vector<256x128xf32> to vector<128xf32>
    %11 = vector.shape_cast %10 : vector<128xf32> to vector<1x128xf32>
    %12 = vector.shape_cast %11 : vector<1x128xf32> to vector<1x1x128xf32>
    %c0_10 = arith.constant 0 : index
    %c0_11 = arith.constant 0 : index
    %c0_12 = arith.constant 0 : index
    %13 = vector.load %arg5[%c0_10, %c0_11, %c0_12] : memref<1x1x128xf32, #tpu.memory_space<vmem>>, vector<1x1x128xf32>
    tpu.vector_store %arg5[%c0_10, %c0_11, %c0_12], %12 {strides = array<i32>} : memref<1x1x128xf32, #tpu.memory_space<vmem>>, vector<1x1x128xf32>,
    return
  }
  func.func @transform_0(%arg0: i32) -> (i32, i32) {
    %c0_i32 = arith.constant 0 : i32
    %c0_i32_0 = arith.constant 0 : i32
    return %arg0, %c0_i32 : i32, i32
  }
  func.func @transform_1(%arg0: i32) -> (i32, i32) {
    %c0_i32 = arith.constant 0 : i32
    %c0_i32_0 = arith.constant 0 : i32
    %c0_i32_1 = arith.constant 0 : i32
    return %c0_i32, %c0_i32_0 : i32, i32
  }
  func.func @transform_2(%arg0: i32) -> (i32, i32) {
    %c0_i32 = arith.constant 0 : i32
    %c0_i32_0 = arith.constant 0 : i32
    return %arg0, %c0_i32 : i32, i32
  }
  func.func @transform_3(%arg0: i32) -> (i32, i32, i32) {
    %c0_i32 = arith.constant 0 : i32
    %c0_i32_0 = arith.constant 0 : i32
    %c0_i32_1 = arith.constant 0 : i32
    return %arg0, %c0_i32, %c0_i32_0 : i32, i32, i32
  }
  func.func @transform_4(%arg0: i32) -> (i32, i32, i32) {
    %c0_i32 = arith.constant 0 : i32
    %c0_i32_0 = arith.constant 0 : i32
    %c0_i32_1 = arith.constant 0 : i32
    return %arg0, %c0_i32, %c0_i32_0 : i32, i32, i32
  }
}

module attributes {stable_mosaic.version = 11 : i64} {
  func.func @_bn_act_conv3x3_stats_kernel(%arg0: i32, %arg1: memref<1x16x16x128xbf16, #tpu.memory_space<vmem>>, %arg2: memref<1x128xf32, #tpu.memory_space<vmem>>, %arg3: memref<1x128xf32, #tpu.memory_space<vmem>>, %arg4: memref<9x128x128xbf16, #tpu.memory_space<vmem>>, %arg5: memref<256x128xbf16, #tpu.memory_space<vmem>>, %arg6: memref<1x1x128xf32, #tpu.memory_space<vmem>>, %arg7: memref<1x1x128xf32, #tpu.memory_space<vmem>>, %arg8: memref<18x18x128xbf16, #tpu.memory_space<vmem>>) attributes {dimension_semantics = [#tpu.dimension_semantics<parallel>], iteration_bounds = array<i64: 2>, scalar_prefetch = 0 : i64, scratch_operands = 1 : i64, tpu.core_type = #tpu.core_type<tc>, window_params = [{transform_indices = @transform_0, window_bounds = array<i64: 1, 16, 16, 128>}, {pipeline_mode = #tpu.pipeline_mode<synchronous>, transform_indices = @transform_1, window_bounds = array<i64: 1, 128>}, {pipeline_mode = #tpu.pipeline_mode<synchronous>, transform_indices = @transform_2, window_bounds = array<i64: 1, 128>}, {pipeline_mode = #tpu.pipeline_mode<synchronous>, transform_indices = @transform_3, window_bounds = array<i64: 9, 128, 128>}, {transform_indices = @transform_4, window_bounds = array<i64: 256, 128>}, {transform_indices = @transform_5, window_bounds = array<i64: 1, 1, 128>}, {transform_indices = @transform_6, window_bounds = array<i64: 1, 1, 128>}]} {
    %c0 = arith.constant 0 : index
    %c0_0 = arith.constant 0 : index
    %c0_1 = arith.constant 0 : index
    %c0_2 = arith.constant 0 : index
    %0 = vector.load %arg1[%c0, %c0_0, %c0_1, %c0_2] : memref<1x16x16x128xbf16, #tpu.memory_space<vmem>>, vector<1x16x16x128xbf16>
    %1 = vector.shape_cast %0 : vector<1x16x16x128xbf16> to vector<16x16x128xbf16>
    %2 = arith.extf %1 : vector<16x16x128xbf16> to vector<16x16x128xf32>
    %c0_3 = arith.constant 0 : index
    %c0_4 = arith.constant 0 : index
    %3 = vector.load %arg2[%c0_3, %c0_4] : memref<1x128xf32, #tpu.memory_space<vmem>>, vector<1x128xf32>
    %4 = vector.shape_cast %3 : vector<1x128xf32> to vector<1x1x128xf32>
    %5 = vector.broadcast %4 : vector<1x1x128xf32> to vector<16x16x128xf32>
    %6 = arith.mulf %2, %5 : vector<16x16x128xf32>
    %c0_5 = arith.constant 0 : index
    %c0_6 = arith.constant 0 : index
    %7 = vector.load %arg3[%c0_5, %c0_6] : memref<1x128xf32, #tpu.memory_space<vmem>>, vector<1x128xf32>
    %8 = vector.shape_cast %7 : vector<1x128xf32> to vector<1x1x128xf32>
    %9 = vector.broadcast %8 : vector<1x1x128xf32> to vector<16x16x128xf32>
    %10 = arith.addf %6, %9 : vector<16x16x128xf32>
    %cst = arith.constant 0.000000e+00 : f32
    %11 = vector.broadcast %cst : f32 to vector<16x16x128xf32>
    %12 = arith.cmpf ogt, %10, %11 : vector<16x16x128xf32>
    %cst_7 = arith.constant 0.00999999977 : f32
    %13 = vector.broadcast %cst_7 : f32 to vector<16x16x128xf32>
    %14 = arith.mulf %13, %10 : vector<16x16x128xf32>
    %15 = arith.select %12, %10, %14 : vector<16x16x128xi1>, vector<16x16x128xf32>
    %16 = arith.truncf %15 : vector<16x16x128xf32> to vector<16x16x128xbf16>
    %cst_8 = arith.constant 0.000000e+00 : bf16
    %17 = vector.broadcast %cst_8 : bf16 to vector<18x18x128xbf16>
    %c0_9 = arith.constant 0 : index
    %c0_10 = arith.constant 0 : index
    %c0_11 = arith.constant 0 : index
    %18 = vector.load %arg8[%c0_9, %c0_10, %c0_11] : memref<18x18x128xbf16, #tpu.memory_space<vmem>>, vector<18x18x128xbf16>
    tpu.vector_store %arg8[%c0_9, %c0_10, %c0_11], %17 {strides = array<i32>} : memref<18x18x128xbf16, #tpu.memory_space<vmem>>, vector<18x18x128xbf16>,
    %c1 = arith.constant 1 : index
    %c1_12 = arith.constant 1 : index
    %c0_13 = arith.constant 0 : index
    %19 = vector.load %arg8[%c1, %c1_12, %c0_13] : memref<18x18x128xbf16, #tpu.memory_space<vmem>>, vector<16x16x128xbf16>
    tpu.vector_store %arg8[%c1, %c1_12, %c0_13], %16 {strides = array<i32>} : memref<18x18x128xbf16, #tpu.memory_space<vmem>>, vector<16x16x128xbf16>,
    %c0_14 = arith.constant 0 : index
    %c0_15 = arith.constant 0 : index
    %c0_16 = arith.constant 0 : index
    %20 = vector.load %arg8[%c0_14, %c0_15, %c0_16] : memref<18x18x128xbf16, #tpu.memory_space<vmem>>, vector<16x16x128xbf16>
    %21 = vector.shape_cast %20 : vector<16x16x128xbf16> to vector<256x128xbf16>
    %c0_17 = arith.constant 0 : index
    %c0_18 = arith.constant 0 : index
    %c0_19 = arith.constant 0 : index
    %22 = vector.load %arg4[%c0_17, %c0_18, %c0_19] : memref<9x128x128xbf16, #tpu.memory_space<vmem>>, vector<1x128x128xbf16>
    %23 = vector.shape_cast %22 : vector<1x128x128xbf16> to vector<128x128xbf16>
    %cst_20 = arith.constant dense<0.000000e+00> : vector<256x128xf32>
    %24 = tpu.matmul %21, %23, %cst_20 {dimension_numbers = #tpu.dot_dimension_numbers<[1], [0], [0], [1], [0, 0, 1, 1], [], []>} : vector<256x128xbf16>, vector<128x128xbf16>, vector<256x128xf32> -> vector<256x128xf32>
    %c0_21 = arith.constant 0 : index
    %c1_22 = arith.constant 1 : index
    %c0_23 = arith.constant 0 : index
    %25 = vector.load %arg8[%c0_21, %c1_22, %c0_23] : memref<18x18x128xbf16, #tpu.memory_space<vmem>>, vector<16x16x128xbf16>
    %26 = vector.shape_cast %25 : vector<16x16x128xbf16> to vector<256x128xbf16>
    %c1_24 = arith.constant 1 : index
    %c0_25 = arith.constant 0 : index
    %c0_26 = arith.constant 0 : index
    %27 = vector.load %arg4[%c1_24, %c0_25, %c0_26] : memref<9x128x128xbf16, #tpu.memory_space<vmem>>, vector<1x128x128xbf16>
    %28 = vector.shape_cast %27 : vector<1x128x128xbf16> to vector<128x128xbf16>
    %cst_27 = arith.constant dense<0.000000e+00> : vector<256x128xf32>
    %29 = tpu.matmul %26, %28, %cst_27 {dimension_numbers = #tpu.dot_dimension_numbers<[1], [0], [0], [1], [0, 0, 1, 1], [], []>} : vector<256x128xbf16>, vector<128x128xbf16>, vector<256x128xf32> -> vector<256x128xf32>
    %30 = arith.addf %24, %29 : vector<256x128xf32>
    %c0_28 = arith.constant 0 : index
    %c2 = arith.constant 2 : index
    %c0_29 = arith.constant 0 : index
    %31 = vector.load %arg8[%c0_28, %c2, %c0_29] : memref<18x18x128xbf16, #tpu.memory_space<vmem>>, vector<16x16x128xbf16>
    %32 = vector.shape_cast %31 : vector<16x16x128xbf16> to vector<256x128xbf16>
    %c2_30 = arith.constant 2 : index
    %c0_31 = arith.constant 0 : index
    %c0_32 = arith.constant 0 : index
    %33 = vector.load %arg4[%c2_30, %c0_31, %c0_32] : memref<9x128x128xbf16, #tpu.memory_space<vmem>>, vector<1x128x128xbf16>
    %34 = vector.shape_cast %33 : vector<1x128x128xbf16> to vector<128x128xbf16>
    %cst_33 = arith.constant dense<0.000000e+00> : vector<256x128xf32>
    %35 = tpu.matmul %32, %34, %cst_33 {dimension_numbers = #tpu.dot_dimension_numbers<[1], [0], [0], [1], [0, 0, 1, 1], [], []>} : vector<256x128xbf16>, vector<128x128xbf16>, vector<256x128xf32> -> vector<256x128xf32>
    %36 = arith.addf %30, %35 : vector<256x128xf32>
    %c1_34 = arith.constant 1 : index
    %c0_35 = arith.constant 0 : index
    %c0_36 = arith.constant 0 : index
    %37 = vector.load %arg8[%c1_34, %c0_35, %c0_36] : memref<18x18x128xbf16, #tpu.memory_space<vmem>>, vector<16x16x128xbf16>
    %38 = vector.shape_cast %37 : vector<16x16x128xbf16> to vector<256x128xbf16>
    %c3 = arith.constant 3 : index
    %c0_37 = arith.constant 0 : index
    %c0_38 = arith.constant 0 : index
    %39 = vector.load %arg4[%c3, %c0_37, %c0_38] : memref<9x128x128xbf16, #tpu.memory_space<vmem>>, vector<1x128x128xbf16>
    %40 = vector.shape_cast %39 : vector<1x128x128xbf16> to vector<128x128xbf16>
    %cst_39 = arith.constant dense<0.000000e+00> : vector<256x128xf32>
    %41 = tpu.matmul %38, %40, %cst_39 {dimension_numbers = #tpu.dot_dimension_numbers<[1], [0], [0], [1], [0, 0, 1, 1], [], []>} : vector<256x128xbf16>, vector<128x128xbf16>, vector<256x128xf32> -> vector<256x128xf32>
    %42 = arith.addf %36, %41 : vector<256x128xf32>
    %c1_40 = arith.constant 1 : index
    %c1_41 = arith.constant 1 : index
    %c0_42 = arith.constant 0 : index
    %43 = vector.load %arg8[%c1_40, %c1_41, %c0_42] : memref<18x18x128xbf16, #tpu.memory_space<vmem>>, vector<16x16x128xbf16>
    %44 = vector.shape_cast %43 : vector<16x16x128xbf16> to vector<256x128xbf16>
    %c4 = arith.constant 4 : index
    %c0_43 = arith.constant 0 : index
    %c0_44 = arith.constant 0 : index
    %45 = vector.load %arg4[%c4, %c0_43, %c0_44] : memref<9x128x128xbf16, #tpu.memory_space<vmem>>, vector<1x128x128xbf16>
    %46 = vector.shape_cast %45 : vector<1x128x128xbf16> to vector<128x128xbf16>
    %cst_45 = arith.constant dense<0.000000e+00> : vector<256x128xf32>
    %47 = tpu.matmul %44, %46, %cst_45 {dimension_numbers = #tpu.dot_dimension_numbers<[1], [0], [0], [1], [0, 0, 1, 1], [], []>} : vector<256x128xbf16>, vector<128x128xbf16>, vector<256x128xf32> -> vector<256x128xf32>
    %48 = arith.addf %42, %47 : vector<256x128xf32>
    %c1_46 = arith.constant 1 : index
    %c2_47 = arith.constant 2 : index
    %c0_48 = arith.constant 0 : index
    %49 = vector.load %arg8[%c1_46, %c2_47, %c0_48] : memref<18x18x128xbf16, #tpu.memory_space<vmem>>, vector<16x16x128xbf16>
    %50 = vector.shape_cast %49 : vector<16x16x128xbf16> to vector<256x128xbf16>
    %c5 = arith.constant 5 : index
    %c0_49 = arith.constant 0 : index
    %c0_50 = arith.constant 0 : index
    %51 = vector.load %arg4[%c5, %c0_49, %c0_50] : memref<9x128x128xbf16, #tpu.memory_space<vmem>>, vector<1x128x128xbf16>
    %52 = vector.shape_cast %51 : vector<1x128x128xbf16> to vector<128x128xbf16>
    %cst_51 = arith.constant dense<0.000000e+00> : vector<256x128xf32>
    %53 = tpu.matmul %50, %52, %cst_51 {dimension_numbers = #tpu.dot_dimension_numbers<[1], [0], [0], [1], [0, 0, 1, 1], [], []>} : vector<256x128xbf16>, vector<128x128xbf16>, vector<256x128xf32> -> vector<256x128xf32>
    %54 = arith.addf %48, %53 : vector<256x128xf32>
    %c2_52 = arith.constant 2 : index
    %c0_53 = arith.constant 0 : index
    %c0_54 = arith.constant 0 : index
    %55 = vector.load %arg8[%c2_52, %c0_53, %c0_54] : memref<18x18x128xbf16, #tpu.memory_space<vmem>>, vector<16x16x128xbf16>
    %56 = vector.shape_cast %55 : vector<16x16x128xbf16> to vector<256x128xbf16>
    %c6 = arith.constant 6 : index
    %c0_55 = arith.constant 0 : index
    %c0_56 = arith.constant 0 : index
    %57 = vector.load %arg4[%c6, %c0_55, %c0_56] : memref<9x128x128xbf16, #tpu.memory_space<vmem>>, vector<1x128x128xbf16>
    %58 = vector.shape_cast %57 : vector<1x128x128xbf16> to vector<128x128xbf16>
    %cst_57 = arith.constant dense<0.000000e+00> : vector<256x128xf32>
    %59 = tpu.matmul %56, %58, %cst_57 {dimension_numbers = #tpu.dot_dimension_numbers<[1], [0], [0], [1], [0, 0, 1, 1], [], []>} : vector<256x128xbf16>, vector<128x128xbf16>, vector<256x128xf32> -> vector<256x128xf32>
    %60 = arith.addf %54, %59 : vector<256x128xf32>
    %c2_58 = arith.constant 2 : index
    %c1_59 = arith.constant 1 : index
    %c0_60 = arith.constant 0 : index
    %61 = vector.load %arg8[%c2_58, %c1_59, %c0_60] : memref<18x18x128xbf16, #tpu.memory_space<vmem>>, vector<16x16x128xbf16>
    %62 = vector.shape_cast %61 : vector<16x16x128xbf16> to vector<256x128xbf16>
    %c7 = arith.constant 7 : index
    %c0_61 = arith.constant 0 : index
    %c0_62 = arith.constant 0 : index
    %63 = vector.load %arg4[%c7, %c0_61, %c0_62] : memref<9x128x128xbf16, #tpu.memory_space<vmem>>, vector<1x128x128xbf16>
    %64 = vector.shape_cast %63 : vector<1x128x128xbf16> to vector<128x128xbf16>
    %cst_63 = arith.constant dense<0.000000e+00> : vector<256x128xf32>
    %65 = tpu.matmul %62, %64, %cst_63 {dimension_numbers = #tpu.dot_dimension_numbers<[1], [0], [0], [1], [0, 0, 1, 1], [], []>} : vector<256x128xbf16>, vector<128x128xbf16>, vector<256x128xf32> -> vector<256x128xf32>
    %66 = arith.addf %60, %65 : vector<256x128xf32>
    %c2_64 = arith.constant 2 : index
    %c2_65 = arith.constant 2 : index
    %c0_66 = arith.constant 0 : index
    %67 = vector.load %arg8[%c2_64, %c2_65, %c0_66] : memref<18x18x128xbf16, #tpu.memory_space<vmem>>, vector<16x16x128xbf16>
    %68 = vector.shape_cast %67 : vector<16x16x128xbf16> to vector<256x128xbf16>
    %c8 = arith.constant 8 : index
    %c0_67 = arith.constant 0 : index
    %c0_68 = arith.constant 0 : index
    %69 = vector.load %arg4[%c8, %c0_67, %c0_68] : memref<9x128x128xbf16, #tpu.memory_space<vmem>>, vector<1x128x128xbf16>
    %70 = vector.shape_cast %69 : vector<1x128x128xbf16> to vector<128x128xbf16>
    %cst_69 = arith.constant dense<0.000000e+00> : vector<256x128xf32>
    %71 = tpu.matmul %68, %70, %cst_69 {dimension_numbers = #tpu.dot_dimension_numbers<[1], [0], [0], [1], [0, 0, 1, 1], [], []>} : vector<256x128xbf16>, vector<128x128xbf16>, vector<256x128xf32> -> vector<256x128xf32>
    %72 = arith.addf %66, %71 : vector<256x128xf32>
    %73 = arith.truncf %72 : vector<256x128xf32> to vector<256x128xbf16>
    %c0_70 = arith.constant 0 : index
    %c0_71 = arith.constant 0 : index
    %74 = vector.load %arg5[%c0_70, %c0_71] : memref<256x128xbf16, #tpu.memory_space<vmem>>, vector<256x128xbf16>
    tpu.vector_store %arg5[%c0_70, %c0_71], %73 {strides = array<i32>} : memref<256x128xbf16, #tpu.memory_space<vmem>>, vector<256x128xbf16>,
    %cst_72 = arith.constant dense<0.000000e+00> : vector<128xf32>
    %75 = vector.multi_reduction <add>, %72, %cst_72 [0] : vector<256x128xf32> to vector<128xf32>
    %76 = vector.shape_cast %75 : vector<128xf32> to vector<1x128xf32>
    %77 = vector.shape_cast %76 : vector<1x128xf32> to vector<1x1x128xf32>
    %c0_73 = arith.constant 0 : index
    %c0_74 = arith.constant 0 : index
    %c0_75 = arith.constant 0 : index
    %78 = vector.load %arg6[%c0_73, %c0_74, %c0_75] : memref<1x1x128xf32, #tpu.memory_space<vmem>>, vector<1x1x128xf32>
    tpu.vector_store %arg6[%c0_73, %c0_74, %c0_75], %77 {strides = array<i32>} : memref<1x1x128xf32, #tpu.memory_space<vmem>>, vector<1x1x128xf32>,
    %79 = arith.mulf %72, %72 : vector<256x128xf32>
    %cst_76 = arith.constant dense<0.000000e+00> : vector<128xf32>
    %80 = vector.multi_reduction <add>, %79, %cst_76 [0] : vector<256x128xf32> to vector<128xf32>
    %81 = vector.shape_cast %80 : vector<128xf32> to vector<1x128xf32>
    %82 = vector.shape_cast %81 : vector<1x128xf32> to vector<1x1x128xf32>
    %c0_77 = arith.constant 0 : index
    %c0_78 = arith.constant 0 : index
    %c0_79 = arith.constant 0 : index
    %83 = vector.load %arg7[%c0_77, %c0_78, %c0_79] : memref<1x1x128xf32, #tpu.memory_space<vmem>>, vector<1x1x128xf32>
    tpu.vector_store %arg7[%c0_77, %c0_78, %c0_79], %82 {strides = array<i32>} : memref<1x1x128xf32, #tpu.memory_space<vmem>>, vector<1x1x128xf32>,
    return
  }
  func.func @transform_0(%arg0: i32) -> (i32, i32, i32, i32) {
    %c0_i32 = arith.constant 0 : i32
    %c0_i32_0 = arith.constant 0 : i32
    %c0_i32_1 = arith.constant 0 : i32
    %c0_i32_2 = arith.constant 0 : i32
    return %arg0, %c0_i32, %c0_i32_0, %c0_i32_1 : i32, i32, i32, i32
  }
  func.func @transform_1(%arg0: i32) -> (i32, i32) {
    %c0_i32 = arith.constant 0 : i32
    %c0_i32_0 = arith.constant 0 : i32
    %c0_i32_1 = arith.constant 0 : i32
    return %c0_i32, %c0_i32_0 : i32, i32
  }
  func.func @transform_2(%arg0: i32) -> (i32, i32) {
    %c0_i32 = arith.constant 0 : i32
    %c0_i32_0 = arith.constant 0 : i32
    %c0_i32_1 = arith.constant 0 : i32
    return %c0_i32, %c0_i32_0 : i32, i32
  }
  func.func @transform_3(%arg0: i32) -> (i32, i32, i32) {
    %c0_i32 = arith.constant 0 : i32
    %c0_i32_0 = arith.constant 0 : i32
    %c0_i32_1 = arith.constant 0 : i32
    %c0_i32_2 = arith.constant 0 : i32
    return %c0_i32, %c0_i32_0, %c0_i32_1 : i32, i32, i32
  }
  func.func @transform_4(%arg0: i32) -> (i32, i32) {
    %c0_i32 = arith.constant 0 : i32
    %c0_i32_0 = arith.constant 0 : i32
    return %arg0, %c0_i32 : i32, i32
  }
  func.func @transform_5(%arg0: i32) -> (i32, i32, i32) {
    %c0_i32 = arith.constant 0 : i32
    %c0_i32_0 = arith.constant 0 : i32
    %c0_i32_1 = arith.constant 0 : i32
    return %arg0, %c0_i32, %c0_i32_0 : i32, i32, i32
  }
  func.func @transform_6(%arg0: i32) -> (i32, i32, i32) {
    %c0_i32 = arith.constant 0 : i32
    %c0_i32_0 = arith.constant 0 : i32
    %c0_i32_1 = arith.constant 0 : i32
    return %arg0, %c0_i32, %c0_i32_0 : i32, i32, i32
  }
}

module attributes {stable_mosaic.version = 11 : i64} {
  func.func @_bn_act_conv1x1_stats_kernel(%arg0: i32, %arg1: memref<256x128xbf16, #tpu.memory_space<vmem>>, %arg2: memref<1x128xf32, #tpu.memory_space<vmem>>, %arg3: memref<1x128xf32, #tpu.memory_space<vmem>>, %arg4: memref<128x128xbf16, #tpu.memory_space<vmem>>, %arg5: memref<256x128xbf16, #tpu.memory_space<vmem>>, %arg6: memref<1x1x128xf32, #tpu.memory_space<vmem>>, %arg7: memref<1x1x128xf32, #tpu.memory_space<vmem>>) attributes {dimension_semantics = [#tpu.dimension_semantics<parallel>], iteration_bounds = array<i64: 2>, scalar_prefetch = 0 : i64, scratch_operands = 0 : i64, tpu.core_type = #tpu.core_type<tc>, window_params = [{transform_indices = @transform_0, window_bounds = array<i64: 256, 128>}, {pipeline_mode = #tpu.pipeline_mode<synchronous>, transform_indices = @transform_1, window_bounds = array<i64: 1, 128>}, {pipeline_mode = #tpu.pipeline_mode<synchronous>, transform_indices = @transform_2, window_bounds = array<i64: 1, 128>}, {pipeline_mode = #tpu.pipeline_mode<synchronous>, transform_indices = @transform_3, window_bounds = array<i64: 128, 128>}, {transform_indices = @transform_4, window_bounds = array<i64: 256, 128>}, {transform_indices = @transform_5, window_bounds = array<i64: 1, 1, 128>}, {transform_indices = @transform_6, window_bounds = array<i64: 1, 1, 128>}]} {
    %c0 = arith.constant 0 : index
    %c0_0 = arith.constant 0 : index
    %0 = vector.load %arg1[%c0, %c0_0] : memref<256x128xbf16, #tpu.memory_space<vmem>>, vector<256x128xbf16>
    %1 = arith.extf %0 : vector<256x128xbf16> to vector<256x128xf32>
    %c0_1 = arith.constant 0 : index
    %c0_2 = arith.constant 0 : index
    %2 = vector.load %arg2[%c0_1, %c0_2] : memref<1x128xf32, #tpu.memory_space<vmem>>, vector<1x128xf32>
    %3 = vector.broadcast %2 : vector<1x128xf32> to vector<256x128xf32>
    %4 = arith.mulf %1, %3 : vector<256x128xf32>
    %c0_3 = arith.constant 0 : index
    %c0_4 = arith.constant 0 : index
    %5 = vector.load %arg3[%c0_3, %c0_4] : memref<1x128xf32, #tpu.memory_space<vmem>>, vector<1x128xf32>
    %6 = vector.broadcast %5 : vector<1x128xf32> to vector<256x128xf32>
    %7 = arith.addf %4, %6 : vector<256x128xf32>
    %cst = arith.constant 0.000000e+00 : f32
    %8 = vector.broadcast %cst : f32 to vector<256x128xf32>
    %9 = arith.cmpf ogt, %7, %8 : vector<256x128xf32>
    %cst_5 = arith.constant 0.00999999977 : f32
    %10 = vector.broadcast %cst_5 : f32 to vector<256x128xf32>
    %11 = arith.mulf %10, %7 : vector<256x128xf32>
    %12 = arith.select %9, %7, %11 : vector<256x128xi1>, vector<256x128xf32>
    %13 = arith.truncf %12 : vector<256x128xf32> to vector<256x128xbf16>
    %c0_6 = arith.constant 0 : index
    %c0_7 = arith.constant 0 : index
    %14 = vector.load %arg4[%c0_6, %c0_7] : memref<128x128xbf16, #tpu.memory_space<vmem>>, vector<128x128xbf16>
    %cst_8 = arith.constant dense<0.000000e+00> : vector<256x128xf32>
    %15 = tpu.matmul %13, %14, %cst_8 {dimension_numbers = #tpu.dot_dimension_numbers<[1], [0], [0], [1], [0, 0, 1, 1], [], []>} : vector<256x128xbf16>, vector<128x128xbf16>, vector<256x128xf32> -> vector<256x128xf32>
    %16 = arith.truncf %15 : vector<256x128xf32> to vector<256x128xbf16>
    %c0_9 = arith.constant 0 : index
    %c0_10 = arith.constant 0 : index
    %17 = vector.load %arg5[%c0_9, %c0_10] : memref<256x128xbf16, #tpu.memory_space<vmem>>, vector<256x128xbf16>
    tpu.vector_store %arg5[%c0_9, %c0_10], %16 {strides = array<i32>} : memref<256x128xbf16, #tpu.memory_space<vmem>>, vector<256x128xbf16>,
    %cst_11 = arith.constant dense<0.000000e+00> : vector<128xf32>
    %18 = vector.multi_reduction <add>, %15, %cst_11 [0] : vector<256x128xf32> to vector<128xf32>
    %19 = vector.shape_cast %18 : vector<128xf32> to vector<1x128xf32>
    %20 = vector.shape_cast %19 : vector<1x128xf32> to vector<1x1x128xf32>
    %c0_12 = arith.constant 0 : index
    %c0_13 = arith.constant 0 : index
    %c0_14 = arith.constant 0 : index
    %21 = vector.load %arg6[%c0_12, %c0_13, %c0_14] : memref<1x1x128xf32, #tpu.memory_space<vmem>>, vector<1x1x128xf32>
    tpu.vector_store %arg6[%c0_12, %c0_13, %c0_14], %20 {strides = array<i32>} : memref<1x1x128xf32, #tpu.memory_space<vmem>>, vector<1x1x128xf32>,
    %22 = arith.mulf %15, %15 : vector<256x128xf32>
    %cst_15 = arith.constant dense<0.000000e+00> : vector<128xf32>
    %23 = vector.multi_reduction <add>, %22, %cst_15 [0] : vector<256x128xf32> to vector<128xf32>
    %24 = vector.shape_cast %23 : vector<128xf32> to vector<1x128xf32>
    %25 = vector.shape_cast %24 : vector<1x128xf32> to vector<1x1x128xf32>
    %c0_16 = arith.constant 0 : index
    %c0_17 = arith.constant 0 : index
    %c0_18 = arith.constant 0 : index
    %26 = vector.load %arg7[%c0_16, %c0_17, %c0_18] : memref<1x1x128xf32, #tpu.memory_space<vmem>>, vector<1x1x128xf32>
    tpu.vector_store %arg7[%c0_16, %c0_17, %c0_18], %25 {strides = array<i32>} : memref<1x1x128xf32, #tpu.memory_space<vmem>>, vector<1x1x128xf32>,
    return
  }
  func.func @transform_0(%arg0: i32) -> (i32, i32) {
    %c0_i32 = arith.constant 0 : i32
    %c0_i32_0 = arith.constant 0 : i32
    return %arg0, %c0_i32 : i32, i32
  }
  func.func @transform_1(%arg0: i32) -> (i32, i32) {
    %c0_i32 = arith.constant 0 : i32
    %c0_i32_0 = arith.constant 0 : i32
    %c0_i32_1 = arith.constant 0 : i32
    return %c0_i32, %c0_i32_0 : i32, i32
  }
  func.func @transform_2(%arg0: i32) -> (i32, i32) {
    %c0_i32 = arith.constant 0 : i32
    %c0_i32_0 = arith.constant 0 : i32
    %c0_i32_1 = arith.constant 0 : i32
    return %c0_i32, %c0_i32_0 : i32, i32
  }
  func.func @transform_3(%arg0: i32) -> (i32, i32) {
    %c0_i32 = arith.constant 0 : i32
    %c0_i32_0 = arith.constant 0 : i32
    %c0_i32_1 = arith.constant 0 : i32
    return %c0_i32, %c0_i32_0 : i32, i32
  }
  func.func @transform_4(%arg0: i32) -> (i32, i32) {
    %c0_i32 = arith.constant 0 : i32
    %c0_i32_0 = arith.constant 0 : i32
    return %arg0, %c0_i32 : i32, i32
  }
  func.func @transform_5(%arg0: i32) -> (i32, i32, i32) {
    %c0_i32 = arith.constant 0 : i32
    %c0_i32_0 = arith.constant 0 : i32
    %c0_i32_1 = arith.constant 0 : i32
    return %arg0, %c0_i32, %c0_i32_0 : i32, i32, i32
  }
  func.func @transform_6(%arg0: i32) -> (i32, i32, i32) {
    %c0_i32 = arith.constant 0 : i32
    %c0_i32_0 = arith.constant 0 : i32
    %c0_i32_1 = arith.constant 0 : i32
    return %arg0, %c0_i32, %c0_i32_0 : i32, i32, i32
  }
}

module attributes {stable_mosaic.version = 11 : i64} {
  func.func @_bn_res_act_kernel(%arg0: i32, %arg1: memref<256x128xbf16, #tpu.memory_space<vmem>>, %arg2: memref<1x128xf32, #tpu.memory_space<vmem>>, %arg3: memref<1x128xf32, #tpu.memory_space<vmem>>, %arg4: memref<256x128xbf16, #tpu.memory_space<vmem>>, %arg5: memref<256x128xf32, #tpu.memory_space<vmem>>) attributes {dimension_semantics = [#tpu.dimension_semantics<parallel>], iteration_bounds = array<i64: 2>, scalar_prefetch = 0 : i64, scratch_operands = 0 : i64, tpu.core_type = #tpu.core_type<tc>, window_params = [{transform_indices = @transform_0, window_bounds = array<i64: 256, 128>}, {pipeline_mode = #tpu.pipeline_mode<synchronous>, transform_indices = @transform_1, window_bounds = array<i64: 1, 128>}, {pipeline_mode = #tpu.pipeline_mode<synchronous>, transform_indices = @transform_2, window_bounds = array<i64: 1, 128>}, {transform_indices = @transform_3, window_bounds = array<i64: 256, 128>}, {transform_indices = @transform_4, window_bounds = array<i64: 256, 128>}]} {
    %c0 = arith.constant 0 : index
    %c0_0 = arith.constant 0 : index
    %0 = vector.load %arg1[%c0, %c0_0] : memref<256x128xbf16, #tpu.memory_space<vmem>>, vector<256x128xbf16>
    %1 = arith.extf %0 : vector<256x128xbf16> to vector<256x128xf32>
    %c0_1 = arith.constant 0 : index
    %c0_2 = arith.constant 0 : index
    %2 = vector.load %arg2[%c0_1, %c0_2] : memref<1x128xf32, #tpu.memory_space<vmem>>, vector<1x128xf32>
    %3 = vector.broadcast %2 : vector<1x128xf32> to vector<256x128xf32>
    %4 = arith.mulf %1, %3 : vector<256x128xf32>
    %c0_3 = arith.constant 0 : index
    %c0_4 = arith.constant 0 : index
    %5 = vector.load %arg3[%c0_3, %c0_4] : memref<1x128xf32, #tpu.memory_space<vmem>>, vector<1x128xf32>
    %6 = vector.broadcast %5 : vector<1x128xf32> to vector<256x128xf32>
    %7 = arith.addf %4, %6 : vector<256x128xf32>
    %c0_5 = arith.constant 0 : index
    %c0_6 = arith.constant 0 : index
    %8 = vector.load %arg4[%c0_5, %c0_6] : memref<256x128xbf16, #tpu.memory_space<vmem>>, vector<256x128xbf16>
    %9 = arith.extf %8 : vector<256x128xbf16> to vector<256x128xf32>
    %10 = arith.addf %7, %9 : vector<256x128xf32>
    %cst = arith.constant 0.000000e+00 : f32
    %11 = vector.broadcast %cst : f32 to vector<256x128xf32>
    %12 = arith.cmpf ogt, %10, %11 : vector<256x128xf32>
    %cst_7 = arith.constant 0.00999999977 : f32
    %13 = vector.broadcast %cst_7 : f32 to vector<256x128xf32>
    %14 = arith.mulf %13, %10 : vector<256x128xf32>
    %15 = arith.select %12, %10, %14 : vector<256x128xi1>, vector<256x128xf32>
    %c0_8 = arith.constant 0 : index
    %c0_9 = arith.constant 0 : index
    %16 = vector.load %arg5[%c0_8, %c0_9] : memref<256x128xf32, #tpu.memory_space<vmem>>, vector<256x128xf32>
    tpu.vector_store %arg5[%c0_8, %c0_9], %15 {strides = array<i32>} : memref<256x128xf32, #tpu.memory_space<vmem>>, vector<256x128xf32>,
    return
  }
  func.func @transform_0(%arg0: i32) -> (i32, i32) {
    %c0_i32 = arith.constant 0 : i32
    %c0_i32_0 = arith.constant 0 : i32
    return %arg0, %c0_i32 : i32, i32
  }
  func.func @transform_1(%arg0: i32) -> (i32, i32) {
    %c0_i32 = arith.constant 0 : i32
    %c0_i32_0 = arith.constant 0 : i32
    %c0_i32_1 = arith.constant 0 : i32
    return %c0_i32, %c0_i32_0 : i32, i32
  }
  func.func @transform_2(%arg0: i32) -> (i32, i32) {
    %c0_i32 = arith.constant 0 : i32
    %c0_i32_0 = arith.constant 0 : i32
    %c0_i32_1 = arith.constant 0 : i32
    return %c0_i32, %c0_i32_0 : i32, i32
  }
  func.func @transform_3(%arg0: i32) -> (i32, i32) {
    %c0_i32 = arith.constant 0 : i32
    %c0_i32_0 = arith.constant 0 : i32
    return %arg0, %c0_i32 : i32, i32
  }
  func.func @transform_4(%arg0: i32) -> (i32, i32) {
    %c0_i32 = arith.constant 0 : i32
    %c0_i32_0 = arith.constant 0 : i32
    return %arg0, %c0_i32 : i32, i32
  }
}

</mosaic_0001>

<bundles_post_ra>
// kernel: _lambda_.4
= control target key start
LH: loop header
LB: loop body
LE: loop exit
PB: predicated region body
PF: predicated region fallthrough
CT: control target
= control target key end

     0   :  { %s1293_s15 = smov 0   ;;  %s1472_s0 = inlined_call_operand.vmem [shape: bf16[512,128], index: 0, kind: input, shape index: {}]   ;;  %s1473_s1 = inlined_call_operand.vmem [shape: bf16[128,128], index: 1, kind: input, shape index: {}]   ;;  %s1474_s2 = inlined_call_operand.vmem [shape: bf16[512,128], index: 2, kind: output, shape index: {0}]   ;;  %s1475_s3 = inlined_call_operand.vmem [shape: f32[2,1,128], index: 3, kind: output, shape index: {1}]   ;;  %s1476_s4 = inlined_call_operand.vmem [shape: f32[2,1,128], index: 4, kind: output, shape index: {2}]  }
   0x1 LB: > { %s1299_s16 = sadd.s32 4294967295, %s1266_s15   ;;  %p950_p0 = scmp.ge.s32.totalorder %s1266_s15, 1  ;;  %s1266_s15 = sphi %s1293_s15, %s15_s15  }
   0x2   : > { %p168_p1 = scmp.lt.s32.totalorder %s1266_s15, 3 }
   0x4   : > { %p169_p2 = pnand %p950_p0, %p168_p1 }
   0x5   : > { %v1236_v0 = vld [vmem:[%s1473_s1] sm:$0xff] (!%p169_p2)   ;;  %s951_s19 = sshll.u32 (!%p169_p2), %s1299_s16, 5  ;;  %v1237_v1 = vld [vmem:[%s1473_s1 + $0x8] sm:$0xff] (!%p169_p2)   ;;  %v1238_v2 = vld [vmem:[%s1473_s1 + $0x10] sm:$0xff] (!%p169_p2)   ;;  %p212_p4 = scmp.lt.s32.totalorder (!%p169_p2), %s1299_s16, 1 }
   0x6   : > { %172 = sbr.rel (%p169_p2) target bundleno = 330 (0x14a), region = 28  ;;  %p201_p3 = scmp.lt.s32.totalorder (!%p169_p2), %s951_s19, 63  ;;  %1164 = vmatprep.subr.bf16.mxu0 (!%p169_p2), %v1236_v0  ;;  %1212 = vmatprep.subr.bf16.mxu1 (!%p169_p2), %v1236_v0  ;;  %v1239_v3 = vld [vmem:[%s1473_s1 + $0x18] sm:$0xff] (!%p169_p2)   ;;  %v1240_v5 = vld [vmem:[%s1473_s1 + $0x20] sm:$0xff] (!%p169_p2)   ;;  %v1241_v6 = vld [vmem:[%s1473_s1 + $0x28] sm:$0xff] (!%p169_p2)  }
   0x7   : > { %1165 = vmatpush3.bf16.msra.mxu0 (!%p169_p2), %v1236_v0  ;;  %1220 = vmatpush3.bf16.msra.mxu1 (!%p169_p2), %v1236_v0  ;;  %v1242_v8 = vld [vmem:[%s1473_s1 + $0x30] sm:$0xff] (!%p169_p2)   ;;  %v1243_v9 = vld [vmem:[%s1473_s1 + $0x38] sm:$0xff] (!%p169_p2)  }
   0x8   : > { %1166 = vmatprep.subr.bf16.mxu0 (!%p169_p2), %v1237_v1  ;;  %1213 = vmatprep.subr.bf16.mxu1 (!%p169_p2), %v1237_v1 }
   0xb   : > { %1167 = vmatpush3.bf16.msra.mxu0 (!%p169_p2), %v1237_v1  ;;  %1221 = vmatpush3.bf16.msra.mxu1 (!%p169_p2), %v1237_v1 }
   0xc   : > { %1168 = vmatprep.subr.bf16.mxu0 (!%p169_p2), %v1238_v2  ;;  %1214 = vmatprep.subr.bf16.mxu1 (!%p169_p2), %v1238_v2 }
   0xd   : > { %s1478_s19 = smov (!%p201_p3, %s951_s19), 63  ;;  %s1480_s16 = smov (!%p212_p4, %s1299_s16), 1 }
   0xe   : > { %s952_s24 = sshll.u32 %s1478_s19, 2  ;;  %s214_s19 = scalar_lea.vmem %s1475_s3, %s1480_s16 }
   0xf   : > { %s1321_s27 = scalar_lea.vmem %s1472_s0, %s952_s24  ;;  %1169 = vmatpush3.bf16.msra.mxu0 %v1238_v2  ;;  %1222 = vmatpush3.bf16.msra.mxu1 %v1238_v2  ;;  %s1363_s14 = scalar_lea.vmem %s1474_s2, %s952_s24 }
  0x10   : > { %v1244_v4 = vld [vmem:[%s1321_s27] sm:$0xff]   ;;  %1170 = vmatprep.subr.bf16.mxu0 %v1239_v3  ;;  %1215 = vmatprep.subr.bf16.mxu1 %v1239_v3  ;;  %v1245_v10 = vld [vmem:[%s1321_s27 + $0x8] sm:$0xff]   ;;  %v1246_v12 = vld [vmem:[%s1321_s27 + $0x10] sm:$0xff]   ;;  %s217_s22 = scalar_lea.vmem %s1476_s4, %s1480_s16 }
  0x11   : > { %1180 = vmatprep.mubr.bf16.mxu0 %v1244_v4  ;;  %v1252_v7 = vld [vmem:[%s1321_s27 + $0x40] sm:$0xff]   ;;  %v1253_v11 = vld [vmem:[%s1321_s27 + $0x48] sm:$0xff]   ;;  %v1254_v13 = vld [vmem:[%s1321_s27 + $0x50] sm:$0xff]  }
  0x12   : > { %1196 = vmatprep.mubr.bf16.mxu1 %v1252_v7  ;;  %v1247_v14 = vld [vmem:[%s1321_s27 + $0x18] sm:$0xff]   ;;  %v1248_v16 = vld [vmem:[%s1321_s27 + $0x20] sm:$0xff]   ;;  %v1249_v18 = vld [vmem:[%s1321_s27 + $0x28] sm:$0xff]  }
  0x13   : > { %1171 = vmatpush3.bf16.msra.mxu0 %v1239_v3  ;;  %1223 = vmatpush3.bf16.msra.mxu1 %v1239_v3  ;;  %v1255_v15 = vld [vmem:[%s1321_s27 + $0x58] sm:$0xff]   ;;  %v1256_v17 = vld [vmem:[%s1321_s27 + $0x60] sm:$0xff]   ;;  %v1257_v19 = vld [vmem:[%s1321_s27 + $0x68] sm:$0xff]  }
  0x14   : > { %1172 = vmatprep.subr.bf16.mxu0 %v1240_v5  ;;  %1216 = vmatprep.subr.bf16.mxu1 %v1240_v5  ;;  %v1250_v20 = vld [vmem:[%s1321_s27 + $0x30] sm:$0xff]   ;;  %v1251_v22 = vld [vmem:[%s1321_s27 + $0x38] sm:$0xff]  }
  0x15   : > { %v1258_v21 = vld [vmem:[%s1321_s27 + $0x70] sm:$0xff]   ;;  %v1259_v23 = vld [vmem:[%s1321_s27 + $0x78] sm:$0xff]  }
  0x17   : > { %1173 = vmatpush3.bf16.msra.mxu0 %v1240_v5  ;;  %1224 = vmatpush3.bf16.msra.mxu1 %v1240_v5 }
  0x18   : > { %1174 = vmatprep.subr.bf16.mxu0 %v1241_v6  ;;  %1217 = vmatprep.subr.bf16.mxu1 %v1241_v6 }
  0x1b   : > { %1175 = vmatpush3.bf16.msra.mxu0 %v1241_v6  ;;  %1225 = vmatpush3.bf16.msra.mxu1 %v1241_v6 }
  0x1c   : > { %1176 = vmatprep.subr.bf16.mxu0 %v1242_v8  ;;  %1218 = vmatprep.subr.bf16.mxu1 %v1242_v8 }
  0x1f   : > { %1177 = vmatpush3.bf16.msra.mxu0 %v1242_v8  ;;  %1226 = vmatpush3.bf16.msra.mxu1 %v1242_v8 }
  0x20   : > { %1178 = vmatprep.subr.bf16.mxu0 %v1243_v9  ;;  %1219 = vmatprep.subr.bf16.mxu1 %v1243_v9 }
  0x23   : > { %1179 = vmatpush3.bf16.msra.mxu0 %v1243_v9  ;;  %1227 = vmatpush3.bf16.msra.mxu1 %v1243_v9 }
  0x26   : > { %1181 = vmatmul.mubr.bf16.vlgmr.msra.gmra.mrb[0].mxu0 %v1245_v10  ;;  %1197 = vmatmul.mubr.bf16.vlgmr.msra.gmra.mrb[0].mxu1 %v1253_v11 }
  0x27   : > { %1184 = vmatprep.mubr.bf16.mxu0 %v1246_v12  ;;  %1200 = vmatprep.mubr.bf16.mxu1 %v1254_v13 }
  0x2e   : > { %1185 = vmatmul.mubr.bf16.gmra.mrb[4].mxu0 %v1247_v14  ;;  %1201 = vmatmul.mubr.bf16.gmra.mrb[4].mxu1 %v1255_v15 }
  0x2f   : > { %1188 = vmatprep.mubr.bf16.mxu0 %v1248_v16  ;;  %1204 = vmatprep.mubr.bf16.mxu1 %v1256_v17 }
  0x36   : > { %1189 = vmatmul.mubr.bf16.gmra.mrb[8].mxu0 %v1249_v18  ;;  %1205 = vmatmul.mubr.bf16.gmra.mrb[8].mxu1 %v1257_v19 }
  0x37   : > { %1192 = vmatprep.mubr.bf16.mxu0 %v1250_v20  ;;  %1208 = vmatprep.mubr.bf16.mxu1 %v1258_v21 }
  0x3e   : > { %1193 = vmatmul.mubr.bf16.gmra.mrb[12].mxu0 %v1251_v22  ;;  %1209 = vmatmul.mubr.bf16.gmra.mrb[12].mxu1 %v1259_v23 }
  0xf9   : > { %v1182_v24 = vpop.f32.mrb[0].mxu0  ;;  %v1354_v25 = vpop.f32.mrb[0].mxu1 }
  0xfa   : > { %v445_v26 = vpop.f32.mrb[1].mxu0  ;;  %v1356_v27 = vpop.f32.mrb[1].mxu1  ;;  %v772_v39 = vmul.f32 %v1182_v24, %v1182_v24 }
  0xfb   : > { %v1183_v28 = vpop.f32.mrb[2].mxu0  ;;  %v1365_v29 = vpop.f32.mrb[2].mxu1  ;;  %v770_v30 = vmul.f32 %v445_v26, %v445_v26 }
  0xfc   : > { %v1053_v31 = vpack.c.bf16 %v1183_v28, %v1182_v24  ;;  %v448_v32 = vpop.f32.mrb[3].mxu0  ;;  %v1093_v33 = vpack.c.bf16 %v1365_v29, %v1354_v25  ;;  %v1369_v34 = vpop.f32.mrb[3].mxu1  ;;  %v773_v42 = vmul.f32 %v1183_v28, %v1183_v28 }
  0xfd   : > { %v1048_v35 = vpack.c.bf16 %v448_v32, %v445_v26  ;;  %v732_v36 = vadd.f32 %v448_v32, %v445_v26  ;;  %v771_v37 = vmul.f32 %v448_v32, %v448_v32  ;;  %v1088_v38 = vpack.c.bf16 %v1369_v34, %v1356_v27 }
  0xfe   : > { %1125 = vst [vmem:[%s1363_s14 + $0x8] sm:$0xff] %v1053_v31   ;;  %1133 = vst [vmem:[%s1363_s14 + $0x48] sm:$0xff] %v1093_v33  }
  0xff   : > { %1049 = vst [vmem:[%s1363_s14] sm:$0xff] %v1048_v35   ;;  %v733_v40 = vadd.f32 %v1182_v24, %v732_v36  ;;  %v802_v41 = vadd.f32 %v771_v37, %v770_v30  ;;  %1132 = vst [vmem:[%s1363_s14 + $0x40] sm:$0xff] %v1088_v38  }
 0x101   : > { %v803_v43 = vadd.f32 %v802_v41, %v772_v39  ;;  %v1186_v44 = vpop.f32.mrb[4].mxu0  ;;  %v734_v45 = vadd.f32 %v1183_v28, %v733_v40  ;;  %v1377_v46 = vpop.f32.mrb[4].mxu1 }
 0x102   : > { %v461_v47 = vpop.f32.mrb[5].mxu0  ;;  %v1379_v48 = vpop.f32.mrb[5].mxu1  ;;  %v776_v63 = vmul.f32 %v1186_v44, %v1186_v44 }
 0x103   : > { %v735_v49 = vadd.f32 %v734_v45, %v461_v47  ;;  %v774_v50 = vmul.f32 %v461_v47, %v461_v47  ;;  %v804_v51 = vadd.f32 %v803_v43, %v773_v42  ;;  %v1187_v52 = vpop.f32.mrb[6].mxu0  ;;  %v1381_v53 = vpop.f32.mrb[6].mxu1 }
 0x104   : > { %v1063_v54 = vpack.c.bf16 %v1187_v52, %v1186_v44  ;;  %v464_v55 = vpop.f32.mrb[7].mxu0  ;;  %v1103_v56 = vpack.c.bf16 %v1381_v53, %v1377_v46  ;;  %v1385_v57 = vpop.f32.mrb[7].mxu1  ;;  %v777_v2 = vmul.f32 %v1187_v52, %v1187_v52 }
 0x105   : > { %v805_v58 = vadd.f32 %v804_v51, %v774_v50  ;;  %v1058_v59 = vpack.c.bf16 %v464_v55, %v461_v47  ;;  %v736_v60 = vadd.f32 %v735_v49, %v464_v55  ;;  %v775_v61 = vmul.f32 %v464_v55, %v464_v55 }
 0x106   : > { %1127 = vst [vmem:[%s1363_s14 + $0x18] sm:$0xff] %v1063_v54   ;;  %1135 = vst [vmem:[%s1363_s14 + $0x58] sm:$0xff] %v1103_v56   ;;  %v1098_v62 = vpack.c.bf16 %v1385_v57, %v1379_v48 }
 0x107   : > { %1126 = vst [vmem:[%s1363_s14 + $0x10] sm:$0xff] %v1058_v59   ;;  %v737_v0 = vadd.f32 %v1186_v44, %v736_v60  ;;  %v806_v1 = vadd.f32 %v805_v58, %v775_v61  ;;  %v786_v61 = vmul.f32 %v1356_v27, %v1356_v27 }
 0x108   : > { %1134 = vst [vmem:[%s1363_s14 + $0x50] sm:$0xff] %v1098_v62  }
 0x109   : > { %v807_v3 = vadd.f32 %v806_v1, %v776_v63  ;;  %v1190_v4 = vpop.f32.mrb[8].mxu0  ;;  %v738_v5 = vadd.f32 %v1187_v52, %v737_v0  ;;  %v1393_v6 = vpop.f32.mrb[8].mxu1 }
 0x10a   : > { %v477_v7 = vpop.f32.mrb[9].mxu0  ;;  %v1395_v8 = vpop.f32.mrb[9].mxu1  ;;  %v780_v23 = vmul.f32 %v1190_v4, %v1190_v4 }
 0x10b   : > { %v739_v9 = vadd.f32 %v738_v5, %v477_v7  ;;  %v778_v10 = vmul.f32 %v477_v7, %v477_v7  ;;  %v808_v11 = vadd.f32 %v807_v3, %v777_v2  ;;  %v1191_v12 = vpop.f32.mrb[10].mxu0  ;;  %v1397_v13 = vpop.f32.mrb[10].mxu1  ;;  %v787_v2 = vmul.f32 %v1369_v34, %v1369_v34 }
 0x10c   : > { %v1073_v14 = vpack.c.bf16 %v1191_v12, %v1190_v4  ;;  %v480_v15 = vpop.f32.mrb[11].mxu0  ;;  %v1113_v16 = vpack.c.bf16 %v1397_v13, %v1393_v6  ;;  %v1401_v17 = vpop.f32.mrb[11].mxu1  ;;  %v781_v28 = vmul.f32 %v1191_v12, %v1191_v12  ;;  %v788_v3 = vmul.f32 %v1354_v25, %v1354_v25 }
 0x10d   : > { %v809_v18 = vadd.f32 %v808_v11, %v778_v10  ;;  %v1068_v19 = vpack.c.bf16 %v480_v15, %v477_v7  ;;  %v740_v20 = vadd.f32 %v739_v9, %v480_v15  ;;  %v779_v21 = vmul.f32 %v480_v15, %v480_v15 }
 0x10e   : > { %1129 = vst [vmem:[%s1363_s14 + $0x28] sm:$0xff] %v1073_v14   ;;  %1137 = vst [vmem:[%s1363_s14 + $0x68] sm:$0xff] %v1113_v16   ;;  %v1108_v22 = vpack.c.bf16 %v1401_v17, %v1395_v8  ;;  %v789_v7 = vmul.f32 %v1365_v29, %v1365_v29  ;;  %v791_v15 = vmul.f32 %v1385_v57, %v1385_v57 }
 0x10f   : > { %1128 = vst [vmem:[%s1363_s14 + $0x20] sm:$0xff] %v1068_v19   ;;  %v741_v24 = vadd.f32 %v1190_v4, %v740_v20  ;;  %v810_v26 = vadd.f32 %v809_v18, %v779_v21 }
 0x110   : > { %1136 = vst [vmem:[%s1363_s14 + $0x60] sm:$0xff] %v1108_v22  }
 0x111   : > { %v811_v30 = vadd.f32 %v810_v26, %v780_v23  ;;  %v1194_v31 = vpop.f32.mrb[12].mxu0  ;;  %v742_v32 = vadd.f32 %v1191_v12, %v741_v24  ;;  %v1409_v33 = vpop.f32.mrb[12].mxu1  ;;  %v795_v24 = vmul.f32 %v1401_v17, %v1401_v17 }
 0x112   : > { %v493_v35 = vpop.f32.mrb[13].mxu0  ;;  %v557_v36 = vpop.f32.mrb[13].mxu1  ;;  %v784_v54 = vmul.f32 %v1194_v31, %v1194_v31 }
 0x113   : > { %v743_v37 = vadd.f32 %v742_v32, %v493_v35  ;;  %v782_v38 = vmul.f32 %v493_v35, %v493_v35  ;;  %v812_v39 = vadd.f32 %v811_v30, %v781_v28  ;;  %v1195_v40 = vpop.f32.mrb[14].mxu0  ;;  %v1411_v41 = vpop.f32.mrb[14].mxu1 }
 0x114   : > { %v1083_v42 = vpack.c.bf16 %v1195_v40, %v1194_v31  ;;  %v496_v43 = vpop.f32.mrb[15].mxu0  ;;  %v1123_v44 = vpack.c.bf16 %v1411_v41, %v1409_v33  ;;  %v560_v45 = vpop.f32.mrb[15].mxu1  ;;  %v785_v58 = vmul.f32 %v1195_v40, %v1195_v40 }
 0x115   : > { %v813_v47 = vadd.f32 %v812_v39, %v782_v38  ;;  %v1078_v49 = vpack.c.bf16 %v496_v43, %v493_v35  ;;  %v744_v50 = vadd.f32 %v743_v37, %v496_v43  ;;  %v783_v51 = vmul.f32 %v496_v43, %v496_v43 }
 0x116   : > { %1131 = vst [vmem:[%s1363_s14 + $0x38] sm:$0xff] %v1083_v42   ;;  %1139 = vst [vmem:[%s1363_s14 + $0x78] sm:$0xff] %v1123_v44   ;;  %v1118_v52 = vpack.c.bf16 %v560_v45, %v557_v36  ;;  %v800_v39 = vmul.f32 %v1409_v33, %v1409_v33  ;;  %v801_v42 = vmul.f32 %v1411_v41, %v1411_v41 }
 0x117   : > { %1130 = vst [vmem:[%s1363_s14 + $0x30] sm:$0xff] %v1078_v49   ;;  %v745_v55 = vadd.f32 %v1194_v31, %v744_v50  ;;  %v814_v56 = vadd.f32 %v813_v47, %v783_v51  ;;  %v798_v31 = vmul.f32 %v557_v36, %v557_v36 }
 0x118   : > { %1138 = vst [vmem:[%s1363_s14 + $0x70] sm:$0xff] %v1118_v52  }
 0x119   : > { %v815_v59 = vadd.f32 %v814_v56, %v784_v54  ;;  %v746_v60 = vadd.f32 %v1195_v40, %v745_v55 }
 0x11b   : > { %v747_v62 = vadd.f32 %v746_v60, %v1356_v27  ;;  %v816_v63 = vadd.f32 %v815_v59, %v785_v58  ;;  %v790_v27 = vmul.f32 %v1379_v48, %v1379_v48 }
 0x11d   : > { %v817_v0 = vadd.f32 %v816_v63, %v786_v61  ;;  %v748_v1 = vadd.f32 %v747_v62, %v1369_v34 }
 0x11f   : > { %v749_v4 = vadd.f32 %v1354_v25, %v748_v1  ;;  %v818_v5 = vadd.f32 %v817_v0, %v787_v2  ;;  %v792_v25 = vmul.f32 %v1377_v46, %v1377_v46 }
 0x121   : > { %v819_v9 = vadd.f32 %v818_v5, %v788_v3  ;;  %v750_v10 = vadd.f32 %v1365_v29, %v749_v4  ;;  %v793_v29 = vmul.f32 %v1381_v53, %v1381_v53 }
 0x123   : > { %v751_v11 = vadd.f32 %v750_v10, %v1379_v48  ;;  %v820_v12 = vadd.f32 %v819_v9, %v789_v7  ;;  %v794_v48 = vmul.f32 %v1395_v8, %v1395_v8 }
 0x125   : > { %v821_v14 = vadd.f32 %v820_v12, %v790_v27  ;;  %v752_v34 = vadd.f32 %v751_v11, %v1385_v57 }
 0x127   : > { %v753_v16 = vadd.f32 %v1377_v46, %v752_v34  ;;  %v822_v18 = vadd.f32 %v821_v14, %v791_v15  ;;  %v796_v46 = vmul.f32 %v1393_v6, %v1393_v6 }
 0x129   : > { %v823_v19 = vadd.f32 %v822_v18, %v792_v25  ;;  %v754_v20 = vadd.f32 %v1381_v53, %v753_v16  ;;  %v797_v53 = vmul.f32 %v1397_v13, %v1397_v13 }
 0x12b   : > { %v755_v21 = vadd.f32 %v754_v20, %v1395_v8  ;;  %v824_v22 = vadd.f32 %v823_v19, %v793_v29 }
 0x12d   : > { %v825_v23 = vadd.f32 %v824_v22, %v794_v48  ;;  %v756_v57 = vadd.f32 %v755_v21, %v1401_v17  ;;  %v799_v17 = vmul.f32 %v560_v45, %v560_v45 }
 0x12f   : > { %v757_v26 = vadd.f32 %v1393_v6, %v756_v57  ;;  %v826_v28 = vadd.f32 %v825_v23, %v795_v24 }
 0x131   : > { %v827_v30 = vadd.f32 %v826_v28, %v796_v46  ;;  %v758_v8 = vadd.f32 %v1397_v13, %v757_v26 }
 0x133   : > { %v759_v32 = vadd.f32 %v758_v8, %v557_v36  ;;  %v828_v35 = vadd.f32 %v827_v30, %v797_v53 }
 0x135   : > { %v829_v37 = vadd.f32 %v828_v35, %v798_v31  ;;  %v760_v38 = vadd.f32 %v759_v32, %v560_v45 }
 0x137   : > { %v761_v6 = vadd.f32 %v1409_v33, %v760_v38  ;;  %v830_v40 = vadd.f32 %v829_v37, %v799_v17 }
 0x139   : > { %v762_v43 = vadd.f32 %v1411_v41, %v761_v6  ;;  %v831_v44 = vadd.f32 %v830_v40, %v800_v39 }
 0x13b   : > { %v763_v13 = vrot.slane %v762_v43, 4  ;;  %v832_v47 = vadd.f32 %v831_v44, %v801_v42 }
 0x13d   : > { %v764_v36 = vadd.f32 %v763_v13, %v762_v43  ;;  %v833_v49 = vrot.slane %v832_v47, 4 }
 0x13f   : > { %v765_v50 = vrot.slane %v764_v36, 2  ;;  %v834_v51 = vadd.f32 %v833_v49, %v832_v47 }
 0x141   : > { %v766_v45 = vadd.f32 %v765_v50, %v764_v36  ;;  %v835_v52 = vrot.slane %v834_v51, 2 }
 0x143   : > { %v767_v54 = vrot.slane %v766_v45, 1  ;;  %v836_v55 = vadd.f32 %v835_v52, %v834_v51 }
 0x145   : > { %v768_v33 = vadd.f32 %v767_v54, %v766_v45  ;;  %v837_v56 = vrot.slane %v836_v55, 1 }
 0x147   : > { %769 = vst [vmem:[%s214_s19] sm:$0x1] %v768_v33  ;;  %v838_v41 = vadd.f32 %v837_v56, %v836_v55 }
 0x149   : > { %839 = vst [vmem:[%s217_s22] sm:$0x1] %v838_v41 }
 0x14a PF: > { %s15_s15 = sadd.s32 1, %s1266_s15  }
 0x14b   : > { %p12_p5 = scmp.ge.s32.totalorder %s15_s15, 4  }
 0x14d   :  { %14 = sbr.rel (!%p12_p5) target bundleno = 1 (0x1), region = 82 }

// kernel: _lambda_.6
= control target key start
LH: loop header
LB: loop body
LE: loop exit
PB: predicated region body
PF: predicated region fallthrough
CT: control target
= control target key end

     0   :  { %s1532_s21 = smov 0   ;;  %s1802_s0 = inlined_call_operand.vmem [shape: bf16[512,128], index: 0, kind: input, shape index: {}]   ;;  %s1803_s1 = inlined_call_operand.vmem [shape: f32[1,128], index: 1, kind: input, shape index: {}]   ;;  %s1804_s2 = inlined_call_operand.vmem [shape: f32[1,128], index: 2, kind: input, shape index: {}]   ;;  %s1805_s3 = inlined_call_operand.vmem [shape: bf16[128,128], index: 3, kind: input, shape index: {}]   ;;  %s1806_s4 = inlined_call_operand.vmem [shape: bf16[512,128], index: 4, kind: output, shape index: {0}]   ;;  %s1807_s5 = inlined_call_operand.vmem [shape: f32[2,1,128], index: 5, kind: output, shape index: {1}]   ;;  %s1808_s6 = inlined_call_operand.vmem [shape: f32[2,1,128], index: 6, kind: output, shape index: {2}]  }
   0x1 LB: > { %s1538_s22 = sadd.s32 4294967295, %s1495_s21   ;;  %p1130_p0 = scmp.ge.s32.totalorder %s1495_s21, 1  ;;  %s1495_s21 = sphi %s1532_s21, %s17_s21  }
   0x2   : > { %p218_p1 = scmp.lt.s32.totalorder %s1495_s21, 3 }
   0x4   : > { %p219_p2 = pnand %p1130_p0, %p218_p1 }
   0x5   : > { %v1481_v0 = vld [vmem:[%s1805_s3] sm:$0xff] (!%p219_p2)   ;;  %s1131_s25 = sshll.u32 (!%p219_p2), %s1538_s22, 5  ;;  %v1482_v1 = vld [vmem:[%s1805_s3 + $0x8] sm:$0xff] (!%p219_p2)   ;;  %v1483_v2 = vld [vmem:[%s1805_s3 + $0x10] sm:$0xff] (!%p219_p2)   ;;  %p266_p4 = scmp.lt.s32.totalorder (!%p219_p2), %s1538_s22, 1 }
   0x6   : > { %222 = sbr.rel (%p219_p2) target bundleno = 331 (0x14b), region = 36  ;;  %p255_p3 = scmp.lt.s32.totalorder (!%p219_p2), %s1131_s25, 63  ;;  %1409 = vmatprep.subr.bf16.mxu0 (!%p219_p2), %v1481_v0  ;;  %1457 = vmatprep.subr.bf16.mxu1 (!%p219_p2), %v1481_v0  ;;  %v1484_v3 = vld [vmem:[%s1805_s3 + $0x18] sm:$0xff] (!%p219_p2)   ;;  %v1569_v5 = vld [vmem:[%s1803_s1] ss:$0 sm:$0xff] (!%p219_p2)  ;;  %v1486_v29 = vld [vmem:[%s1805_s3 + $0x28] sm:$0xff] (!%p219_p2)  }
   0x7   : > { %1410 = vmatpush3.bf16.msra.mxu0 (!%p219_p2), %v1481_v0  ;;  %1465 = vmatpush3.bf16.msra.mxu1 (!%p219_p2), %v1481_v0  ;;  %v1577_v11 = vld [vmem:[%s1804_s2] ss:$0 sm:$0xff] (!%p219_p2)  ;;  %v1487_v50 = vld [vmem:[%s1805_s3 + $0x30] sm:$0xff] (!%p219_p2)  }
   0x8   : > { %1411 = vmatprep.subr.bf16.mxu0 (!%p219_p2), %v1482_v1  ;;  %1458 = vmatprep.subr.bf16.mxu1 (!%p219_p2), %v1482_v1  ;;  %v1485_v20 = vld [vmem:[%s1805_s3 + $0x20] sm:$0xff] (!%p219_p2)  }
   0xb   : > { %1412 = vmatpush3.bf16.msra.mxu0 (!%p219_p2), %v1482_v1  ;;  %1466 = vmatpush3.bf16.msra.mxu1 (!%p219_p2), %v1482_v1 }
   0xc   : > { %1413 = vmatprep.subr.bf16.mxu0 (!%p219_p2), %v1483_v2  ;;  %1459 = vmatprep.subr.bf16.mxu1 (!%p219_p2), %v1483_v2 }
   0xd   : > { %s1810_s25 = smov (!%p255_p3, %s1131_s25), 63  ;;  %s1812_s22 = smov (!%p266_p4, %s1538_s22), 1 }
   0xe   : > { %s1132_s30 = sshll.u32 %s1810_s25, 2  ;;  %s268_s7 = scalar_lea.vmem %s1807_s5, %s1812_s22 }
   0xf   : > { %s1560_s9 = scalar_lea.vmem %s1802_s0, %s1132_s30  ;;  %1414 = vmatpush3.bf16.msra.mxu0 %v1483_v2  ;;  %1467 = vmatpush3.bf16.msra.mxu1 %v1483_v2  ;;  %v1488_v2 = vld [vmem:[%s1805_s3 + $0x38] sm:$0xff]   ;;  %s1737_s29 = scalar_lea.vmem %s1806_s4, %s1132_s30 }
  0x10   : > { %v1212_v4 = vld [vmem:[%s1560_s9] sm:$0xff]   ;;  %v1355_v8 = vld [vmem:[%s1560_s9 + $0x8] sm:$0xff]   ;;  %v1356_v9 = vld [vmem:[%s1560_s9 + $0x10] sm:$0xff]   ;;  %1415 = vmatprep.subr.bf16.mxu0 %v1484_v3  ;;  %1460 = vmatprep.subr.bf16.mxu1 %v1484_v3  ;;  %s271_s10 = scalar_lea.vmem %s1808_s6, %s1812_s22 }
  0x11   : > { %v1213_v6 = vunpack.c.l.bf16 %v1212_v4  ;;  %v1214_v7 = vunpack.c.h.bf16 %v1212_v4  ;;  %v1357_v10 = vld [vmem:[%s1560_s9 + $0x18] sm:$0xff]   ;;  %v1217_v12 = vunpack.c.l.bf16 %v1355_v8  ;;  %v1218_v13 = vunpack.c.h.bf16 %v1355_v8  ;;  %v1358_v40 = vld [vmem:[%s1560_s9 + $0x20] sm:$0xff]   ;;  %v1359_v41 = vld [vmem:[%s1560_s9 + $0x28] sm:$0xff]  }
  0x12   : > { %v1221_v14 = vunpack.c.l.bf16 %v1356_v9  ;;  %v1222_v15 = vunpack.c.h.bf16 %v1356_v9  ;;  %v1225_v18 = vunpack.c.l.bf16 %v1357_v10  ;;  %v1226_v19 = vunpack.c.h.bf16 %v1357_v10  ;;  %v1360_v55 = vld [vmem:[%s1560_s9 + $0x30] sm:$0xff]  }
  0x13   : > { %v344_v16 = vmul.f32 %v1213_v6, %v1569_v5  ;;  %v345_v17 = vmul.f32 %v1214_v7, %v1569_v5  ;;  %v346_v21 = vmul.f32 %v1217_v12, %v1569_v5  ;;  %v347_v22 = vmul.f32 %v1218_v13, %v1569_v5  ;;  %1416 = vmatpush3.bf16.msra.mxu0 %v1484_v3  ;;  %v1361_v13 = vld [vmem:[%s1560_s9 + $0x38] sm:$0xff]  }
  0x14   : > { %v348_v23 = vmul.f32 %v1221_v14, %v1569_v5  ;;  %v349_v24 = vmul.f32 %v1222_v15, %v1569_v5  ;;  %v350_v27 = vmul.f32 %v1225_v18, %v1569_v5  ;;  %v351_v28 = vmul.f32 %v1226_v19, %v1569_v5  ;;  %1468 = vmatpush3.bf16.msra.mxu1 %v1484_v3 }
  0x15   : > { %v383_v25 = vadd.f32 %v1577_v11, %v344_v16  ;;  %v384_v26 = vadd.f32 %v1577_v11, %v345_v17  ;;  %v385_v30 = vadd.f32 %v1577_v11, %v346_v21  ;;  %v386_v31 = vadd.f32 %v1577_v11, %v347_v22  ;;  %1417 = vmatprep.subr.bf16.mxu0 %v1485_v20 }
  0x16   : > { %v387_v32 = vadd.f32 %v1577_v11, %v348_v23  ;;  %v388_v33 = vadd.f32 %v1577_v11, %v349_v24  ;;  %1461 = vmatprep.subr.bf16.mxu1 %v1485_v20  ;;  %v389_v48 = vadd.f32 %v1577_v11, %v350_v27  ;;  %v390_v49 = vadd.f32 %v1577_v11, %v351_v28  ;;  %v1362_v23 = vld [vmem:[%s1560_s9 + $0x40] sm:$0xff]  }
  0x17   : > { %vm415_vm0 = vcmp.gt.f32.partialorder %v383_v25, 0.0  ;;  %vm416_vm1 = vcmp.gt.f32.partialorder %v384_v26, 0.0  ;;  %v447_v34 = vmul.f32 0.01, %v383_v25  ;;  %v448_v35 = vmul.f32 0.01, %v384_v26  ;;  %1418 = vmatpush3.bf16.msra.mxu0 %v1485_v20 }
  0x18   : > { %vm417_vm2 = vcmp.gt.f32.partialorder %v385_v30, 0.0  ;;  %vm418_vm3 = vcmp.gt.f32.partialorder %v386_v31, 0.0  ;;  %v449_v36 = vmul.f32 0.01, %v385_v30  ;;  %v450_v37 = vmul.f32 0.01, %v386_v31  ;;  %1469 = vmatpush3.bf16.msra.mxu1 %v1485_v20  ;;  %1419 = vmatprep.subr.bf16.mxu0 %v1486_v29 }
  0x19   : > { %v479_v38 = vsel %vm415_vm0, %v383_v25, %v447_v34  ;;  %v480_v39 = vsel %vm416_vm1, %v384_v26, %v448_v35  ;;  %vm419_vm4 = vcmp.gt.f32.partialorder %v387_v32, 0.0  ;;  %vm420_vm5 = vcmp.gt.f32.partialorder %v388_v33, 0.0  ;;  %1462 = vmatprep.subr.bf16.mxu1 %v1486_v29  ;;  %v1363_v34 = vld [vmem:[%s1560_s9 + $0x48] sm:$0xff]   ;;  %v1364_v35 = vld [vmem:[%s1560_s9 + $0x50] sm:$0xff]  }
  0x1a   : > { %v511_v42 = vpack.c.bf16 %v480_v39, %v479_v38  ;;  %v1601_v43 = vsel %vm417_vm2, %v385_v30, %v449_v36  ;;  %v1603_v44 = vsel %vm418_vm3, %v386_v31, %v450_v37  ;;  %v451_v45 = vmul.f32 0.01, %v387_v32 }
  0x1b   : > { %v512_v46 = vpack.c.bf16 %v1603_v44, %v1601_v43  ;;  %v452_v47 = vmul.f32 0.01, %v388_v33  ;;  %v1229_v52 = vunpack.c.l.bf16 %v1358_v40  ;;  %v1230_v53 = vunpack.c.h.bf16 %v1358_v40  ;;  %1420 = vmatpush3.bf16.msra.mxu0 %v1486_v29 }
  0x1c   : > { %1425 = vmatprep.mubr.bf16.mxu0 %v511_v42  ;;  %v1613_v51 = vsel %vm419_vm4, %v387_v32, %v451_v45  ;;  %v1233_v54 = vunpack.c.l.bf16 %v1359_v41  ;;  %vm421_vm6 = vcmp.gt.f32.partialorder %v389_v48, 0.0  ;;  %vm422_vm7 = vcmp.gt.f32.partialorder %v390_v49, 0.0  ;;  %1470 = vmatpush3.bf16.msra.mxu1 %v1486_v29 }
  0x1d   : > { %v1617_v56 = vsel %vm420_vm5, %v388_v33, %v452_v47  ;;  %v453_v57 = vmul.f32 0.01, %v389_v48  ;;  %v454_v59 = vmul.f32 0.01, %v390_v49  ;;  %v352_v60 = vmul.f32 %v1229_v52, %v1569_v5  ;;  %1421 = vmatprep.subr.bf16.mxu0 %v1487_v50  ;;  %1463 = vmatprep.subr.bf16.mxu1 %v1487_v50 }
  0x1e   : > { %v513_v58 = vpack.c.bf16 %v1617_v56, %v1613_v51  ;;  %v353_v61 = vmul.f32 %v1230_v53, %v1569_v5  ;;  %v1234_v63 = vunpack.c.h.bf16 %v1359_v41  ;;  %v354_v0 = vmul.f32 %v1233_v54, %v1569_v5 }
  0x1f   : > { %v1623_v62 = vsel %vm421_vm6, %v389_v48, %v453_v57  ;;  %v1237_v1 = vunpack.c.l.bf16 %v1360_v55  ;;  %v1629_v3 = vsel %vm422_vm7, %v390_v49, %v454_v59  ;;  %v391_v4 = vadd.f32 %v1577_v11, %v352_v60  ;;  %1422 = vmatpush3.bf16.msra.mxu0 %v1487_v50 }
  0x20   : > { %v392_v6 = vadd.f32 %v1577_v11, %v353_v61  ;;  %v1238_v7 = vunpack.c.h.bf16 %v1360_v55  ;;  %v514_v8 = vpack.c.bf16 %v1629_v3, %v1623_v62  ;;  %v355_v9 = vmul.f32 %v1234_v63, %v1569_v5  ;;  %1471 = vmatpush3.bf16.msra.mxu1 %v1487_v50  ;;  %1423 = vmatprep.subr.bf16.mxu0 %v1488_v2 }
  0x21   : > { %v393_v10 = vadd.f32 %v1577_v11, %v354_v0  ;;  %v356_v12 = vmul.f32 %v1237_v1, %v1569_v5  ;;  %vm423_vm8 = vcmp.gt.f32.partialorder %v391_v4, 0.0  ;;  %v455_v14 = vmul.f32 0.01, %v391_v4  ;;  %1464 = vmatprep.subr.bf16.mxu1 %v1488_v2  ;;  %v1365_v0 = vld [vmem:[%s1560_s9 + $0x58] sm:$0xff]  }
  0x22   : > { %vm424_vm9 = vcmp.gt.f32.partialorder %v392_v6, 0.0  ;;  %v456_v15 = vmul.f32 0.01, %v392_v6  ;;  %v394_v16 = vadd.f32 %v1577_v11, %v355_v9  ;;  %v357_v18 = vmul.f32 %v1238_v7, %v1569_v5  ;;  %v1366_v7 = vld [vmem:[%s1560_s9 + $0x60] sm:$0xff]  }
  0x23   : > { %vm425_vm10 = vcmp.gt.f32.partialorder %v393_v10, 0.0  ;;  %v457_v17 = vmul.f32 0.01, %v393_v10  ;;  %v1641_v19 = vsel %vm423_vm8, %v391_v4, %v455_v14  ;;  %v395_v21 = vadd.f32 %v1577_v11, %v356_v12  ;;  %1424 = vmatpush3.bf16.msra.mxu0 %v1488_v2 }
  0x24   : > { %v1643_v20 = vsel %vm424_vm9, %v392_v6, %v456_v15  ;;  %v1241_v22 = vunpack.c.l.bf16 %v1361_v13  ;;  %vm426_vm11 = vcmp.gt.f32.partialorder %v394_v16, 0.0  ;;  %v458_v25 = vmul.f32 0.01, %v394_v16  ;;  %1472 = vmatpush3.bf16.msra.mxu1 %v1488_v2 }
  0x25   : > { %v515_v24 = vpack.c.bf16 %v1643_v20, %v1641_v19  ;;  %v1649_v26 = vsel %vm425_vm10, %v393_v10, %v457_v17  ;;  %v396_v27 = vadd.f32 %v1577_v11, %v357_v18  ;;  %vm427_vm12 = vcmp.gt.f32.partialorder %v395_v21, 0.0 }
  0x26   : > { %v459_v28 = vmul.f32 0.01, %v395_v21  ;;  %v1242_v29 = vunpack.c.h.bf16 %v1361_v13  ;;  %v1652_v30 = vsel %vm426_vm11, %v394_v16, %v458_v25  ;;  %v358_v31 = vmul.f32 %v1241_v22, %v1569_v5  ;;  %1426 = vmatmul.mubr.bf16.vlgmr.msra.gmra.mrb[0].mxu0 %v512_v46  ;;  %v1367_v22 = vld [vmem:[%s1560_s9 + $0x68] sm:$0xff]  }
  0x27   : > { %v1245_v32 = vunpack.c.l.bf16 %v1362_v23  ;;  %v1246_v33 = vunpack.c.h.bf16 %v1362_v23  ;;  %v516_v36 = vpack.c.bf16 %v1652_v30, %v1649_v26  ;;  %vm428_vm13 = vcmp.gt.f32.partialorder %v396_v27, 0.0  ;;  %1429 = vmatprep.mubr.bf16.mxu0 %v513_v58 }
  0x28   : > { %v460_v37 = vmul.f32 0.01, %v396_v27  ;;  %v1659_v38 = vsel %vm427_vm12, %v395_v21, %v459_v28  ;;  %v359_v39 = vmul.f32 %v1242_v29, %v1569_v5  ;;  %v397_v40 = vadd.f32 %v1577_v11, %v358_v31 }
  0x29   : > { %v360_v41 = vmul.f32 %v1245_v32, %v1569_v5  ;;  %v361_v42 = vmul.f32 %v1246_v33, %v1569_v5  ;;  %v1249_v47 = vunpack.c.l.bf16 %v1363_v34  ;;  %v1250_v48 = vunpack.c.h.bf16 %v1363_v34 }
  0x2a   : > { %v1668_v45 = vsel %vm428_vm13, %v396_v27, %v460_v37  ;;  %v1253_v49 = vunpack.c.l.bf16 %v1364_v35  ;;  %v398_v52 = vadd.f32 %v1577_v11, %v359_v39  ;;  %vm429_vm14 = vcmp.gt.f32.partialorder %v397_v40, 0.0 }
  0x2b   : > { %v517_v50 = vpack.c.bf16 %v1668_v45, %v1659_v38  ;;  %v461_v53 = vmul.f32 0.01, %v397_v40  ;;  %v399_v54 = vadd.f32 %v1577_v11, %v360_v41  ;;  %v400_v43 = vadd.f32 %v1577_v11, %v361_v42 }
  0x2c   : > { %v362_v44 = vmul.f32 %v1249_v47, %v1569_v5  ;;  %v363_v46 = vmul.f32 %v1250_v48, %v1569_v5  ;;  %vm430_vm15 = vcmp.gt.f32.partialorder %v398_v52, 0.0  ;;  %v462_v55 = vmul.f32 0.01, %v398_v52 }
  0x2d   : > { %v1680_v51 = vsel %vm429_vm14, %v397_v40, %v461_v53  ;;  %v1254_v56 = vunpack.c.h.bf16 %v1364_v35  ;;  %vm431_vm0 = vcmp.gt.f32.partialorder %v399_v54, 0.0  ;;  %vm432_vm1 = vcmp.gt.f32.partialorder %v400_v43, 0.0  ;;  %v1368_v40 = vld [vmem:[%s1560_s9 + $0x70] sm:$0xff]  }
  0x2e   : > { %v463_v57 = vmul.f32 0.01, %v399_v54  ;;  %v464_v58 = vmul.f32 0.01, %v400_v43  ;;  %v1682_v59 = vsel %vm430_vm15, %v398_v52, %v462_v55  ;;  %v401_v60 = vadd.f32 %v1577_v11, %v362_v44  ;;  %1430 = vmatmul.mubr.bf16.gmra.mrb[4].mxu0 %v514_v8 }
  0x2f   : > { %v402_v61 = vadd.f32 %v1577_v11, %v363_v46  ;;  %v364_v63 = vmul.f32 %v1253_v49, %v1569_v5  ;;  %v518_v1 = vpack.c.bf16 %v1682_v59, %v1680_v51  ;;  %v365_v6 = vmul.f32 %v1254_v56, %v1569_v5  ;;  %1433 = vmatprep.mubr.bf16.mxu0 %v515_v24 }
  0x30   : > { %v495_v2 = vsel %vm431_vm0, %v399_v54, %v463_v57  ;;  %v496_v4 = vsel %vm432_vm1, %v400_v43, %v464_v58  ;;  %vm433_vm2 = vcmp.gt.f32.partialorder %v401_v60, 0.0  ;;  %v465_v10 = vmul.f32 0.01, %v401_v60  ;;  %v1369_v43 = vld [vmem:[%s1560_s9 + $0x78] sm:$0xff]  }
  0x31   : > { %v519_v9 = vpack.c.bf16 %v496_v4, %v495_v2  ;;  %vm434_vm3 = vcmp.gt.f32.partialorder %v402_v61, 0.0  ;;  %v466_v12 = vmul.f32 0.01, %v402_v61  ;;  %v403_v13 = vadd.f32 %v1577_v11, %v364_v63 }
  0x32   : > { %v404_v14 = vadd.f32 %v1577_v11, %v365_v6  ;;  %v1257_v15 = vunpack.c.l.bf16 %v1365_v0  ;;  %v497_v16 = vsel %vm433_vm2, %v401_v60, %v465_v10  ;;  %v1258_v17 = vunpack.c.h.bf16 %v1365_v0 }
  0x33   : > { %1441 = vmatprep.mubr.bf16.mxu1 %v519_v9  ;;  %v1261_v18 = vunpack.c.l.bf16 %v1366_v7  ;;  %v1262_v21 = vunpack.c.h.bf16 %v1366_v7  ;;  %v498_v23 = vsel %vm434_vm3, %v402_v61, %v466_v12  ;;  %vm435_vm4 = vcmp.gt.f32.partialorder %v403_v13, 0.0 }
  0x34   : > { %vm436_vm5 = vcmp.gt.f32.partialorder %v404_v14, 0.0  ;;  %v467_v62 = vmul.f32 0.01, %v403_v13  ;;  %v520_v3 = vpack.c.bf16 %v498_v23, %v497_v16  ;;  %v468_v8 = vmul.f32 0.01, %v404_v14 }
  0x35   : > { %v366_v25 = vmul.f32 %v1257_v15, %v1569_v5  ;;  %v367_v27 = vmul.f32 %v1258_v17, %v1569_v5  ;;  %v368_v19 = vmul.f32 %v1261_v18, %v1569_v5  ;;  %v369_v20 = vmul.f32 %v1262_v21, %v1569_v5 }
  0x36   : > { %v499_v28 = vsel %vm435_vm4, %v403_v13, %v467_v62  ;;  %v1265_v24 = vunpack.c.l.bf16 %v1367_v22  ;;  %1442 = vmatmul.mubr.bf16.vlgmr.msra.gmra.mrb[0].mxu1 %v520_v3  ;;  %v500_v29 = vsel %vm436_vm5, %v404_v14, %v468_v8  ;;  %v1266_v33 = vunpack.c.h.bf16 %v1367_v22  ;;  %1434 = vmatmul.mubr.bf16.gmra.mrb[8].mxu0 %v516_v36 }
  0x37   : > { %v405_v31 = vadd.f32 %v1577_v11, %v366_v25  ;;  %v406_v32 = vadd.f32 %v1577_v11, %v367_v27  ;;  %v521_v34 = vpack.c.bf16 %v500_v29, %v499_v28  ;;  %v407_v35 = vadd.f32 %v1577_v11, %v368_v19  ;;  %1437 = vmatprep.mubr.bf16.mxu0 %v517_v50 }
  0x38   : > { %v408_v37 = vadd.f32 %v1577_v11, %v369_v20  ;;  %v370_v39 = vmul.f32 %v1265_v24, %v1569_v5  ;;  %v371_v53 = vmul.f32 %v1266_v33, %v1569_v5  ;;  %v1269_v30 = vunpack.c.l.bf16 %v1368_v40 }
  0x39   : > { %vm437_vm6 = vcmp.gt.f32.partialorder %v405_v31, 0.0  ;;  %vm438_vm7 = vcmp.gt.f32.partialorder %v406_v32, 0.0  ;;  %v469_v41 = vmul.f32 0.01, %v405_v31  ;;  %v470_v42 = vmul.f32 0.01, %v406_v32  ;;  %1445 = vmatprep.mubr.bf16.mxu1 %v521_v34 }
  0x3a   : > { %vm439_vm8 = vcmp.gt.f32.partialorder %v407_v35, 0.0  ;;  %vm440_vm9 = vcmp.gt.f32.partialorder %v408_v37, 0.0  ;;  %v471_v47 = vmul.f32 0.01, %v407_v35  ;;  %v472_v48 = vmul.f32 0.01, %v408_v37 }
  0x3b   : > { %v501_v49 = vsel %vm437_vm6, %v405_v31, %v469_v41  ;;  %v502_v52 = vsel %vm438_vm7, %v406_v32, %v470_v42  ;;  %v409_v54 = vadd.f32 %v1577_v11, %v370_v39  ;;  %v410_v55 = vadd.f32 %v1577_v11, %v371_v53 }
  0x3c   : > { %v522_v44 = vpack.c.bf16 %v502_v52, %v501_v49  ;;  %v503_v46 = vsel %vm439_vm8, %v407_v35, %v471_v47  ;;  %v504_v26 = vsel %vm440_vm9, %v408_v37, %v472_v48  ;;  %v1270_v57 = vunpack.c.h.bf16 %v1368_v40 }
  0x3d   : > { %v523_v36 = vpack.c.bf16 %v504_v26, %v503_v46  ;;  %vm441_vm10 = vcmp.gt.f32.partialorder %v409_v54, 0.0  ;;  %v473_v56 = vmul.f32 0.01, %v409_v54  ;;  %v372_v38 = vmul.f32 %v1269_v30, %v1569_v5 }
  0x3e   : > { %v1273_v45 = vunpack.c.l.bf16 %v1369_v43  ;;  %v1274_v50 = vunpack.c.h.bf16 %v1369_v43  ;;  %1446 = vmatmul.mubr.bf16.gmra.mrb[4].mxu1 %v522_v44  ;;  %vm442_vm11 = vcmp.gt.f32.partialorder %v410_v55, 0.0  ;;  %v474_v58 = vmul.f32 0.01, %v410_v55  ;;  %1438 = vmatmul.mubr.bf16.gmra.mrb[12].mxu0 %v518_v1 }
  0x3f   : > { %v505_v60 = vsel %vm441_vm10, %v409_v54, %v473_v56  ;;  %1449 = vmatprep.mubr.bf16.mxu1 %v523_v36  ;;  %v373_v61 = vmul.f32 %v1270_v57, %v1569_v5  ;;  %v411_v63 = vadd.f32 %v1577_v11, %v372_v38 }
  0x40   : > { %v374_v0 = vmul.f32 %v1273_v45, %v1569_v5  ;;  %v375_v2 = vmul.f32 %v1274_v50, %v1569_v5  ;;  %v506_v4 = vsel %vm442_vm11, %v410_v55, %v474_v58 }
  0x41   : > { %v412_v6 = vadd.f32 %v1577_v11, %v373_v61  ;;  %vm443_vm12 = vcmp.gt.f32.partialorder %v411_v63, 0.0  ;;  %v475_v7 = vmul.f32 0.01, %v411_v63  ;;  %v524_v9 = vpack.c.bf16 %v506_v4, %v505_v60 }
  0x42   : > { %v413_v10 = vadd.f32 %v1577_v11, %v374_v0  ;;  %v414_v12 = vadd.f32 %v1577_v11, %v375_v2 }
  0x43   : > { %vm444_vm13 = vcmp.gt.f32.partialorder %v412_v6, 0.0  ;;  %v476_v13 = vmul.f32 0.01, %v412_v6  ;;  %v507_v14 = vsel %vm443_vm12, %v411_v63, %v475_v7 }
  0x44   : > { %vm445_vm14 = vcmp.gt.f32.partialorder %v413_v10, 0.0  ;;  %vm446_vm15 = vcmp.gt.f32.partialorder %v414_v12, 0.0  ;;  %v477_v5 = vmul.f32 0.01, %v413_v10  ;;  %v478_v15 = vmul.f32 0.01, %v414_v12 }
  0x45   : > { %v508_v16 = vsel %vm444_vm13, %v412_v6, %v476_v13 }
  0x46   : > { %1450 = vmatmul.mubr.bf16.gmra.mrb[8].mxu1 %v524_v9  ;;  %v525_v51 = vpack.c.bf16 %v508_v16, %v507_v14  ;;  %v509_v59 = vsel %vm445_vm14, %v413_v10, %v477_v5  ;;  %v510_v1 = vsel %vm446_vm15, %v414_v12, %v478_v15 }
  0x47   : > { %v526_v17 = vpack.c.bf16 %v510_v1, %v509_v59 }
  0x48   : > { %1453 = vmatprep.mubr.bf16.mxu1 %v525_v51 }
  0x4e   : > { %1454 = vmatmul.mubr.bf16.gmra.mrb[12].mxu1 %v526_v17 }
  0xf9   : > { %v1427_v18 = vpop.f32.mrb[0].mxu0 }
  0xfa   : > { %v625_v21 = vpop.f32.mrb[1].mxu0  ;;  %v952_v27 = vmul.f32 %v1427_v18, %v1427_v18 }
  0xfb   : > { %v1428_v11 = vpop.f32.mrb[2].mxu0  ;;  %v950_v62 = vmul.f32 %v625_v21, %v625_v21 }
  0xfc   : > { %v1283_v22 = vpack.c.bf16 %v1428_v11, %v1427_v18  ;;  %v628_v23 = vpop.f32.mrb[3].mxu0  ;;  %v953_v20 = vmul.f32 %v1428_v11, %v1428_v11 }
  0xfd   : > { %v1278_v3 = vpack.c.bf16 %v628_v23, %v625_v21  ;;  %v912_v8 = vadd.f32 %v628_v23, %v625_v21  ;;  %v951_v25 = vmul.f32 %v628_v23, %v628_v23 }
  0xfe   : > { %1370 = vst [vmem:[%s1737_s29 + $0x8] sm:$0xff] %v1283_v22  }
  0xff   : > { %1279 = vst [vmem:[%s1737_s29] sm:$0xff] %v1278_v3   ;;  %v913_v28 = vadd.f32 %v1427_v18, %v912_v8  ;;  %v982_v19 = vadd.f32 %v951_v25, %v950_v62 }
 0x101   : > { %v983_v24 = vadd.f32 %v982_v19, %v952_v27  ;;  %v1431_v29 = vpop.f32.mrb[4].mxu0  ;;  %v914_v31 = vadd.f32 %v1428_v11, %v913_v28 }
 0x102   : > { %v641_v32 = vpop.f32.mrb[5].mxu0  ;;  %v956_v52 = vmul.f32 %v1431_v29, %v1431_v29 }
 0x103   : > { %v915_v33 = vadd.f32 %v914_v31, %v641_v32  ;;  %v954_v34 = vmul.f32 %v641_v32, %v641_v32  ;;  %v984_v35 = vadd.f32 %v983_v24, %v953_v20  ;;  %v1432_v37 = vpop.f32.mrb[6].mxu0 }
 0x104   : > { %v1293_v39 = vpack.c.bf16 %v1432_v37, %v1431_v29  ;;  %v644_v40 = vpop.f32.mrb[7].mxu0  ;;  %v957_v46 = vmul.f32 %v1432_v37, %v1432_v37 }
 0x105   : > { %v985_v41 = vadd.f32 %v984_v35, %v954_v34  ;;  %v1288_v42 = vpack.c.bf16 %v644_v40, %v641_v32  ;;  %v916_v47 = vadd.f32 %v915_v33, %v644_v40  ;;  %v955_v48 = vmul.f32 %v644_v40, %v644_v40 }
 0x106   : > { %1372 = vst [vmem:[%s1737_s29 + $0x18] sm:$0xff] %v1293_v39  }
 0x107   : > { %1371 = vst [vmem:[%s1737_s29 + $0x10] sm:$0xff] %v1288_v42   ;;  %v917_v53 = vadd.f32 %v1431_v29, %v916_v47  ;;  %v986_v54 = vadd.f32 %v985_v41, %v955_v48 }
 0x109   : > { %v1742_v49 = vpop.f32.mrb[0].mxu1  ;;  %v987_v26 = vadd.f32 %v986_v54, %v956_v52  ;;  %v1435_v30 = vpop.f32.mrb[8].mxu0  ;;  %v918_v36 = vadd.f32 %v1432_v37, %v917_v53 }
 0x10a   : > { %v1745_v43 = vpop.f32.mrb[1].mxu1  ;;  %v657_v57 = vpop.f32.mrb[9].mxu0  ;;  %v960_v9 = vmul.f32 %v1435_v30, %v1435_v30 }
 0x10b   : > { %v1747_v44 = vpop.f32.mrb[2].mxu1  ;;  %v919_v45 = vadd.f32 %v918_v36, %v657_v57  ;;  %v958_v50 = vmul.f32 %v657_v57, %v657_v57  ;;  %v988_v58 = vadd.f32 %v987_v26, %v957_v46  ;;  %v1436_v60 = vpop.f32.mrb[10].mxu0  ;;  %v966_v32 = vmul.f32 %v1745_v43, %v1745_v43 }
 0x10c   : > { %v1323_v55 = vpack.c.bf16 %v1747_v44, %v1742_v49  ;;  %v1751_v56 = vpop.f32.mrb[3].mxu1  ;;  %v1303_v61 = vpack.c.bf16 %v1436_v60, %v1435_v30  ;;  %v660_v63 = vpop.f32.mrb[11].mxu0  ;;  %v961_v5 = vmul.f32 %v1436_v60, %v1436_v60  ;;  %v968_v46 = vmul.f32 %v1742_v49, %v1742_v49 }
 0x10d   : > { %v1318_v38 = vpack.c.bf16 %v1751_v56, %v1745_v43  ;;  %v989_v0 = vadd.f32 %v988_v58, %v958_v50  ;;  %v1298_v2 = vpack.c.bf16 %v660_v63, %v657_v57  ;;  %v920_v4 = vadd.f32 %v919_v45, %v660_v63 }
 0x10e   : > { %1378 = vst [vmem:[%s1737_s29 + $0x48] sm:$0xff] %v1323_v55   ;;  %v959_v6 = vmul.f32 %v660_v63, %v660_v63  ;;  %1374 = vst [vmem:[%s1737_s29 + $0x28] sm:$0xff] %v1303_v61   ;;  %v967_v53 = vmul.f32 %v1751_v56, %v1751_v56 }
 0x10f   : > { %1377 = vst [vmem:[%s1737_s29 + $0x40] sm:$0xff] %v1318_v38   ;;  %1373 = vst [vmem:[%s1737_s29 + $0x20] sm:$0xff] %v1298_v2   ;;  %v921_v10 = vadd.f32 %v1435_v30, %v920_v4 }
 0x110   : > { %v990_v12 = vadd.f32 %v989_v0, %v959_v6 }
 0x111   : > { %v1758_v7 = vpop.f32.mrb[4].mxu1  ;;  %v1439_v16 = vpop.f32.mrb[12].mxu0  ;;  %v922_v51 = vadd.f32 %v1436_v60, %v921_v10 }
 0x112   : > { %v705_v13 = vpop.f32.mrb[5].mxu1  ;;  %v991_v15 = vadd.f32 %v990_v12, %v960_v9  ;;  %v673_v17 = vpop.f32.mrb[13].mxu0  ;;  %v964_v20 = vmul.f32 %v1439_v16, %v1439_v16  ;;  %v972_v2 = vmul.f32 %v1758_v7, %v1758_v7 }
 0x113   : > { %v1761_v14 = vpop.f32.mrb[6].mxu1  ;;  %v923_v21 = vadd.f32 %v922_v51, %v673_v17  ;;  %v962_v11 = vmul.f32 %v673_v17, %v673_v17  ;;  %v1440_v23 = vpop.f32.mrb[14].mxu0  ;;  %v970_v45 = vmul.f32 %v705_v13, %v705_v13 }
 0x114   : > { %v1333_v59 = vpack.c.bf16 %v1761_v14, %v1758_v7  ;;  %v708_v1 = vpop.f32.mrb[7].mxu1  ;;  %v992_v22 = vadd.f32 %v991_v15, %v961_v5  ;;  %v1313_v62 = vpack.c.bf16 %v1440_v23, %v1439_v16  ;;  %v676_v3 = vpop.f32.mrb[15].mxu0  ;;  %v965_v34 = vmul.f32 %v1440_v23, %v1440_v23 }
 0x115   : > { %v1328_v18 = vpack.c.bf16 %v708_v1, %v705_v13  ;;  %v1308_v25 = vpack.c.bf16 %v676_v3, %v673_v17  ;;  %v924_v27 = vadd.f32 %v923_v21, %v676_v3  ;;  %v963_v28 = vmul.f32 %v676_v3, %v676_v3 }
 0x116   : > { %1380 = vst [vmem:[%s1737_s29 + $0x58] sm:$0xff] %v1333_v59   ;;  %v993_v8 = vadd.f32 %v992_v22, %v962_v11  ;;  %1376 = vst [vmem:[%s1737_s29 + $0x38] sm:$0xff] %v1313_v62  }
 0x117   : > { %1379 = vst [vmem:[%s1737_s29 + $0x50] sm:$0xff] %v1328_v18   ;;  %1375 = vst [vmem:[%s1737_s29 + $0x30] sm:$0xff] %v1308_v25   ;;  %v925_v24 = vadd.f32 %v1439_v16, %v924_v27 }
 0x118   : > { %v994_v29 = vadd.f32 %v993_v8, %v963_v28 }
 0x119   : > { %v1451_v19 = vpop.f32.mrb[8].mxu1  ;;  %v926_v37 = vadd.f32 %v1440_v23, %v925_v24 }
 0x11a   : > { %v721_v31 = vpop.f32.mrb[9].mxu1  ;;  %v995_v35 = vadd.f32 %v994_v29, %v964_v20  ;;  %v976_v59 = vmul.f32 %v1451_v19, %v1451_v19 }
 0x11b   : > { %v1452_v33 = vpop.f32.mrb[10].mxu1  ;;  %v927_v42 = vadd.f32 %v926_v37, %v1745_v43  ;;  %v969_v43 = vmul.f32 %v1747_v44, %v1747_v44  ;;  %v974_v12 = vmul.f32 %v721_v31, %v721_v31 }
 0x11c   : > { %v1343_v39 = vpack.c.bf16 %v1452_v33, %v1451_v19  ;;  %v724_v40 = vpop.f32.mrb[11].mxu1  ;;  %v996_v47 = vadd.f32 %v995_v35, %v965_v34  ;;  %v977_v18 = vmul.f32 %v1452_v33, %v1452_v33 }
 0x11d   : > { %v1338_v41 = vpack.c.bf16 %v724_v40, %v721_v31  ;;  %v928_v52 = vadd.f32 %v927_v42, %v1751_v56  ;;  %v975_v51 = vmul.f32 %v724_v40, %v724_v40 }
 0x11e   : > { %1382 = vst [vmem:[%s1737_s29 + $0x68] sm:$0xff] %v1343_v39   ;;  %v997_v48 = vadd.f32 %v996_v47, %v966_v32 }
 0x11f   : > { %1381 = vst [vmem:[%s1737_s29 + $0x60] sm:$0xff] %v1338_v41   ;;  %v929_v26 = vadd.f32 %v1742_v49, %v928_v52  ;;  %v971_v49 = vmul.f32 %v708_v1, %v708_v1 }
 0x120   : > { %v998_v30 = vadd.f32 %v997_v48, %v967_v53 }
 0x121   : > { %v1455_v54 = vpop.f32.mrb[12].mxu1  ;;  %v930_v38 = vadd.f32 %v1747_v44, %v929_v26  ;;  %v973_v44 = vmul.f32 %v1761_v14, %v1761_v14 }
 0x122   : > { %v737_v36 = vpop.f32.mrb[13].mxu1  ;;  %v999_v57 = vadd.f32 %v998_v30, %v968_v46  ;;  %v980_v8 = vmul.f32 %v1455_v54, %v1455_v54 }
 0x123   : > { %v1456_v55 = vpop.f32.mrb[14].mxu1  ;;  %v931_v60 = vadd.f32 %v930_v38, %v705_v13  ;;  %v978_v11 = vmul.f32 %v737_v36, %v737_v36 }
 0x124   : > { %v1353_v50 = vpack.c.bf16 %v1456_v55, %v1455_v54  ;;  %v740_v56 = vpop.f32.mrb[15].mxu1  ;;  %v1000_v61 = vadd.f32 %v999_v57, %v969_v43  ;;  %v981_v28 = vmul.f32 %v1456_v55, %v1456_v55 }
 0x125   : > { %v1348_v58 = vpack.c.bf16 %v740_v56, %v737_v36  ;;  %v932_v0 = vadd.f32 %v931_v60, %v708_v1 }
 0x126   : > { %1384 = vst [vmem:[%s1737_s29 + $0x78] sm:$0xff] %v1353_v50   ;;  %v1001_v63 = vadd.f32 %v1000_v61, %v970_v45 }
 0x127   : > { %1383 = vst [vmem:[%s1737_s29 + $0x70] sm:$0xff] %v1348_v58   ;;  %v933_v4 = vadd.f32 %v1758_v7, %v932_v0 }
 0x128   : > { %v1002_v6 = vadd.f32 %v1001_v63, %v971_v49 }
 0x129   : > { %v934_v10 = vadd.f32 %v1761_v14, %v933_v4  ;;  %v979_v14 = vmul.f32 %v740_v56, %v740_v56 }
 0x12a   : > { %v1003_v9 = vadd.f32 %v1002_v6, %v972_v2 }
 0x12b   : > { %v935_v13 = vadd.f32 %v934_v10, %v721_v31 }
 0x12c   : > { %v1004_v5 = vadd.f32 %v1003_v9, %v973_v44 }
 0x12d   : > { %v936_v16 = vadd.f32 %v935_v13, %v724_v40 }
 0x12e   : > { %v1005_v15 = vadd.f32 %v1004_v5, %v974_v12 }
 0x12f   : > { %v937_v1 = vadd.f32 %v1451_v19, %v936_v16 }
 0x130   : > { %v1006_v17 = vadd.f32 %v1005_v15, %v975_v51 }
 0x131   : > { %v938_v7 = vadd.f32 %v1452_v33, %v937_v1 }
 0x132   : > { %v1007_v21 = vadd.f32 %v1006_v17, %v976_v59 }
 0x133   : > { %v939_v22 = vadd.f32 %v938_v7, %v737_v36 }
 0x134   : > { %v1008_v23 = vadd.f32 %v1007_v21, %v977_v18 }
 0x135   : > { %v940_v3 = vadd.f32 %v939_v22, %v740_v56 }
 0x136   : > { %v1009_v62 = vadd.f32 %v1008_v23, %v978_v11 }
 0x137   : > { %v941_v25 = vadd.f32 %v1455_v54, %v940_v3 }
 0x138   : > { %v1010_v27 = vadd.f32 %v1009_v62, %v979_v14 }
 0x139   : > { %v942_v20 = vadd.f32 %v1456_v55, %v941_v25 }
 0x13a   : > { %v1011_v24 = vadd.f32 %v1010_v27, %v980_v8 }
 0x13b   : > { %v943_v29 = vrot.slane %v942_v20, 4 }
 0x13c   : > { %v1012_v19 = vadd.f32 %v1011_v24, %v981_v28 }
 0x13d   : > { %v944_v31 = vadd.f32 %v943_v29, %v942_v20 }
 0x13e   : > { %v1013_v32 = vrot.slane %v1012_v19, 4 }
 0x13f   : > { %v945_v34 = vrot.slane %v944_v31, 2 }
 0x140   : > { %v1014_v33 = vadd.f32 %v1013_v32, %v1012_v19 }
 0x141   : > { %v946_v35 = vadd.f32 %v945_v34, %v944_v31 }
 0x142   : > { %v1015_v37 = vrot.slane %v1014_v33, 2 }
 0x143   : > { %v947_v39 = vrot.slane %v946_v35, 1 }
 0x144   : > { %v1016_v40 = vadd.f32 %v1015_v37, %v1014_v33 }
 0x145   : > { %v948_v41 = vadd.f32 %v947_v39, %v946_v35 }
 0x146   : > { %v1017_v42 = vrot.slane %v1016_v40, 1 }
 0x147   : > { %949 = vst [vmem:[%s268_s7] sm:$0x1] %v948_v41 }
 0x148   : > { %v1018_v47 = vadd.f32 %v1017_v42, %v1016_v40 }
 0x14a   : > { %1019 = vst [vmem:[%s271_s10] sm:$0x1] %v1018_v47 }
 0x14b PF: > { %s17_s21 = sadd.s32 1, %s1495_s21  }
 0x14c   : > { %p14_p5 = scmp.ge.s32.totalorder %s17_s21, 4  }
 0x14e   :  { %16 = sbr.rel (!%p14_p5) target bundleno = 1 (0x1), region = 90 }

// kernel: _lambda_.7
= control target key start
LH: loop header
LB: loop body
LE: loop exit
PB: predicated region body
PF: predicated region fallthrough
CT: control target
= control target key end

     0   :  { %s871_s15 = smov 0   ;;  %s1043_s0 = inlined_call_operand.vmem [shape: bf16[512,128], index: 0, kind: input, shape index: {}]   ;;  %s1044_s1 = inlined_call_operand.vmem [shape: f32[1,128], index: 1, kind: input, shape index: {}]   ;;  %s1045_s2 = inlined_call_operand.vmem [shape: f32[1,128], index: 2, kind: input, shape index: {}]   ;;  %s1046_s3 = inlined_call_operand.vmem [shape: bf16[512,128], index: 3, kind: input, shape index: {}]   ;;  %s1047_s4 = inlined_call_operand.vmem [shape: f32[512,128], index: 4, kind: output, shape index: {}]  }
   0x1 LB: > { %s657_s16 = sadd.s32 4294967295, %s844_s15   ;;  %p661_p0 = scmp.ge.s32.totalorder %s844_s15, 1  ;;  %s844_s15 = sphi %s871_s15, %s14_s15  }
   0x2   : > { %p174_p1 = scmp.lt.s32.totalorder %s844_s15, 3 }
   0x4   : > { %p175_p2 = pnand %p661_p0, %p174_p1 }
   0x5   : > { %s662_s17 = sshll.u32 (!%p175_p2), %s657_s16, 5  ;;  %v895_v0 = vld [vmem:[%s1044_s1] ss:$0 sm:$0xff] (!%p175_p2) }
   0x6   : > { %178 = sbr.rel (%p175_p2) target bundleno = 86 (0x56), region = 36  ;;  %p206_p3 = scmp.lt.s32.totalorder (!%p175_p2), %s662_s17, 63  ;;  %v906_v11 = vld [vmem:[%s1045_s2] ss:$0 sm:$0xff] (!%p175_p2) }
   0xd   : > { %s1049_s17 = smov (!%p206_p3, %s662_s17), 63 }
   0xe   : > { %s663_s18 = sshll.u32 %s1049_s17, 2  ;;  %s667_s29 = sshll.u32 %s1049_s17, 3 }
   0xf   : > { %s885_s21 = scalar_lea.vmem %s1043_s0, %s663_s18  ;;  %s890_s24 = scalar_lea.vmem %s1046_s3, %s663_s18 }
  0x10   : > { %v673_v1 = vld [vmem:[%s885_s21] sm:$0xff]   ;;  %v800_v3 = vld [vmem:[%s885_s21 + $0x8] sm:$0xff]   ;;  %v801_v9 = vld [vmem:[%s885_s21 + $0x10] sm:$0xff]   ;;  %s930_s6 = scalar_lea.vmem %s1047_s4, %s667_s29 }
  0x11   : > { %v737_v2 = vld [vmem:[%s890_s24] sm:$0xff]   ;;  %v674_v4 = vunpack.c.l.bf16 %v673_v1  ;;  %v675_v6 = vunpack.c.h.bf16 %v673_v1  ;;  %v815_v8 = vld [vmem:[%s890_s24 + $0x8] sm:$0xff]   ;;  %v816_v10 = vld [vmem:[%s890_s24 + $0x10] sm:$0xff]   ;;  %v678_v12 = vunpack.c.l.bf16 %v800_v3  ;;  %v679_v14 = vunpack.c.h.bf16 %v800_v3 }
  0x12   : > { %v738_v5 = vunpack.c.l.bf16 %v737_v2  ;;  %v739_v7 = vunpack.c.h.bf16 %v737_v2  ;;  %v742_v13 = vunpack.c.l.bf16 %v815_v8  ;;  %v743_v15 = vunpack.c.h.bf16 %v815_v8  ;;  %v802_v16 = vld [vmem:[%s885_s21 + $0x18] sm:$0xff]   ;;  %v803_v50 = vld [vmem:[%s885_s21 + $0x20] sm:$0xff]   ;;  %v804_v62 = vld [vmem:[%s885_s21 + $0x28] sm:$0xff]  }
  0x13   : > { %v294_v17 = vmul.f32 %v674_v4, %v895_v0  ;;  %v295_v18 = vmul.f32 %v675_v6, %v895_v0  ;;  %v682_v19 = vunpack.c.l.bf16 %v801_v9  ;;  %v746_v20 = vunpack.c.l.bf16 %v816_v10  ;;  %v912_v21 = vld [vmem:[%s890_s24 + $0x18] sm:$0xff]   ;;  %v818_v55 = vld [vmem:[%s890_s24 + $0x20] sm:$0xff]   ;;  %v819_v63 = vld [vmem:[%s890_s24 + $0x28] sm:$0xff]  }
  0x14   : > { %v296_v22 = vmul.f32 %v678_v12, %v895_v0  ;;  %v297_v23 = vmul.f32 %v679_v14, %v895_v0  ;;  %v683_v24 = vunpack.c.h.bf16 %v801_v9  ;;  %v747_v25 = vunpack.c.h.bf16 %v816_v10  ;;  %v820_v14 = vld [vmem:[%s890_s24 + $0x30] sm:$0xff]  }
  0x15   : > { %v333_v26 = vadd.f32 %v906_v11, %v294_v17  ;;  %v334_v27 = vadd.f32 %v906_v11, %v295_v18  ;;  %v298_v28 = vmul.f32 %v682_v19, %v895_v0  ;;  %v686_v29 = vunpack.c.l.bf16 %v802_v16 }
  0x16   : > { %v335_v30 = vadd.f32 %v906_v11, %v296_v22  ;;  %v336_v31 = vadd.f32 %v906_v11, %v297_v23  ;;  %v299_v32 = vmul.f32 %v683_v24, %v895_v0  ;;  %v750_v33 = vunpack.c.l.bf16 %v912_v21 }
  0x17   : > { %v429_v34 = vadd.f32 %v738_v5, %v333_v26  ;;  %v430_v35 = vadd.f32 %v739_v7, %v334_v27  ;;  %v337_v36 = vadd.f32 %v906_v11, %v298_v28  ;;  %v300_v37 = vmul.f32 %v686_v29, %v895_v0 }
  0x18   : > { %v431_v38 = vadd.f32 %v742_v13, %v335_v30  ;;  %v432_v39 = vadd.f32 %v743_v15, %v336_v31  ;;  %v338_v40 = vadd.f32 %v906_v11, %v299_v32  ;;  %v687_v41 = vunpack.c.h.bf16 %v802_v16  ;;  %v805_v13 = vld [vmem:[%s885_s21 + $0x30] sm:$0xff]   ;;  %v806_v30 = vld [vmem:[%s885_s21 + $0x38] sm:$0xff]  }
  0x19   : > { %vm461_vm0 = vcmp.gt.f32.partialorder %v429_v34, 0.0  ;;  %v493_v42 = vmul.f32 0.01, %v429_v34  ;;  %vm462_vm1 = vcmp.gt.f32.partialorder %v430_v35, 0.0  ;;  %v494_v43 = vmul.f32 0.01, %v430_v35 }
  0x1a   : > { %vm463_vm2 = vcmp.gt.f32.partialorder %v431_v38, 0.0  ;;  %v495_v44 = vmul.f32 0.01, %v431_v38  ;;  %vm464_vm3 = vcmp.gt.f32.partialorder %v432_v39, 0.0  ;;  %v496_v45 = vmul.f32 0.01, %v432_v39 }
  0x1b   : > { %v525_v46 = vsel %vm461_vm0, %v429_v34, %v493_v42  ;;  %v526_v47 = vsel %vm462_vm1, %v430_v35, %v494_v43  ;;  %v433_v48 = vadd.f32 %v746_v20, %v337_v36  ;;  %v434_v49 = vadd.f32 %v747_v25, %v338_v40 }
  0x1c   : > { %557 = vst [vmem:[%s930_s6] sm:$0xff] %v525_v46  ;;  %558 = vst [vmem:[%s930_s6 + $0x8] sm:$0xff] %v526_v47  ;;  %v527_v51 = vsel %vm463_vm2, %v431_v38, %v495_v44  ;;  %v528_v52 = vsel %vm464_vm3, %v432_v39, %v496_v45  ;;  %v339_v53 = vadd.f32 %v906_v11, %v300_v37  ;;  %v751_v60 = vunpack.c.h.bf16 %v912_v21  ;;  %v821_v37 = vld [vmem:[%s890_s24 + $0x38] sm:$0xff]  }
  0x1d   : > { %v301_v54 = vmul.f32 %v687_v41, %v895_v0  ;;  %559 = vst [vmem:[%s930_s6 + $0x10] sm:$0xff] %v527_v51  ;;  %560 = vst [vmem:[%s930_s6 + $0x18] sm:$0xff] %v528_v52  ;;  %vm465_vm4 = vcmp.gt.f32.partialorder %v433_v48, 0.0  ;;  %v497_v56 = vmul.f32 0.01, %v433_v48  ;;  %vm466_vm5 = vcmp.gt.f32.partialorder %v434_v49, 0.0 }
  0x1e   : > { %v498_v57 = vmul.f32 0.01, %v434_v49  ;;  %v435_v58 = vadd.f32 %v750_v33, %v339_v53  ;;  %v690_v61 = vunpack.c.l.bf16 %v803_v50  ;;  %v754_v3 = vunpack.c.l.bf16 %v818_v55 }
  0x1f   : > { %v340_v59 = vadd.f32 %v906_v11, %v301_v54  ;;  %v529_v1 = vsel %vm465_vm4, %v433_v48, %v497_v56  ;;  %v691_v4 = vunpack.c.h.bf16 %v803_v50  ;;  %v755_v9 = vunpack.c.h.bf16 %v818_v55  ;;  %v822_v56 = vld [vmem:[%s890_s24 + $0x40] sm:$0xff]  }
  0x20   : > { %v530_v2 = vsel %vm466_vm5, %v434_v49, %v498_v57  ;;  %561 = vst [vmem:[%s930_s6 + $0x20] sm:$0xff] %v529_v1  ;;  %vm467_vm6 = vcmp.gt.f32.partialorder %v435_v58, 0.0  ;;  %v499_v5 = vmul.f32 0.01, %v435_v58  ;;  %v302_v7 = vmul.f32 %v690_v61, %v895_v0  ;;  %v807_v49 = vld [vmem:[%s885_s21 + $0x40] sm:$0xff]   ;;  %v808_v1 = vld [vmem:[%s885_s21 + $0x48] sm:$0xff]  }
  0x21   : > { %562 = vst [vmem:[%s930_s6 + $0x28] sm:$0xff] %v530_v2  ;;  %v436_v6 = vadd.f32 %v751_v60, %v340_v59  ;;  %v303_v8 = vmul.f32 %v691_v4, %v895_v0  ;;  %v694_v10 = vunpack.c.l.bf16 %v804_v62  ;;  %v758_v12 = vunpack.c.l.bf16 %v819_v63 }
  0x22   : > { %v531_v15 = vsel %vm467_vm6, %v435_v58, %v499_v5  ;;  %v341_v17 = vadd.f32 %v906_v11, %v302_v7  ;;  %v695_v20 = vunpack.c.h.bf16 %v804_v62  ;;  %v759_v21 = vunpack.c.h.bf16 %v819_v63 }
  0x23   : > { %vm468_vm7 = vcmp.gt.f32.partialorder %v436_v6, 0.0  ;;  %v500_v16 = vmul.f32 0.01, %v436_v6  ;;  %563 = vst [vmem:[%s930_s6 + $0x30] sm:$0xff] %v531_v15  ;;  %v342_v18 = vadd.f32 %v906_v11, %v303_v8  ;;  %v304_v19 = vmul.f32 %v694_v10, %v895_v0  ;;  %v809_v15 = vld [vmem:[%s885_s21 + $0x50] sm:$0xff]  }
  0x24   : > { %v437_v23 = vadd.f32 %v754_v3, %v341_v17  ;;  %v698_v24 = vunpack.c.l.bf16 %v805_v13  ;;  %v762_v25 = vunpack.c.l.bf16 %v820_v14  ;;  %v305_v28 = vmul.f32 %v695_v20, %v895_v0 }
  0x25   : > { %v532_v22 = vsel %vm468_vm7, %v436_v6, %v500_v16  ;;  %v438_v26 = vadd.f32 %v755_v9, %v342_v18  ;;  %v343_v27 = vadd.f32 %v906_v11, %v304_v19  ;;  %v699_v29 = vunpack.c.h.bf16 %v805_v13  ;;  %v823_v6 = vld [vmem:[%s890_s24 + $0x48] sm:$0xff]   ;;  %v824_v16 = vld [vmem:[%s890_s24 + $0x50] sm:$0xff]  }
  0x26   : > { %564 = vst [vmem:[%s930_s6 + $0x38] sm:$0xff] %v532_v22  ;;  %vm469_vm8 = vcmp.gt.f32.partialorder %v437_v23, 0.0  ;;  %v501_v31 = vmul.f32 0.01, %v437_v23  ;;  %v306_v32 = vmul.f32 %v698_v24, %v895_v0  ;;  %v763_v33 = vunpack.c.h.bf16 %v820_v14 }
  0x27   : > { %vm470_vm9 = vcmp.gt.f32.partialorder %v438_v26, 0.0  ;;  %v502_v34 = vmul.f32 0.01, %v438_v26  ;;  %v439_v35 = vadd.f32 %v758_v12, %v343_v27  ;;  %v344_v36 = vadd.f32 %v906_v11, %v305_v28 }
  0x28   : > { %v533_v38 = vsel %vm469_vm8, %v437_v23, %v501_v31  ;;  %v345_v39 = vadd.f32 %v906_v11, %v306_v32  ;;  %v307_v40 = vmul.f32 %v699_v29, %v895_v0  ;;  %v702_v41 = vunpack.c.l.bf16 %v806_v30 }
  0x29   : > { %565 = vst [vmem:[%s930_s6 + $0x40] sm:$0xff] %v533_v38  ;;  %v534_v42 = vsel %vm470_vm9, %v438_v26, %v502_v34  ;;  %vm471_vm10 = vcmp.gt.f32.partialorder %v439_v35, 0.0  ;;  %v503_v43 = vmul.f32 0.01, %v439_v35  ;;  %v440_v44 = vadd.f32 %v759_v21, %v344_v36  ;;  %v825_v36 = vld [vmem:[%s890_s24 + $0x58] sm:$0xff]  }
  0x2a   : > { %566 = vst [vmem:[%s930_s6 + $0x48] sm:$0xff] %v534_v42  ;;  %v441_v45 = vadd.f32 %v762_v25, %v345_v39  ;;  %v346_v46 = vadd.f32 %v906_v11, %v307_v40  ;;  %v308_v47 = vmul.f32 %v702_v41, %v895_v0  ;;  %v766_v48 = vunpack.c.l.bf16 %v821_v37 }
  0x2b   : > { %v535_v50 = vsel %vm471_vm10, %v439_v35, %v503_v43  ;;  %vm472_vm11 = vcmp.gt.f32.partialorder %v440_v44, 0.0  ;;  %v504_v51 = vmul.f32 0.01, %v440_v44  ;;  %v703_v52 = vunpack.c.h.bf16 %v806_v30  ;;  %v810_v35 = vld [vmem:[%s885_s21 + $0x58] sm:$0xff]  }
  0x2c   : > { %567 = vst [vmem:[%s930_s6 + $0x50] sm:$0xff] %v535_v50  ;;  %vm473_vm12 = vcmp.gt.f32.partialorder %v441_v45, 0.0  ;;  %v505_v53 = vmul.f32 0.01, %v441_v45  ;;  %v442_v54 = vadd.f32 %v763_v33, %v346_v46  ;;  %v347_v55 = vadd.f32 %v906_v11, %v308_v47 }
  0x2d   : > { %v536_v57 = vsel %vm472_vm11, %v440_v44, %v504_v51  ;;  %v309_v58 = vmul.f32 %v703_v52, %v895_v0  ;;  %v767_v59 = vunpack.c.h.bf16 %v821_v37  ;;  %v706_v60 = vunpack.c.l.bf16 %v807_v49 }
  0x2e   : > { %568 = vst [vmem:[%s930_s6 + $0x58] sm:$0xff] %v536_v57  ;;  %v537_v61 = vsel %vm473_vm12, %v441_v45, %v505_v53  ;;  %vm474_vm13 = vcmp.gt.f32.partialorder %v442_v54, 0.0  ;;  %v506_v62 = vmul.f32 0.01, %v442_v54  ;;  %v443_v63 = vadd.f32 %v766_v48, %v347_v55  ;;  %v811_v48 = vld [vmem:[%s885_s21 + $0x60] sm:$0xff]  }
  0x2f   : > { %569 = vst [vmem:[%s930_s6 + $0x60] sm:$0xff] %v537_v61  ;;  %v348_v2 = vadd.f32 %v906_v11, %v309_v58  ;;  %v310_v3 = vmul.f32 %v706_v60, %v895_v0  ;;  %v770_v4 = vunpack.c.l.bf16 %v822_v56  ;;  %v707_v5 = vunpack.c.h.bf16 %v807_v49  ;;  %v826_v55 = vld [vmem:[%s890_s24 + $0x60] sm:$0xff]  }
  0x30   : > { %v538_v7 = vsel %vm474_vm13, %v442_v54, %v506_v62  ;;  %vm475_vm14 = vcmp.gt.f32.partialorder %v443_v63, 0.0  ;;  %v507_v8 = vmul.f32 0.01, %v443_v63  ;;  %v771_v9 = vunpack.c.h.bf16 %v822_v56 }
  0x31   : > { %570 = vst [vmem:[%s930_s6 + $0x68] sm:$0xff] %v538_v7  ;;  %v444_v10 = vadd.f32 %v767_v59, %v348_v2  ;;  %v349_v12 = vadd.f32 %v906_v11, %v310_v3  ;;  %v311_v13 = vmul.f32 %v707_v5, %v895_v0  ;;  %v710_v14 = vunpack.c.l.bf16 %v808_v1 }
  0x32   : > { %v539_v17 = vsel %vm475_vm14, %v443_v63, %v507_v8  ;;  %v774_v18 = vunpack.c.l.bf16 %v823_v6  ;;  %v711_v19 = vunpack.c.h.bf16 %v808_v1  ;;  %v775_v20 = vunpack.c.h.bf16 %v823_v6 }
  0x33   : > { %571 = vst [vmem:[%s930_s6 + $0x70] sm:$0xff] %v539_v17  ;;  %vm476_vm15 = vcmp.gt.f32.partialorder %v444_v10, 0.0  ;;  %v508_v21 = vmul.f32 0.01, %v444_v10  ;;  %v445_v22 = vadd.f32 %v770_v4, %v349_v12  ;;  %v350_v23 = vadd.f32 %v906_v11, %v311_v13  ;;  %v812_v4 = vld [vmem:[%s885_s21 + $0x68] sm:$0xff]  }
  0x34   : > { %v312_v24 = vmul.f32 %v710_v14, %v895_v0  ;;  %v313_v25 = vmul.f32 %v711_v19, %v895_v0  ;;  %v714_v26 = vunpack.c.l.bf16 %v809_v15  ;;  %v778_v27 = vunpack.c.l.bf16 %v824_v16  ;;  %v827_v13 = vld [vmem:[%s890_s24 + $0x68] sm:$0xff]  }
  0x35   : > { %v540_v28 = vsel %vm476_vm15, %v444_v10, %v508_v21  ;;  %vm477_vm0 = vcmp.gt.f32.partialorder %v445_v22, 0.0  ;;  %v509_v29 = vmul.f32 0.01, %v445_v22  ;;  %v446_v30 = vadd.f32 %v771_v9, %v350_v23 }
  0x36   : > { %572 = vst [vmem:[%s930_s6 + $0x78] sm:$0xff] %v540_v28  ;;  %v351_v31 = vadd.f32 %v906_v11, %v312_v24  ;;  %v352_v32 = vadd.f32 %v906_v11, %v313_v25  ;;  %v314_v33 = vmul.f32 %v714_v26, %v895_v0  ;;  %v715_v34 = vunpack.c.h.bf16 %v809_v15  ;;  %v828_v25 = vld [vmem:[%s890_s24 + $0x70] sm:$0xff]  }
  0x37   : > { %v541_v37 = vsel %vm477_vm0, %v445_v22, %v509_v29  ;;  %vm478_vm1 = vcmp.gt.f32.partialorder %v446_v30, 0.0  ;;  %v510_v38 = vmul.f32 0.01, %v446_v30  ;;  %v779_v39 = vunpack.c.h.bf16 %v824_v16 }
  0x38   : > { %573 = vst [vmem:[%s930_s6 + $0x80] sm:$0xff] %v541_v37  ;;  %v447_v40 = vadd.f32 %v774_v18, %v351_v31  ;;  %v448_v41 = vadd.f32 %v775_v20, %v352_v32  ;;  %v353_v42 = vadd.f32 %v906_v11, %v314_v33  ;;  %v315_v43 = vmul.f32 %v715_v34, %v895_v0  ;;  %v813_v20 = vld [vmem:[%s885_s21 + $0x70] sm:$0xff]   ;;  %v814_v33 = vld [vmem:[%s885_s21 + $0x78] sm:$0xff]  }
  0x39   : > { %v542_v44 = vsel %vm478_vm1, %v446_v30, %v510_v38  ;;  %v718_v45 = vunpack.c.l.bf16 %v810_v35  ;;  %v782_v46 = vunpack.c.l.bf16 %v825_v36  ;;  %v719_v47 = vunpack.c.h.bf16 %v810_v35 }
  0x3a   : > { %574 = vst [vmem:[%s930_s6 + $0x88] sm:$0xff] %v542_v44  ;;  %vm479_vm2 = vcmp.gt.f32.partialorder %v447_v40, 0.0  ;;  %v511_v49 = vmul.f32 0.01, %v447_v40  ;;  %vm480_vm3 = vcmp.gt.f32.partialorder %v448_v41, 0.0  ;;  %v449_v51 = vadd.f32 %v778_v27, %v353_v42 }
  0x3b   : > { %v512_v50 = vmul.f32 0.01, %v448_v41  ;;  %v354_v52 = vadd.f32 %v906_v11, %v315_v43  ;;  %v316_v53 = vmul.f32 %v718_v45, %v895_v0  ;;  %v317_v54 = vmul.f32 %v719_v47, %v895_v0 }
  0x3c   : > { %v543_v56 = vsel %vm479_vm2, %v447_v40, %v511_v49  ;;  %v783_v58 = vunpack.c.h.bf16 %v825_v36  ;;  %v722_v59 = vunpack.c.l.bf16 %v811_v48  ;;  %vm481_vm4 = vcmp.gt.f32.partialorder %v449_v51, 0.0 }
  0x3d   : > { %v544_v57 = vsel %vm480_vm3, %v448_v41, %v512_v50  ;;  %575 = vst [vmem:[%s930_s6 + $0x90] sm:$0xff] %v543_v56  ;;  %v513_v60 = vmul.f32 0.01, %v449_v51  ;;  %v450_v61 = vadd.f32 %v779_v39, %v354_v52  ;;  %v355_v62 = vadd.f32 %v906_v11, %v316_v53  ;;  %v829_v41 = vld [vmem:[%s890_s24 + $0x78] sm:$0xff]  }
  0x3e   : > { %576 = vst [vmem:[%s930_s6 + $0x98] sm:$0xff] %v544_v57  ;;  %v356_v63 = vadd.f32 %v906_v11, %v317_v54  ;;  %v318_v1 = vmul.f32 %v722_v59, %v895_v0  ;;  %v786_v2 = vunpack.c.l.bf16 %v826_v55  ;;  %v723_v3 = vunpack.c.h.bf16 %v811_v48 }
  0x3f   : > { %v545_v5 = vsel %vm481_vm4, %v449_v51, %v513_v60  ;;  %vm482_vm5 = vcmp.gt.f32.partialorder %v450_v61, 0.0  ;;  %v514_v6 = vmul.f32 0.01, %v450_v61  ;;  %v451_v7 = vadd.f32 %v782_v46, %v355_v62 }
  0x40   : > { %577 = vst [vmem:[%s930_s6 + $0xa0] sm:$0xff] %v545_v5  ;;  %v452_v8 = vadd.f32 %v783_v58, %v356_v63  ;;  %v357_v9 = vadd.f32 %v906_v11, %v318_v1  ;;  %v319_v10 = vmul.f32 %v723_v3, %v895_v0  ;;  %v787_v12 = vunpack.c.h.bf16 %v826_v55 }
  0x41   : > { %v546_v14 = vsel %vm482_vm5, %v450_v61, %v514_v6  ;;  %vm483_vm6 = vcmp.gt.f32.partialorder %v451_v7, 0.0  ;;  %v515_v15 = vmul.f32 0.01, %v451_v7  ;;  %v726_v16 = vunpack.c.l.bf16 %v812_v4 }
  0x42   : > { %578 = vst [vmem:[%s930_s6 + $0xa8] sm:$0xff] %v546_v14  ;;  %vm484_vm7 = vcmp.gt.f32.partialorder %v452_v8, 0.0  ;;  %v516_v17 = vmul.f32 0.01, %v452_v8  ;;  %v453_v18 = vadd.f32 %v786_v2, %v357_v9  ;;  %v358_v19 = vadd.f32 %v906_v11, %v319_v10 }
  0x43   : > { %v547_v21 = vsel %vm483_vm6, %v451_v7, %v515_v15  ;;  %v320_v22 = vmul.f32 %v726_v16, %v895_v0  ;;  %v790_v23 = vunpack.c.l.bf16 %v827_v13  ;;  %v727_v24 = vunpack.c.h.bf16 %v812_v4 }
  0x44   : > { %579 = vst [vmem:[%s930_s6 + $0xb0] sm:$0xff] %v547_v21  ;;  %v548_v26 = vsel %vm484_vm7, %v452_v8, %v516_v17  ;;  %vm485_vm8 = vcmp.gt.f32.partialorder %v453_v18, 0.0  ;;  %v517_v27 = vmul.f32 0.01, %v453_v18  ;;  %v454_v28 = vadd.f32 %v787_v12, %v358_v19 }
  0x45   : > { %580 = vst [vmem:[%s930_s6 + $0xb8] sm:$0xff] %v548_v26  ;;  %v359_v29 = vadd.f32 %v906_v11, %v320_v22  ;;  %v321_v30 = vmul.f32 %v727_v24, %v895_v0  ;;  %v791_v31 = vunpack.c.h.bf16 %v827_v13  ;;  %v730_v32 = vunpack.c.l.bf16 %v813_v20 }
  0x46   : > { %v549_v34 = vsel %vm485_vm8, %v453_v18, %v517_v27  ;;  %vm486_vm9 = vcmp.gt.f32.partialorder %v454_v28, 0.0  ;;  %v518_v35 = vmul.f32 0.01, %v454_v28  ;;  %v794_v36 = vunpack.c.l.bf16 %v828_v25 }
  0x47   : > { %581 = vst [vmem:[%s930_s6 + $0xc0] sm:$0xff] %v549_v34  ;;  %v455_v37 = vadd.f32 %v790_v23, %v359_v29  ;;  %v360_v38 = vadd.f32 %v906_v11, %v321_v30  ;;  %v322_v39 = vmul.f32 %v730_v32, %v895_v0  ;;  %v731_v40 = vunpack.c.h.bf16 %v813_v20 }
  0x48   : > { %v550_v42 = vsel %vm486_vm9, %v454_v28, %v518_v35  ;;  %v795_v43 = vunpack.c.h.bf16 %v828_v25  ;;  %v734_v44 = vunpack.c.l.bf16 %v814_v33  ;;  %v798_v50 = vunpack.c.l.bf16 %v829_v41 }
  0x49   : > { %582 = vst [vmem:[%s930_s6 + $0xc8] sm:$0xff] %v550_v42  ;;  %vm487_vm10 = vcmp.gt.f32.partialorder %v455_v37, 0.0  ;;  %v519_v45 = vmul.f32 0.01, %v455_v37  ;;  %v456_v46 = vadd.f32 %v791_v31, %v360_v38  ;;  %v361_v47 = vadd.f32 %v906_v11, %v322_v39 }
  0x4a   : > { %v323_v48 = vmul.f32 %v731_v40, %v895_v0  ;;  %v324_v49 = vmul.f32 %v734_v44, %v895_v0  ;;  %v735_v51 = vunpack.c.h.bf16 %v814_v33  ;;  %v799_v60 = vunpack.c.h.bf16 %v829_v41 }
  0x4b   : > { %v551_v52 = vsel %vm487_vm10, %v455_v37, %v519_v45  ;;  %vm488_vm11 = vcmp.gt.f32.partialorder %v456_v46, 0.0  ;;  %v520_v53 = vmul.f32 0.01, %v456_v46  ;;  %v457_v54 = vadd.f32 %v794_v36, %v361_v47 }
  0x4c   : > { %583 = vst [vmem:[%s930_s6 + $0xd0] sm:$0xff] %v551_v52  ;;  %v362_v55 = vadd.f32 %v906_v11, %v323_v48  ;;  %v363_v56 = vadd.f32 %v906_v11, %v324_v49  ;;  %v325_v57 = vmul.f32 %v735_v51, %v895_v0 }
  0x4d   : > { %v552_v58 = vsel %vm488_vm11, %v456_v46, %v520_v53  ;;  %vm489_vm12 = vcmp.gt.f32.partialorder %v457_v54, 0.0  ;;  %v521_v59 = vmul.f32 0.01, %v457_v54 }
  0x4e   : > { %584 = vst [vmem:[%s930_s6 + $0xd8] sm:$0xff] %v552_v58  ;;  %v458_v61 = vadd.f32 %v795_v43, %v362_v55  ;;  %v459_v62 = vadd.f32 %v798_v50, %v363_v56  ;;  %v364_v63 = vadd.f32 %v906_v11, %v325_v57 }
  0x4f   : > { %v553_v1 = vsel %vm489_vm12, %v457_v54, %v521_v59 }
  0x50   : > { %585 = vst [vmem:[%s930_s6 + $0xe0] sm:$0xff] %v553_v1  ;;  %vm490_vm13 = vcmp.gt.f32.partialorder %v458_v61, 0.0  ;;  %v522_v2 = vmul.f32 0.01, %v458_v61  ;;  %vm491_vm14 = vcmp.gt.f32.partialorder %v459_v62, 0.0  ;;  %v460_v4 = vadd.f32 %v799_v60, %v364_v63 }
  0x51   : > { %v523_v3 = vmul.f32 0.01, %v459_v62 }
  0x52   : > { %v554_v0 = vsel %vm490_vm13, %v458_v61, %v522_v2  ;;  %vm492_vm15 = vcmp.gt.f32.partialorder %v460_v4, 0.0  ;;  %v524_v6 = vmul.f32 0.01, %v460_v4 }
  0x53   : > { %v555_v5 = vsel %vm491_vm14, %v459_v62, %v523_v3  ;;  %586 = vst [vmem:[%s930_s6 + $0xe8] sm:$0xff] %v554_v0 }
  0x54   : > { %587 = vst [vmem:[%s930_s6 + $0xf0] sm:$0xff] %v555_v5  ;;  %v556_v7 = vsel %vm492_vm15, %v460_v4, %v524_v6 }
  0x55   : > { %588 = vst [vmem:[%s930_s6 + $0xf8] sm:$0xff] %v556_v7 }
  0x56 PF: > { %s14_s15 = sadd.s32 1, %s844_s15  }
  0x57   : > { %p11_p4 = scmp.ge.s32.totalorder %s14_s15, 4  }
  0x59   :  { %13 = sbr.rel (!%p11_p4) target bundleno = 1 (0x1), region = 69 }

// kernel: _lambda_.5
= control target key start
LH: loop header
LB: loop body
LE: loop exit
PB: predicated region body
PF: predicated region fallthrough
CT: control target
= control target key end

     0   :  { %s8167_s21 = smov 0   ;;  %s10074_s0 = inlined_call_operand.vmem [shape: bf16[2,16,16,128], index: 0, kind: input, shape index: {}]   ;;  %s10075_s1 = inlined_call_operand.vmem [shape: f32[1,128], index: 1, kind: input, shape index: {}]   ;;  %s10076_s2 = inlined_call_operand.vmem [shape: f32[1,128], index: 2, kind: input, shape index: {}]   ;;  %s10077_s3 = inlined_call_operand.vmem [shape: bf16[9,128,128], index: 3, kind: input, shape index: {}]   ;;  %s10078_s4 = inlined_call_operand.vmem [shape: bf16[512,128], index: 4, kind: output, shape index: {0}]   ;;  %s10079_s5 = inlined_call_operand.vmem [shape: f32[2,1,128], index: 5, kind: output, shape index: {1}]   ;;  %s10080_s6 = inlined_call_operand.vmem [shape: f32[2,1,128], index: 6, kind: output, shape index: {2}]  }
   0x1 LB: > { %s8173_s22 = sadd.s32 4294967295, %s8129_s21   ;;  %p6286_p0 = scmp.ge.s32.totalorder %s8129_s21, 1  ;;  %s8129_s21 = sphi %s8167_s21, %s17_s21  }
   0x2   : > { %p217_p1 = scmp.lt.s32.totalorder %s8129_s21, 3 }
   0x4   : > { %p218_p2 = pnand %p6286_p0, %p217_p1 }
   0x6   : > { %221 = sbr.rel (%p218_p2) target bundleno = 730 (0x2da), region = 36 }
   0xd   : > { %v7919_v0 = vld [vmem:[%s10077_s3 + $0x40] sm:$0xff]   ;;  %v8131_v2 = vmov 0   ;;  %v7921_v3 = vld [vmem:[%s10077_s3 + $0x48] sm:$0xff]   ;;  %v7923_v5 = vld [vmem:[%s10077_s3 + $0x50] sm:$0xff]   ;;  %p253_p3 = scmp.lt.s32.totalorder %s8173_s22, 1  ;;  %vm983_vm3 = vcmask 1043456  }
   0xe   : > { %v7920_v1 = vld [vmem:[%s10077_s3 + $0x100] sm:$0xff]   ;;  %525 = vst [vmem:[#allocation2] sm:$0xf] %v8131_v2  ;;  %526 = vst [vmem:[#allocation2 + $0x4] sm:$0xf] %v8131_v2  ;;  %7206 = vmatprep.subr.bf16.mxu1 %v7919_v0  ;;  %v7922_v4 = vld [vmem:[%s10077_s3 + $0x108] sm:$0xff]  }
   0xf   : > { %527 = vst [vmem:[#allocation2 + $0x8] sm:$0x1] %v8131_v2  ;;  %528 = vst [vmem:[#allocation2 + $0xc] sm:$0xf] %v8131_v2  ;;  %7398 = vmatprep.subr.bf16.mxu0 %v7920_v1  ;;  %7207 = vmatpush3.bf16.msra.mxu1 %v7919_v0  ;;  %v7924_v6 = vld [vmem:[%s10077_s3 + $0x110] sm:$0xff]   ;;  %v7925_v7 = vld [vmem:[%s10077_s3 + $0x58] sm:$0xff]  }
  0x10   : > { %529 = vst [vmem:[#allocation2 + $0x10] sm:$0xf] %v8131_v2  ;;  %530 = vst [vmem:[#allocation2 + $0x14] sm:$0x1] %v8131_v2  ;;  %7399 = vmatpush3.bf16.msra.mxu0 %v7920_v1  ;;  %7208 = vmatprep.subr.bf16.mxu1 %v7921_v3  ;;  %s8200_s13 = scalar_select %p253_p3, %s8173_s22, 1  ;;  %v7926_v8 = vld [vmem:[%s10077_s3 + $0x118] sm:$0xff]  }
  0x11   : > { %531 = vst [vmem:[#allocation2 + $0x18] sm:$0xf] %v8131_v2  ;;  %532 = vst [vmem:[#allocation2 + $0x1c] sm:$0xf] %v8131_v2  ;;  %7400 = vmatprep.subr.bf16.mxu0 %v7922_v4  ;;  %v7927_v9 = vld [vmem:[%s10077_s3 + $0x60] sm:$0xff]   ;;  %v7929_v11 = vld [vmem:[%s10077_s3 + $0x68] sm:$0xff]  }
  0x12   : > { %533 = vst [vmem:[#allocation2 + $0x20] sm:$0x1] %v8131_v2  ;;  %534 = vst [vmem:[#allocation2 + $0x24] sm:$0xf] %v8131_v2  ;;  %s6751_s18 = sshll.u32 %s8200_s13, 7  ;;  %v7928_v10 = vld [vmem:[%s10077_s3 + $0x120] sm:$0xff]   ;;  %s269_s23 = scalar_lea.vmem %s10080_s6, %s8200_s13 }
  0x13   : > { %535 = vst [vmem:[#allocation2 + $0x28] sm:$0xf] %v8131_v2  ;;  %536 = vst [vmem:[#allocation2 + $0x2c] sm:$0x1] %v8131_v2  ;;  %7209 = vmatpush3.bf16.msra.mxu1 %v7921_v3  ;;  %s8218_s27 = scalar_lea.vmem %s10074_s0, %s6751_s18  ;;  %v7930_v15 = vld [vmem:[%s10077_s3 + $0x128] sm:$0xff]   ;;  %v7931_v27 = vld [vmem:[%s10077_s3 + $0x70] sm:$0xff]  }
  0x14   : > { %537 = vst [vmem:[#allocation2 + $0x30] sm:$0xf] %v8131_v2  ;;  %538 = vst [vmem:[#allocation2 + $0x34] sm:$0xf] %v8131_v2  ;;  %7401 = vmatpush3.bf16.msra.mxu0 %v7922_v4  ;;  %7210 = vmatprep.subr.bf16.mxu1 %v7923_v5  ;;  %vm1164_vm0 = vsmask.f32 3328 }
  0x15   : > { %539 = vst [vmem:[#allocation2 + $0x38] sm:$0x1] %v8131_v2  ;;  %540 = vst [vmem:[#allocation2 + $0x3c] sm:$0xf] %v8131_v2  ;;  %7402 = vmatprep.subr.bf16.mxu0 %v7924_v6  ;;  %v1100_v12 = vld [vmem:[#allocation2] sm:$0xf] }
  0x16   : > { %541 = vst [vmem:[#allocation2 + $0x40] sm:$0xf] %v8131_v2  ;;  %542 = vst [vmem:[#allocation2 + $0x44] sm:$0x1] %v8131_v2  ;;  %v1101_v13 = vld [vmem:[#allocation2 + $0x4] sm:$0xf] }
  0x17   : > { %543 = vst [vmem:[#allocation2 + $0x48] sm:$0xf] %v8131_v2  ;;  %544 = vst [vmem:[#allocation2 + $0x4c] sm:$0xf] %v8131_v2  ;;  %7211 = vmatpush3.bf16.msra.mxu1 %v7923_v5  ;;  %v1148_v14 = vld [vmem:[#allocation2 + $0x8] sm:$0x1] }
  0x18   : > { %545 = vst [vmem:[#allocation2 + $0x50] sm:$0x1] %v8131_v2  ;;  %546 = vst [vmem:[#allocation2 + $0x54] sm:$0xf] %v8131_v2  ;;  %7403 = vmatpush3.bf16.msra.mxu0 %v7924_v6  ;;  %7212 = vmatprep.subr.bf16.mxu1 %v7925_v7  ;;  %v1168_v16 = vshrl.u32 %v1100_v12, 16  ;;  %v1171_v17 = vshll.u32 %v1100_v12, 16 }
  0x19   : > { %547 = vst [vmem:[#allocation2 + $0x58] sm:$0xf] %v8131_v2  ;;  %548 = vst [vmem:[#allocation2 + $0x5c] sm:$0x1] %v8131_v2  ;;  %7404 = vmatprep.subr.bf16.mxu0 %v7926_v8  ;;  %vm1165_vm1 = vsmask.f32 7440 }
  0x1a   : > { %549 = vst [vmem:[#allocation2 + $0x60] sm:$0xf] %v8131_v2  ;;  %550 = vst [vmem:[#allocation2 + $0x64] sm:$0xf] %v8131_v2  ;;  %v1177_v18 = vshll.u32 %v1101_v13, 16  ;;  %v1181_v19 = vshrl.u32 %v1101_v13, 16 }
  0x1b   : > { %551 = vst [vmem:[#allocation2 + $0x68] sm:$0x1] %v8131_v2  ;;  %552 = vst [vmem:[#allocation2 + $0x6c] sm:$0xf] %v8131_v2  ;;  %7213 = vmatpush3.bf16.msra.mxu1 %v7925_v7  ;;  %v1187_v20 = vshll.u32 %v1148_v14, 16  ;;  %v6817_v21 = vld [vmem:[%s8218_s27] sm:$0xff]  }
  0x1c   : > { %553 = vst [vmem:[#allocation2 + $0x70] sm:$0xf] %v8131_v2  ;;  %554 = vst [vmem:[#allocation2 + $0x74] sm:$0x1] %v8131_v2  ;;  %7405 = vmatpush3.bf16.msra.mxu0 %v7926_v8  ;;  %7214 = vmatprep.subr.bf16.mxu1 %v7927_v9  ;;  %v1170_v22 = vrot.slane %v1168_v16, 4  ;;  %v1173_v23 = vrot.slane %v1171_v17, 5  ;;  %v6818_v24 = vunpack.c.l.bf16 %v6817_v21  ;;  %v6819_v25 = vunpack.c.h.bf16 %v6817_v21 }
  0x1d   : > { %555 = vst [vmem:[#allocation2 + $0x78] sm:$0xf] %v8131_v2  ;;  %556 = vst [vmem:[#allocation2 + $0x7c] sm:$0xf] %v8131_v2  ;;  %7406 = vmatprep.subr.bf16.mxu0 %v7928_v10  ;;  %v8227_v26 = vld [vmem:[%s10075_s1] ss:$0 sm:$0xff] }
  0x1e   : > { %557 = vst [vmem:[#allocation2 + $0x80] sm:$0x1] %v8131_v2  ;;  %558 = vst [vmem:[#allocation2 + $0x84] sm:$0xf] %v8131_v2  ;;  %v1179_v28 = vrot.slane %v1177_v18, 5  ;;  %v1183_v29 = vrot.slane %v1181_v19, 4  ;;  %v1174_v32 = vor.u32 %v1173_v23, %v1170_v22  ;;  %v342_v33 = vmul.f32 %v6818_v24, %v8227_v26 }
  0x1f   : > { %559 = vst [vmem:[#allocation2 + $0x88] sm:$0xf] %v8131_v2  ;;  %560 = vst [vmem:[#allocation2 + $0x8c] sm:$0x1] %v8131_v2  ;;  %7215 = vmatpush3.bf16.msra.mxu1 %v7927_v9  ;;  %v8235_v30 = vld [vmem:[%s10076_s2] ss:$0 sm:$0xff]  ;;  %v343_v34 = vmul.f32 %v6819_v25, %v8227_v26 }
  0x20   : > { %561 = vst [vmem:[#allocation2 + $0x90] sm:$0xf] %v8131_v2  ;;  %562 = vst [vmem:[#allocation2 + $0x94] sm:$0xf] %v8131_v2  ;;  %7407 = vmatpush3.bf16.msra.mxu0 %v7928_v10  ;;  %7216 = vmatprep.subr.bf16.mxu1 %v7929_v11  ;;  %v7932_v31 = vld [vmem:[%s10077_s3 + $0x130] sm:$0xff]   ;;  %v1184_v36 = vor.u32 %v1183_v29, %v1179_v28  ;;  %v1189_v37 = vrot.slane %v1187_v20, 5  ;;  %v381_v39 = vadd.f32 %v8235_v30, %v342_v33 }
  0x21   : > { %563 = vst [vmem:[#allocation2 + $0x98] sm:$0x1] %v8131_v2  ;;  %564 = vst [vmem:[#allocation2 + $0x9c] sm:$0xf] %v8131_v2  ;;  %7408 = vmatprep.subr.bf16.mxu0 %v7930_v15  ;;  %v1175_v38 = vrot.slane %v1174_v32, 4  ;;  %v382_v40 = vadd.f32 %v8235_v30, %v343_v34  ;;  %vm990_vm4 = vcmask 1040384  }
  0x22   : > { %565 = vst [vmem:[#allocation2 + $0xa0] sm:$0xf] %v8131_v2  ;;  %566 = vst [vmem:[#allocation2 + $0xa4] sm:$0x1] %v8131_v2  ;;  %v7933_v41 = vld [vmem:[%s10077_s3 + $0x78] sm:$0xff]   ;;  %v1185_v43 = vrot.slane %v1184_v36, 4 }
  0x23   : > { %567 = vst [vmem:[#allocation2 + $0xa8] sm:$0xf] %v8131_v2  ;;  %568 = vst [vmem:[#allocation2 + $0xac] sm:$0xf] %v8131_v2  ;;  %7217 = vmatpush3.bf16.msra.mxu1 %v7929_v11  ;;  %v7934_v42 = vld [vmem:[%s10077_s3 + $0x138] sm:$0xff]   ;;  %v6960_v44 = vld [vmem:[%s8218_s27 + $0x8] sm:$0xff]  }
  0x24   : > { %569 = vst [vmem:[#allocation2 + $0xb0] sm:$0x1] %v8131_v2  ;;  %570 = vst [vmem:[#allocation2 + $0xb4] sm:$0xf] %v8131_v2  ;;  %7409 = vmatpush3.bf16.msra.mxu0 %v7930_v15  ;;  %7218 = vmatprep.subr.bf16.mxu1 %v7931_v27  ;;  %vm659_vm5 = vsmask.f32 256  ;;  %v6822_v49 = vunpack.c.l.bf16 %v6960_v44  ;;  %v6823_v50 = vunpack.c.h.bf16 %v6960_v44 }
  0x25   : > { %571 = vst [vmem:[#allocation2 + $0xb8] sm:$0xf] %v8131_v2  ;;  %572 = vst [vmem:[#allocation2 + $0xbc] sm:$0x1] %v8131_v2  ;;  %7410 = vmatprep.subr.bf16.mxu0 %v7932_v31  ;;  %vm413_vm6 = vcmp.gt.f32.partialorder %v381_v39, 0.0  ;;  %vm414_vm7 = vcmp.gt.f32.partialorder %v382_v40, 0.0 }
  0x26   : > { %573 = vst [vmem:[#allocation2 + $0xc0] sm:$0xf] %v8131_v2  ;;  %574 = vst [vmem:[#allocation2 + $0xc4] sm:$0xf] %v8131_v2  ;;  %v445_v46 = vmul.f32 0.01, %v381_v39  ;;  %v344_v59 = vmul.f32 %v6822_v49, %v8227_v26  ;;  %v345_v62 = vmul.f32 %v6823_v50, %v8227_v26 }
  0x27   : > { %575 = vst [vmem:[#allocation2 + $0xc8] sm:$0x1] %v8131_v2  ;;  %576 = vst [vmem:[#allocation2 + $0xcc] sm:$0xf] %v8131_v2  ;;  %v446_v48 = vmul.f32 0.01, %v382_v40  ;;  %7219 = vmatpush3.bf16.msra.mxu1 %v7931_v27 }
  0x28   : > { %577 = vst [vmem:[#allocation2 + $0xd0] sm:$0xf] %v8131_v2  ;;  %578 = vst [vmem:[#allocation2 + $0xd4] sm:$0x1] %v8131_v2  ;;  %v6961_v51 = vld [vmem:[%s8218_s27 + $0x10] sm:$0xff]   ;;  %v477_v53 = vsel %vm413_vm6, %v381_v39, %v445_v46  ;;  %v8265_v54 = vld [vmem:[%s10077_s3] sm:$0xff]   ;;  %7411 = vmatpush3.bf16.msra.mxu0 %v7932_v31  ;;  %7220 = vmatprep.subr.bf16.mxu1 %v7933_v41  ;;  %v383_v2 = vadd.f32 %v8235_v30, %v344_v59 }
  0x29   : > { %vm8244_vm2 = vmor %vm1164_vm0, %vm1165_vm1  ;;  %v6826_v55 = vunpack.c.l.bf16 %v6961_v51  ;;  %v6827_v56 = vunpack.c.h.bf16 %v6961_v51  ;;  %v478_v57 = vsel %vm414_vm7, %v382_v40, %v446_v48  ;;  %v6752_v58 = vpack.c.bf16 %v477_v53, %v477_v53  ;;  %7412 = vmatprep.subr.bf16.mxu0 %v7934_v42  ;;  %v8271_v61 = vld [vmem:[%s10077_s3 + $0x140] sm:$0xff]   ;;  %v986_v9 = vld [vmem:[#allocation2 + $0xc] sm:$0xf]  ;;  %s6289_s12 = sshll.u32 %s8173_s22, 5 }
  0x2a   : > { %v1180_v45 = vsel %vm8244_vm2, %v1175_v38, %v1179_v28  ;;  %v1190_v47 = vsel %vm8244_vm2, %v1185_v43, %v1189_v37  ;;  %vm660_vm8 = vsmask.f32 4368  ;;  %v6753_v60 = vpack.c.bf16 %v478_v57, %v478_v57  ;;  %vm8281_vm10 = vmand %vm990_vm4, %vm659_vm5  ;;  %v992_v19 = vld [vmem:[#allocation2 + $0x14] sm:$0x1]  ;;  %v6962_v36 = vld [vmem:[%s8218_s27 + $0x18] sm:$0xff]   ;;  %p259_p4 = scmp.lt.s32.totalorder %s6289_s12, 63 }
  0x2b   : > { %v6341_v52 = vcombine.low %v1180_v45, %v1190_v47  ;;  %vm984_vm9 = vsmask.f32 7938  ;;  %v346_v63 = vmul.f32 %v6826_v55, %v8227_v26  ;;  %v663_v0 = vshrl.u32 %v6752_v58, 16  ;;  %7221 = vmatpush3.bf16.msra.mxu1 %v7933_v41  ;;  %vm8296_vm15 = vmor %vm659_vm5, %vm660_vm8  ;;  %v8310_v41 = vld [vmem:[%s8218_s27 + $0x20] sm:$0xff]   ;;  %v995_v46 = vld [vmem:[#allocation2 + $0x18] sm:$0xf] }
  0x2c   : > { %v666_v1 = vshll.u32 %v6752_v58, 16  ;;  %v347_v3 = vmul.f32 %v6827_v56, %v8227_v26  ;;  %v671_v4 = vshrl.u32 %v6753_v60, 16  ;;  %v674_v5 = vshll.u32 %v6753_v60, 16  ;;  %7413 = vmatpush3.bf16.msra.mxu0 %v7934_v42  ;;  %7254 = vmatprep.subr.bf16.mxu1 %v8265_v54  ;;  %vm8289_vm12 = vmand %vm983_vm3, %vm984_vm9  ;;  %v999_v51 = vld [vmem:[#allocation2 + $0x20] sm:$0x1]  ;;  %v7979_v14 = vld [vmem:[%s10077_s3 + $0xa8] sm:$0xff]  }
  0x2d   : > { %7222 = vmatprep.mubr.bf16.mxu1 %v6341_v52  ;;  %v384_v6 = vadd.f32 %v8235_v30, %v345_v62  ;;  %v385_v7 = vadd.f32 %v8235_v30, %v346_v63  ;;  %v665_v8 = vrot.slane %v663_v0, 7  ;;  %vm415_vm11 = vcmp.gt.f32.partialorder %v383_v2, 0.0  ;;  %7446 = vmatprep.subr.bf16.mxu0 %v8271_v61  ;;  %v7985_v10 = vld [vmem:[%s10077_s3 + $0xb0] sm:$0xff]   ;;  %s10143_s12 = smov (!%p259_p4, %s6289_s12), 63 }
  0x2e   : > { %v447_v11 = vmul.f32 0.01, %v383_v2  ;;  %v386_v12 = vadd.f32 %v8235_v30, %v347_v3  ;;  %v673_v13 = vrot.slane %v671_v4, 7  ;;  %v6830_v47 = vunpack.c.l.bf16 %v6962_v36  ;;  %s6290_s14 = sshll.u32 %s10143_s12, 2 }
  0x2f   : > { %vm416_vm13 = vcmp.gt.f32.partialorder %v384_v6, 0.0  ;;  %v448_v15 = vmul.f32 0.01, %v384_v6  ;;  %vm417_vm14 = vcmp.gt.f32.partialorder %v385_v7, 0.0  ;;  %v668_v17 = vor.u32 %v666_v1, %v665_v8  ;;  %s10040_s17 = scalar_lea.vmem %s10078_s4, %s6290_s14 }
  0x30   : > { %v669_v18 = vrot.slane %v665_v8, 4  ;;  %v479_v20 = vsel %vm415_vm11, %v383_v2, %v447_v11  ;;  %vm418_vm0 = vcmp.gt.f32.partialorder %v386_v12, 0.0  ;;  %v676_v21 = vor.u32 %v674_v5, %v673_v13 }
  0x31   : > { %v678_v22 = vrot.slane %v673_v13, 4  ;;  %v480_v23 = vsel %vm416_vm13, %v384_v6, %v448_v15  ;;  %v6754_v24 = vpack.c.bf16 %v479_v20, %v479_v20  ;;  %v987_v25 = vsel %vm8289_vm12, %v668_v17, %v986_v9 }
  0x32   : > { %v6755_v27 = vpack.c.bf16 %v480_v23, %v480_v23  ;;  %v449_v28 = vmul.f32 0.01, %v385_v7  ;;  %v450_v29 = vmul.f32 0.01, %v386_v12  ;;  %v677_v31 = vsel %vm8296_vm15, %v669_v18, %v676_v21  ;;  %988 = vst [vmem:[#allocation2 + $0xc] sm:$0xf] %v987_v25 }
  0x33   : > { %v993_v32 = vsel %vm8281_vm10, %v678_v22, %v992_v19  ;;  %v680_v33 = vshrl.u32 %v6754_v24, 16  ;;  %v683_v34 = vshll.u32 %v6754_v24, 16  ;;  %989 = vst [vmem:[#allocation2 + $0x10] sm:$0xf] %v677_v31  ;;  %v6831_v48 = vunpack.c.h.bf16 %v6962_v36  ;;  %v1002_v36 = vld [vmem:[#allocation2 + $0x24] sm:$0xf] }
  0x34   : > { %994 = vst [vmem:[#allocation2 + $0x14] sm:$0x1] %v993_v32  ;;  %v688_v37 = vshrl.u32 %v6755_v27, 16  ;;  %v691_v38 = vshll.u32 %v6755_v27, 16  ;;  %v481_v39 = vsel %vm417_vm14, %v385_v7, %v449_v28  ;;  %v482_v40 = vsel %vm418_vm0, %v386_v12, %v450_v29 }
  0x35   : > { %v682_v42 = vrot.slane %v680_v33, 7  ;;  %v6756_v43 = vpack.c.bf16 %v481_v39, %v481_v39  ;;  %v8312_v44 = vpack.c.bf16 %v482_v40, %v482_v40  ;;  %v6834_v53 = vunpack.c.l.bf16 %v8310_v41 }
  0x36   : > { %v690_v45 = vrot.slane %v688_v37, 7  ;;  %v6835_v63 = vunpack.c.h.bf16 %v8310_v41  ;;  %v348_v5 = vmul.f32 %v6830_v47, %v8227_v26  ;;  %v349_v11 = vmul.f32 %v6831_v48, %v8227_v26 }
  0x37   : > { %v685_v49 = vor.u32 %v683_v34, %v682_v42  ;;  %v686_v50 = vrot.slane %v682_v42, 4  ;;  %v697_v52 = vshrl.u32 %v6756_v43, 16  ;;  %v700_v57 = vshll.u32 %v6756_v43, 16 }
  0x38   : > { %v693_v55 = vor.u32 %v691_v38, %v690_v45  ;;  %v695_v56 = vrot.slane %v690_v45, 4  ;;  %v705_v58 = vshrl.u32 %v8312_v44, 16  ;;  %v708_v62 = vshll.u32 %v8312_v44, 16 }
  0x39   : > { %v996_v59 = vsel %vm8289_vm12, %v685_v49, %v995_v46  ;;  %v8318_v60 = vrot.slane %v697_v52, 7  ;;  %v1102_v0 = vld [vmem:[#allocation2 + $0xc] sm:$0xf]  ;;  %v8331_v12 = vmul.f32 %v6834_v53, %v8227_v26  ;;  %v8337_v29 = vadd.f32 %v8235_v30, %v348_v5 }
  0x3a   : > { %v3017_v1 = vld [vmem:[#allocation2 + $0xc] sm:$0xf]  ;;  %v694_v2 = vsel %vm8296_vm15, %v686_v50, %v693_v55  ;;  %997 = vst [vmem:[#allocation2 + $0x18] sm:$0xf] %v996_v59  ;;  %v1000_v3 = vsel %vm8281_vm10, %v695_v56, %v999_v51  ;;  %v8326_v4 = vrot.slane %v705_v58, 7  ;;  %v1192_v8 = vshrl.u32 %v1102_v0, 16 }
  0x3b   : > { %v1103_v6 = vld [vmem:[#allocation2 + $0x10] sm:$0xf]  ;;  %v1149_v7 = vld [vmem:[#allocation2 + $0x14] sm:$0x1]  ;;  %v1195_v9 = vshll.u32 %v1102_v0, 16  ;;  %v702_v19 = vor.u32 %v700_v57, %v8318_v60  ;;  %v3066_v23 = vshrl.u32 %v3017_v1, 16 }
  0x3c   : > { %998 = vst [vmem:[#allocation2 + $0x1c] sm:$0xf] %v694_v2  ;;  %1001 = vst [vmem:[#allocation2 + $0x20] sm:$0x1] %v1000_v3  ;;  %v1201_v13 = vshll.u32 %v1103_v6, 16  ;;  %v1205_v15 = vshrl.u32 %v1103_v6, 16  ;;  %v710_v50 = vor.u32 %v708_v62, %v8326_v4 }
  0x3d   : > { %v1211_v17 = vshll.u32 %v1149_v7, 16  ;;  %v3018_v18 = vld [vmem:[#allocation2 + $0x10] sm:$0xf]  ;;  %v1194_v20 = vrot.slane %v1192_v8, 4  ;;  %v1197_v21 = vrot.slane %v1195_v9, 5  ;;  %v3069_v24 = vshll.u32 %v3017_v1, 16 }
  0x3e   : > { %v8334_v22 = vld [vmem:[#allocation2 + $0x14] sm:$0x1]  ;;  %v1203_v25 = vrot.slane %v1201_v13, 5  ;;  %v1207_v27 = vrot.slane %v1205_v15, 4  ;;  %v3075_v28 = vshll.u32 %v3018_v18, 16  ;;  %v3068_v32 = vrot.slane %v3066_v23, 4 }
  0x3f   : > { %v1198_v31 = vor.u32 %v1197_v21, %v1194_v20  ;;  %v3071_v33 = vrot.slane %v3069_v24, 5  ;;  %v3079_v34 = vshrl.u32 %v3018_v18, 16  ;;  %v1213_v38 = vrot.slane %v1211_v17, 5  ;;  %v7938_v8 = vld [vmem:[%s10077_s3 + $0x8] sm:$0xff]  }
  0x40   : > { %v1208_v37 = vor.u32 %v1207_v27, %v1203_v25  ;;  %v3077_v39 = vrot.slane %v3075_v28, 5  ;;  %v3085_v40 = vshll.u32 %v8334_v22, 16  ;;  %v3840_v45 = vrot.slane %v8334_v22, 5 }
  0x41   : > { %v1199_v42 = vrot.slane %v1198_v31, 4  ;;  %v3072_v43 = vor.u32 %v3071_v33, %v3068_v32  ;;  %v3081_v44 = vrot.slane %v3079_v34, 4  ;;  %v3020_v46 = vld [vmem:[#allocation2 + $0x18] sm:$0xf]  ;;  %v1003_v51 = vsel %vm8289_vm12, %v702_v19, %v1002_v36  ;;  %v1006_v31 = vld [vmem:[#allocation2 + $0x2c] sm:$0x1] }
  0x42   : > { %v1209_v47 = vrot.slane %v1208_v37, 4  ;;  %v3087_v48 = vrot.slane %v3085_v40, 5  ;;  %v3090_v57 = vshrl.u32 %v3020_v46, 16  ;;  %v1104_v58 = vld [vmem:[#allocation2 + $0x18] sm:$0xf]  ;;  %v3093_v0 = vshll.u32 %v3020_v46, 16 }
  0x43   : > { %v8341_v49 = vld [vmem:[#allocation2 + $0x1c] sm:$0xf]  ;;  %v1204_v52 = vsel %vm8244_vm2, %v1199_v42, %v1203_v25  ;;  %v3073_v53 = vrot.slane %v3072_v43, 4  ;;  %v3082_v55 = vor.u32 %v3081_v44, %v3077_v39  ;;  %v8348_v56 = vld [vmem:[#allocation2 + $0x20] sm:$0x1]  ;;  %v1216_v21 = vshrl.u32 %v1104_v58, 16 }
  0x44   : > { %1004 = vst [vmem:[#allocation2 + $0x24] sm:$0xf] %v1003_v51  ;;  %v1214_v59 = vsel %vm8244_vm2, %v1209_v47, %v1213_v38  ;;  %v3099_v1 = vshll.u32 %v8341_v49, 16  ;;  %v3103_v62 = vshrl.u32 %v8341_v49, 16  ;;  %v3092_v6 = vrot.slane %v3090_v57, 4  ;;  %v7941_v32 = vld [vmem:[%s10077_s3 + $0x10] sm:$0xff]  }
  0x45   : > { %v6342_v2 = vcombine.low %v1204_v52, %v1214_v59  ;;  %v3078_v3 = vsel %vm8244_vm2, %v3073_v53, %v3077_v39  ;;  %v3083_v5 = vrot.slane %v3082_v55, 4  ;;  %v1105_v7 = vld [vmem:[#allocation2 + $0x1c] sm:$0xf]  ;;  %v3095_v9 = vrot.slane %v3093_v0, 5  ;;  %v1150_v20 = vld [vmem:[#allocation2 + $0x20] sm:$0x1] }
  0x46   : > { %v3101_v13 = vrot.slane %v3099_v1, 5  ;;  %v3105_v15 = vrot.slane %v3103_v62, 4  ;;  %v3109_v17 = vshll.u32 %v8348_v56, 16  ;;  %v3844_v19 = vrot.slane %v8341_v49, 5  ;;  %v7937_v57 = vld [vmem:[%s10077_s3 + $0x148] sm:$0xff]   ;;  %v7944_v59 = vld [vmem:[%s10077_s3 + $0x18] sm:$0xff]  }
  0x47   : > { %7223 = vmatmul.mubr.bf16.vlgmr.msra.gmra.mrb[0].mxu1 %v6342_v2  ;;  %v3088_v18 = vsel %vm8244_vm2, %v3083_v5, %v3087_v48  ;;  %v8364_v23 = vadd.f32 %v8235_v30, %v349_v11  ;;  %v3096_v25 = vor.u32 %v3095_v9, %v3092_v6  ;;  %v3847_v33 = vrot.slane %v8348_v56, 5 }
  0x48   : > { %v6501_v24 = vcombine.low %v3078_v3, %v3088_v18  ;;  %7255 = vmatpush3.bf16.msra.mxu1 %v8265_v54  ;;  %v3106_v27 = vor.u32 %v3105_v15, %v3101_v13  ;;  %v3111_v28 = vrot.slane %v3109_v17, 5  ;;  %v1218_v34 = vrot.slane %v1216_v21, 4  ;;  %v8401_v21 = vld [vmem:[%s8218_s27 + $0x30] sm:$0xff]  }
  0x49   : > { %v1219_v36 = vshll.u32 %v1104_v58, 16  ;;  %v1225_v37 = vshll.u32 %v1105_v7, 16  ;;  %7256 = vmatprep.subr.bf16.mxu1 %v7938_v8  ;;  %v3097_v11 = vrot.slane %v3096_v25, 4  ;;  %v1229_v39 = vshrl.u32 %v1105_v7, 16 }
  0x4a   : > { %7414 = vmatprep.mubr.bf16.mxu0 %v6501_v24  ;;  %v3107_v38 = vrot.slane %v3106_v27, 4  ;;  %v1235_v40 = vshll.u32 %v1150_v20, 16  ;;  %v703_v44 = vrot.slane %v8318_v60, 4  ;;  %v712_v46 = vrot.slane %v8326_v4, 4 }
  0x4b   : > { %v1106_v54 = vld [vmem:[#allocation2 + $0x24] sm:$0xf]  ;;  %v1221_v42 = vrot.slane %v1219_v36, 5  ;;  %v1227_v43 = vrot.slane %v1225_v37, 5  ;;  %v3102_v48 = vsel %vm8244_vm2, %v3097_v11, %v3101_v13  ;;  %v1231_v52 = vrot.slane %v1229_v39, 4  ;;  %v8394_v13 = vld [vmem:[%s8218_s27 + $0x28] sm:$0xff]  }
  0x4c   : > { %v3023_v47 = vld [vmem:[#allocation2 + $0x24] sm:$0xf]  ;;  %v3112_v51 = vsel %vm8244_vm2, %v3107_v38, %v3111_v28  ;;  %v1237_v53 = vrot.slane %v1235_v40, 5  ;;  %7257 = vmatpush3.bf16.msra.mxu1 %v7938_v8  ;;  %v711_v60 = vsel %vm8296_vm15, %v703_v44, %v710_v50  ;;  %v1007_v4 = vsel %vm8281_vm10, %v712_v46, %v1006_v31  ;;  %v7939_v50 = vld [vmem:[%s10077_s3 + $0x150] sm:$0xff]   ;;  %v7940_v37 = vld [vmem:[%s10077_s3 + $0x158] sm:$0xff]  }
  0x4d   : > { %v6502_v55 = vcombine.low %v3102_v48, %v3112_v51  ;;  %v1222_v58 = vor.u32 %v1221_v42, %v1218_v34  ;;  %7258 = vmatprep.subr.bf16.mxu1 %v7941_v32  ;;  %v1232_v0 = vor.u32 %v1231_v52, %v1227_v43  ;;  %1005 = vst [vmem:[#allocation2 + $0x28] sm:$0xf] %v711_v60  ;;  %1008 = vst [vmem:[#allocation2 + $0x2c] sm:$0x1] %v1007_v4  ;;  %v7947_v28 = vld [vmem:[%s10077_s3 + $0x20] sm:$0xff]  }
  0x4e   : > { %v1240_v1 = vshrl.u32 %v1106_v54, 16  ;;  %v1243_v62 = vshll.u32 %v1106_v54, 16  ;;  %v3114_v2 = vshrl.u32 %v3023_v47, 16  ;;  %v3117_v5 = vshll.u32 %v3023_v47, 16 }
  0x4f   : > { %7415 = vmatmul.mubr.bf16.vlgmr.msra.gmra.mrb[0].mxu0 %v6502_v55  ;;  %v1223_v3 = vrot.slane %v1222_v58, 4  ;;  %vm419_vm1 = vcmp.gt.f32.partialorder %v8337_v29, 0.0  ;;  %vm420_vm3 = vcmp.gt.f32.partialorder %v8364_v23, 0.0  ;;  %v1233_v6 = vrot.slane %v1232_v0, 4 }
  0x50   : > { %7447 = vmatpush3.bf16.msra.mxu0 %v8271_v61  ;;  %v1242_v7 = vrot.slane %v1240_v1, 4  ;;  %v1245_v8 = vrot.slane %v1243_v62, 5  ;;  %v3116_v9 = vrot.slane %v3114_v2, 4  ;;  %7259 = vmatpush3.bf16.msra.mxu1 %v7941_v32  ;;  %v3119_v17 = vrot.slane %v3117_v5, 5  ;;  %v7942_v2 = vld [vmem:[%s10077_s3 + $0x160] sm:$0xff]  }
  0x51   : > { %7448 = vmatprep.subr.bf16.mxu0 %v7937_v57  ;;  %v1228_v15 = vsel %vm8244_vm2, %v1223_v3, %v1227_v43  ;;  %v451_v18 = vmul.f32 0.01, %v8337_v29  ;;  %v452_v20 = vmul.f32 0.01, %v8364_v23  ;;  %7260 = vmatprep.subr.bf16.mxu1 %v7944_v59  ;;  %v1238_v61 = vsel %vm8244_vm2, %v1233_v6, %v1237_v53  ;;  %v7949_v3 = vld [vmem:[%s10077_s3 + $0x28] sm:$0xff]  }
  0x52   : > { %v1246_v24 = vor.u32 %v1245_v8, %v1242_v7  ;;  %v351_v25 = vmul.f32 %v6835_v63, %v8227_v26  ;;  %v8410_v27 = vadd.f32 %v8235_v30, %v8331_v12  ;;  %v6343_v31 = vcombine.low %v1228_v15, %v1238_v61  ;;  %v1009_v8 = vld [vmem:[#allocation2 + $0x30] sm:$0xf] }
  0x53   : > { %v3120_v32 = vor.u32 %v3119_v17, %v3116_v9  ;;  %v483_v34 = vsel %vm419_vm1, %v8337_v29, %v451_v18  ;;  %v484_v36 = vsel %vm420_vm3, %v8364_v23, %v452_v20  ;;  %v6838_v23 = vunpack.c.l.bf16 %v8394_v13 }
  0x54   : > { %7449 = vmatpush3.bf16.msra.mxu0 %v7937_v57  ;;  %v8421_v41 = vrot.slane %v1246_v24, 4  ;;  %v6758_v63 = vpack.c.bf16 %v483_v34, %v483_v34  ;;  %v6759_v12 = vpack.c.bf16 %v484_v36, %v484_v36  ;;  %v8427_v11 = vadd.f32 %v8235_v30, %v351_v25  ;;  %7261 = vmatpush3.bf16.msra.mxu1 %v7944_v59  ;;  %v1107_v38 = vld [vmem:[#allocation2 + $0x28] sm:$0xf]  ;;  %v1151_v29 = vld [vmem:[#allocation2 + $0x2c] sm:$0x1] }
  0x55   : > { %7226 = vmatprep.mubr.bf16.mxu1 %v6343_v31  ;;  %v3024_v39 = vld [vmem:[#allocation2 + $0x28] sm:$0xf]  ;;  %7450 = vmatprep.subr.bf16.mxu0 %v7939_v50  ;;  %v6839_v40 = vunpack.c.h.bf16 %v8394_v13  ;;  %v6842_v54 = vunpack.c.l.bf16 %v8401_v21  ;;  %v6843_v42 = vunpack.c.h.bf16 %v8401_v21  ;;  %v1249_v43 = vshll.u32 %v1107_v38, 16  ;;  %v3025_v47 = vld [vmem:[#allocation2 + $0x2c] sm:$0x1] }
  0x56   : > { %v1253_v44 = vshrl.u32 %v1107_v38, 16  ;;  %v1259_v46 = vshll.u32 %v1151_v29, 16  ;;  %v3121_v48 = vrot.slane %v3120_v32, 4  ;;  %7262 = vmatprep.subr.bf16.mxu1 %v7947_v28  ;;  %v3123_v51 = vshll.u32 %v3024_v39, 16  ;;  %v1013_v24 = vld [vmem:[#allocation2 + $0x38] sm:$0x1] }
  0x57   : > { %v3127_v52 = vshrl.u32 %v3024_v39, 16  ;;  %v3133_v53 = vshll.u32 %v3025_v47, 16  ;;  %v714_v55 = vshrl.u32 %v6758_v63, 16  ;;  %v1251_v57 = vrot.slane %v1249_v43, 5  ;;  %v7943_v34 = vld [vmem:[%s10077_s3 + $0x168] sm:$0xff]  }
  0x58   : > { %v1255_v58 = vrot.slane %v1253_v44, 4  ;;  %v1261_v60 = vrot.slane %v1259_v46, 5  ;;  %v717_v4 = vshll.u32 %v6758_v63, 16  ;;  %7451 = vmatpush3.bf16.msra.mxu0 %v7939_v50  ;;  %7263 = vmatpush3.bf16.msra.mxu1 %v7947_v28  ;;  %v3125_v59 = vrot.slane %v3123_v51, 5  ;;  %v7945_v44 = vld [vmem:[%s10077_s3 + $0x170] sm:$0xff]  }
  0x59   : > { %v3129_v0 = vrot.slane %v3127_v52, 4  ;;  %v3135_v1 = vrot.slane %v3133_v53, 5  ;;  %v716_v62 = vrot.slane %v714_v55, 7  ;;  %7452 = vmatprep.subr.bf16.mxu0 %v7940_v37  ;;  %v1252_v5 = vsel %vm8244_vm2, %v8421_v41, %v1251_v57  ;;  %7264 = vmatprep.subr.bf16.mxu1 %v7949_v3 }
  0x5a   : > { %v1256_v6 = vor.u32 %v1255_v58, %v1251_v57  ;;  %v722_v50 = vshrl.u32 %v6759_v12, 16  ;;  %v725_v7 = vshll.u32 %v6759_v12, 16  ;;  %v3126_v9 = vsel %vm8244_vm2, %v3121_v48, %v3125_v59 }
  0x5b   : > { %v3130_v15 = vor.u32 %v3129_v0, %v3125_v59  ;;  %v719_v17 = vor.u32 %v717_v4, %v716_v62  ;;  %v720_v18 = vrot.slane %v716_v62, 4  ;;  %vm421_vm4 = vcmp.gt.f32.partialorder %v8410_v27, 0.0 }
  0x5c   : > { %v1257_v20 = vrot.slane %v1256_v6, 4  ;;  %v724_v61 = vrot.slane %v722_v50, 7  ;;  %7453 = vmatpush3.bf16.msra.mxu0 %v7940_v37  ;;  %vm422_vm5 = vcmp.gt.f32.partialorder %v8427_v11, 0.0  ;;  %7265 = vmatpush3.bf16.msra.mxu1 %v7949_v3  ;;  %v453_v31 = vmul.f32 0.01, %v8410_v27  ;;  %v6966_v37 = vld [vmem:[%s8218_s27 + $0x38] sm:$0xff]  }
  0x5d   : > { %v3131_v25 = vrot.slane %v3130_v15, 4  ;;  %v1010_v28 = vsel %vm8289_vm12, %v719_v17, %v1009_v8  ;;  %v454_v32 = vmul.f32 0.01, %v8427_v11  ;;  %7454 = vmatprep.subr.bf16.mxu0 %v7942_v2  ;;  %v352_v12 = vmul.f32 %v6838_v23, %v8227_v26 }
  0x5e   : > { %v1262_v36 = vsel %vm8244_vm2, %v1257_v20, %v1261_v60  ;;  %v727_v41 = vor.u32 %v725_v7, %v724_v61  ;;  %v729_v63 = vrot.slane %v724_v61, 4  ;;  %1011 = vst [vmem:[#allocation2 + $0x30] sm:$0xf] %v1010_v28  ;;  %v485_v39 = vsel %vm421_vm4, %v8410_v27, %v453_v31  ;;  %v1016_v28 = vld [vmem:[#allocation2 + $0x3c] sm:$0xf] }
  0x5f   : > { %v6344_v38 = vcombine.low %v1252_v5, %v1262_v36  ;;  %v3136_v29 = vsel %vm8244_vm2, %v3131_v25, %v3135_v1  ;;  %v486_v43 = vsel %vm422_vm5, %v8427_v11, %v454_v32  ;;  %v6760_v48 = vpack.c.bf16 %v485_v39, %v485_v39  ;;  %v7946_v5 = vld [vmem:[%s10077_s3 + $0x178] sm:$0xff]  }
  0x60   : > { %v6503_v46 = vcombine.low %v3126_v9, %v3136_v29  ;;  %v728_v23 = vsel %vm8296_vm15, %v720_v18, %v727_v41  ;;  %v1014_v47 = vsel %vm8281_vm10, %v729_v63, %v1013_v24  ;;  %7455 = vmatpush3.bf16.msra.mxu0 %v7942_v2  ;;  %v6761_v27 = vpack.c.bf16 %v486_v43, %v486_v43  ;;  %v8505_v18 = vld [vmem:[%s10077_s3 + $0x180] sm:$0xff]  }
  0x61   : > { %7227 = vmatmul.mubr.bf16.gmra.mrb[4].mxu1 %v6344_v38  ;;  %1012 = vst [vmem:[#allocation2 + $0x34] sm:$0xf] %v728_v23  ;;  %1015 = vst [vmem:[#allocation2 + $0x38] sm:$0x1] %v1014_v47  ;;  %v353_v11 = vmul.f32 %v6839_v40, %v8227_v26  ;;  %v391_v51 = vadd.f32 %v8235_v30, %v352_v12  ;;  %7456 = vmatprep.subr.bf16.mxu0 %v7943_v34  ;;  %v6846_v52 = vunpack.c.l.bf16 %v6966_v37  ;;  %vm2194_vm1 = vcmask 1042432  }
  0x62   : > { %v8478_v53 = vrot.slane %v3844_v19, 4  ;;  %7418 = vmatprep.mubr.bf16.mxu0 %v6503_v46  ;;  %v731_v55 = vshrl.u32 %v6760_v48, 16  ;;  %v354_v57 = vmul.f32 %v6842_v54, %v8227_v26  ;;  %v355_v58 = vmul.f32 %v6843_v42, %v8227_v26 }
  0x63   : > { %v734_v13 = vshll.u32 %v6760_v48, 16  ;;  %v739_v40 = vshrl.u32 %v6761_v27, 16  ;;  %v742_v60 = vshll.u32 %v6761_v27, 16  ;;  %v8487_v4 = vadd.f32 %v8235_v30, %v353_v11 }
  0x64   : > { %v733_v59 = vrot.slane %v731_v55, 7  ;;  %vm423_vm6 = vcmp.gt.f32.partialorder %v391_v51, 0.0  ;;  %v455_v0 = vmul.f32 0.01, %v391_v51  ;;  %7457 = vmatpush3.bf16.msra.mxu0 %v7943_v34  ;;  %v8490_v1 = vadd.f32 %v8235_v30, %v354_v57 }
  0x65   : > { %v3026_v62 = vld [vmem:[#allocation2 + $0x30] sm:$0xf]  ;;  %v741_v54 = vrot.slane %v739_v40, 7  ;;  %v8493_v3 = vadd.f32 %v8235_v30, %v355_v58  ;;  %7458 = vmatprep.subr.bf16.mxu0 %v7945_v44  ;;  %v6847_v21 = vunpack.c.h.bf16 %v6966_v37  ;;  %v8496_v42 = vmul.f32 %v6846_v52, %v8227_v26  ;;  %v1020_v37 = vld [vmem:[#allocation2 + $0x44] sm:$0x1] }
  0x66   : > { %v1108_v2 = vld [vmem:[#allocation2 + $0x30] sm:$0xf]  ;;  %v3138_v6 = vshrl.u32 %v3026_v62, 16  ;;  %v3141_v50 = vshll.u32 %v3026_v62, 16  ;;  %vm424_vm7 = vcmp.gt.f32.partialorder %v8487_v4, 0.0  ;;  %v736_v9 = vor.u32 %v734_v13, %v733_v59 }
  0x67   : > { %v1264_v7 = vshrl.u32 %v1108_v2, 16  ;;  %v1267_v8 = vshll.u32 %v1108_v2, 16  ;;  %v737_v15 = vrot.slane %v733_v59, 4  ;;  %v744_v17 = vor.u32 %v742_v60, %v741_v54 }
  0x68   : > { %v746_v30 = vrot.slane %v741_v54, 4  ;;  %v3027_v20 = vld [vmem:[#allocation2 + $0x34] sm:$0xf]  ;;  %v3028_v61 = vld [vmem:[#allocation2 + $0x38] sm:$0x1]  ;;  %v3140_v24 = vrot.slane %v3138_v6, 4  ;;  %v487_v31 = vsel %vm423_vm6, %v391_v51, %v455_v0  ;;  %v8509_v32 = vmul.f32 %v6847_v21, %v8227_v26  ;;  %7459 = vmatpush3.bf16.msra.mxu0 %v7945_v44 }
  0x69   : > { %v3143_v25 = vrot.slane %v3141_v50, 5  ;;  %v3147_v34 = vshll.u32 %v3027_v20, 16  ;;  %v3151_v36 = vshrl.u32 %v3027_v20, 16  ;;  %v3157_v41 = vshll.u32 %v3028_v61, 16  ;;  %v1109_v63 = vld [vmem:[#allocation2 + $0x34] sm:$0xf]  ;;  %7460 = vmatprep.subr.bf16.mxu0 %v7946_v5 }
  0x6a   : > { %v1266_v12 = vrot.slane %v1264_v7, 4  ;;  %v1152_v29 = vld [vmem:[#allocation2 + $0x38] sm:$0x1]  ;;  %v1269_v39 = vrot.slane %v1267_v8, 5  ;;  %v1273_v43 = vshll.u32 %v1109_v63, 16  ;;  %v1277_v46 = vshrl.u32 %v1109_v63, 16 }
  0x6b   : > { %v3144_v38 = vor.u32 %v3143_v25, %v3140_v24  ;;  %v3149_v23 = vrot.slane %v3147_v34, 5  ;;  %v3153_v47 = vrot.slane %v3151_v36, 4  ;;  %v3159_v48 = vrot.slane %v3157_v41, 5  ;;  %v7951_v54 = vld [vmem:[%s10077_s3 + $0x30] sm:$0xff]   ;;  %v8530_v50 = vld [vmem:[%s8218_s27 + $0x40] sm:$0xff]  }
  0x6c   : > { %v1283_v27 = vshll.u32 %v1152_v29, 16  ;;  %v1270_v26 = vor.u32 %v1269_v39, %v1266_v12  ;;  %v1275_v51 = vrot.slane %v1273_v43, 5  ;;  %v1279_v44 = vrot.slane %v1277_v46, 4  ;;  %7461 = vmatpush3.bf16.msra.mxu0 %v7946_v5  ;;  %7266 = vmatprep.subr.bf16.mxu1 %v7951_v54  ;;  %v1023_v41 = vld [vmem:[#allocation2 + $0x48] sm:$0xf] }
  0x6d   : > { %v3145_v11 = vrot.slane %v3144_v38, 4  ;;  %v3154_v52 = vor.u32 %v3153_v47, %v3149_v23  ;;  %v745_v57 = vsel %vm8296_vm15, %v737_v15, %v744_v17  ;;  %v1017_v58 = vsel %vm8289_vm12, %v736_v9, %v1016_v28  ;;  %7494 = vmatprep.subr.bf16.mxu0 %v8505_v18  ;;  %7267 = vmatpush3.bf16.msra.mxu1 %v7951_v54 }
  0x6e   : > { %v1285_v55 = vrot.slane %v1283_v27, 5  ;;  %v1271_v40 = vrot.slane %v1270_v26, 4  ;;  %v1280_v60 = vor.u32 %v1279_v44, %v1275_v51  ;;  %1018 = vst [vmem:[#allocation2 + $0x3c] sm:$0xf] %v1017_v58  ;;  %1019 = vst [vmem:[#allocation2 + $0x40] sm:$0xf] %v745_v57  ;;  %v1021_v59 = vsel %vm8281_vm10, %v746_v30, %v1020_v37 }
  0x6f   : > { %v3150_v13 = vsel %vm8244_vm2, %v3145_v11, %v3149_v23  ;;  %v3155_v0 = vrot.slane %v3154_v52, 4  ;;  %1022 = vst [vmem:[#allocation2 + $0x44] sm:$0x1] %v1021_v59  ;;  %v456_v62 = vmul.f32 0.01, %v8487_v4  ;;  %v6762_v2 = vpack.c.bf16 %v487_v31, %v487_v31 }
  0x70   : > { %vm425_vm8 = vcmp.gt.f32.partialorder %v8490_v1, 0.0  ;;  %v1276_v21 = vsel %vm8244_vm2, %v1271_v40, %v1275_v51  ;;  %v1281_v5 = vrot.slane %v1280_v60, 4  ;;  %vm426_vm9 = vcmp.gt.f32.partialorder %v8493_v3, 0.0 }
  0x71   : > { %v457_v6 = vmul.f32 0.01, %v8490_v1  ;;  %v3160_v7 = vsel %vm8244_vm2, %v3155_v0, %v3159_v48  ;;  %v488_v8 = vsel %vm424_vm7, %v8487_v4, %v456_v62  ;;  %v748_v9 = vshrl.u32 %v6762_v2, 16  ;;  %v8548_v4 = vld [vmem:[%s10076_s2] ss:$0 sm:$0xff] }
  0x72   : > { %v751_v15 = vshll.u32 %v6762_v2, 16  ;;  %v6504_v17 = vcombine.low %v3150_v13, %v3160_v7  ;;  %v1286_v30 = vsel %vm8244_vm2, %v1281_v5, %v1285_v55  ;;  %v6763_v20 = vpack.c.bf16 %v488_v8, %v488_v8 }
  0x73   : > { %v458_v61 = vmul.f32 0.01, %v8493_v3  ;;  %v6345_v24 = vcombine.low %v1276_v21, %v1286_v30  ;;  %v8540_v25 = vrot.slane %v748_v9, 7  ;;  %v489_v28 = vsel %vm425_vm8, %v8490_v1, %v457_v6  ;;  %v1027_v21 = vld [vmem:[#allocation2 + $0x50] sm:$0x1] }
  0x74   : > { %v8552_v31 = vadd.f32 %v8548_v4, %v8496_v42  ;;  %7419 = vmatmul.mubr.bf16.gmra.mrb[4].mxu0 %v6504_v17  ;;  %v756_v34 = vshrl.u32 %v6763_v20, 16  ;;  %v759_v36 = vshll.u32 %v6763_v20, 16  ;;  %v8557_v12 = vpack.c.bf16 %v489_v28, %v489_v28 }
  0x75   : > { %v490_v63 = vsel %vm426_vm9, %v8493_v3, %v458_v61  ;;  %7230 = vmatprep.mubr.bf16.mxu1 %v6345_v24  ;;  %v1110_v1 = vld [vmem:[#allocation2 + $0x3c] sm:$0xf]  ;;  %v1111_v37 = vld [vmem:[#allocation2 + $0x40] sm:$0xf]  ;;  %v753_v29 = vor.u32 %v751_v15, %v8540_v25  ;;  %v8564_v42 = vadd.f32 %v8548_v4, %v8509_v32  ;;  %v6850_v43 = vunpack.c.l.bf16 %v8530_v50 }
  0x76   : > { %v3029_v38 = vld [vmem:[#allocation2 + $0x3c] sm:$0xf]  ;;  %v8560_v39 = vpack.c.bf16 %v490_v63, %v490_v63  ;;  %v1153_v46 = vld [vmem:[#allocation2 + $0x44] sm:$0x1]  ;;  %v1288_v23 = vshrl.u32 %v1110_v1, 16  ;;  %v1291_v47 = vshll.u32 %v1110_v1, 16  ;;  %v6851_v52 = vunpack.c.h.bf16 %v8530_v50 }
  0x77   : > { %v1297_v3 = vshll.u32 %v1111_v37, 16  ;;  %v1301_v48 = vshrl.u32 %v1111_v37, 16  ;;  %v1307_v27 = vshll.u32 %v1153_v46, 16  ;;  %v8567_v11 = vld [vmem:[#allocation2 + $0x40] sm:$0xf]  ;;  %v3162_v51 = vshrl.u32 %v3029_v38, 16 }
  0x78   : > { %v3031_v26 = vld [vmem:[#allocation2 + $0x44] sm:$0x1]  ;;  %v1024_v44 = vsel %vm8289_vm12, %v753_v29, %v1023_v41  ;;  %v1290_v55 = vrot.slane %v1288_v23, 4  ;;  %v1293_v32 = vrot.slane %v1291_v47, 5  ;;  %v3165_v60 = vshll.u32 %v3029_v38, 16  ;;  %v7953_v50 = vld [vmem:[%s10077_s3 + $0x38] sm:$0xff]  }
  0x79   : > { %v1299_v57 = vrot.slane %v1297_v3, 5  ;;  %v1303_v58 = vrot.slane %v1301_v48, 4  ;;  %1025 = vst [vmem:[#allocation2 + $0x48] sm:$0xf] %v1024_v44  ;;  %v1309_v13 = vrot.slane %v1307_v27, 5  ;;  %v3164_v40 = vrot.slane %v3162_v51, 4  ;;  %7268 = vmatprep.subr.bf16.mxu1 %v7953_v50 }
  0x7a   : > { %v3171_v59 = vshll.u32 %v8567_v11, 16  ;;  %v1294_v0 = vor.u32 %v1293_v32, %v1290_v55  ;;  %v3175_v2 = vshrl.u32 %v8567_v11, 16  ;;  %v3181_v54 = vshll.u32 %v3031_v26, 16  ;;  %v1030_v27 = vld [vmem:[#allocation2 + $0x54] sm:$0xf]  ;;  %7269 = vmatpush3.bf16.msra.mxu1 %v7953_v50 }
  0x7b   : > { %v1304_v62 = vor.u32 %v1303_v58, %v1299_v57  ;;  %v3167_v5 = vrot.slane %v3165_v60, 5  ;;  %v754_v7 = vrot.slane %v8540_v25, 4  ;;  %v758_v8 = vrot.slane %v756_v34, 7 }
  0x7c   : > { %v3173_v6 = vrot.slane %v3171_v59, 5  ;;  %v1295_v9 = vrot.slane %v1294_v0, 4  ;;  %v3177_v17 = vrot.slane %v3175_v2, 4  ;;  %v3183_v30 = vrot.slane %v3181_v54, 5  ;;  %v8593_v54 = vld [vmem:[%s8218_s27 + $0x48] sm:$0xff]  }
  0x7d   : > { %v1305_v15 = vrot.slane %v1304_v62, 4  ;;  %v3168_v20 = vor.u32 %v3167_v5, %v3164_v40  ;;  %v761_v61 = vor.u32 %v759_v36, %v758_v8  ;;  %v763_v24 = vrot.slane %v758_v8, 4 }
  0x7e   : > { %v765_v28 = vshrl.u32 %v8557_v12, 16  ;;  %v1300_v41 = vsel %vm8244_vm2, %v1295_v9, %v1299_v57  ;;  %v3178_v1 = vor.u32 %v3177_v17, %v3173_v6  ;;  %v768_v37 = vshll.u32 %v8557_v12, 16 }
  0x7f   : > { %v1310_v63 = vsel %vm8244_vm2, %v1305_v15, %v1309_v13  ;;  %v3169_v34 = vrot.slane %v3168_v20, 4  ;;  %v762_v38 = vsel %vm8296_vm15, %v754_v7, %v761_v61  ;;  %v1028_v36 = vsel %vm8281_vm10, %v763_v24, %v1027_v21  ;;  %v8610_v24 = vld [vmem:[%s10075_s1] ss:$0 sm:$0xff] }
  0x80   : > { %v6346_v25 = vcombine.low %v1300_v41, %v1310_v63  ;;  %v3032_v29 = vld [vmem:[#allocation2 + $0x48] sm:$0xf]  ;;  %v3179_v23 = vrot.slane %v3178_v1, 4  ;;  %1026 = vst [vmem:[#allocation2 + $0x4c] sm:$0xf] %v762_v38  ;;  %v767_v51 = vrot.slane %v765_v28, 7  ;;  %v358_v28 = vmul.f32 %v8610_v24, %v6850_v43 }
  0x81   : > { %v1112_v46 = vld [vmem:[#allocation2 + $0x48] sm:$0xf]  ;;  %1029 = vst [vmem:[#allocation2 + $0x50] sm:$0x1] %v1028_v36  ;;  %v3186_v47 = vshrl.u32 %v3032_v29, 16  ;;  %v3189_v3 = vshll.u32 %v3032_v29, 16  ;;  %v3174_v12 = vsel %vm8244_vm2, %v3169_v34, %v3173_v6  ;;  %v359_v41 = vmul.f32 %v8610_v24, %v6851_v52 }
  0x82   : > { %v1312_v48 = vshrl.u32 %v1112_v46, 16  ;;  %7231 = vmatmul.mubr.bf16.gmra.mrb[8].mxu1 %v6346_v25  ;;  %v1315_v26 = vshll.u32 %v1112_v46, 16  ;;  %v773_v44 = vshrl.u32 %v8560_v39, 16  ;;  %v3184_v55 = vsel %vm8244_vm2, %v3179_v23, %v3183_v30  ;;  %v1034_v6 = vld [vmem:[#allocation2 + $0x5c] sm:$0x1] }
  0x83   : > { %v3188_v32 = vrot.slane %v3186_v47, 4  ;;  %v3191_v57 = vrot.slane %v3189_v3, 5  ;;  %v6505_v13 = vcombine.low %v3174_v12, %v3184_v55  ;;  %v770_v60 = vor.u32 %v768_v37, %v767_v51 }
  0x84   : > { %v1314_v58 = vrot.slane %v1312_v48, 4  ;;  %v1317_v40 = vrot.slane %v1315_v26, 5  ;;  %v771_v59 = vrot.slane %v767_v51, 4  ;;  %v775_v62 = vrot.slane %v773_v44, 7 }
  0x85   : > { %v3192_v0 = vor.u32 %v3191_v57, %v3188_v32  ;;  %v776_v2 = vshll.u32 %v8560_v39, 16  ;;  %vm427_vm11 = vcmp.gt.f32.partialorder %v8552_v31, 0.0  ;;  %7422 = vmatprep.mubr.bf16.mxu0 %v6505_v13  ;;  %v1031_v5 = vsel %vm8289_vm12, %v770_v60, %v1030_v27 }
  0x86   : > { %v1318_v21 = vor.u32 %v1317_v40, %v1314_v58  ;;  %vm428_vm13 = vcmp.gt.f32.partialorder %v8564_v42, 0.0  ;;  %v459_v7 = vmul.f32 0.01, %v8552_v31  ;;  %v780_v15 = vrot.slane %v775_v62, 4  ;;  %1032 = vst [vmem:[#allocation2 + $0x54] sm:$0xf] %v1031_v5 }
  0x87   : > { %v3193_v8 = vrot.slane %v3192_v0, 4  ;;  %v778_v9 = vor.u32 %v776_v2, %v775_v62  ;;  %v460_v39 = vmul.f32 0.01, %v8564_v42  ;;  %v8600_v17 = vld [vmem:[#allocation2 + $0x4c] sm:$0xf]  ;;  %v6854_v63 = vunpack.c.l.bf16 %v8593_v54 }
  0x88   : > { %v8602_v30 = vld [vmem:[#allocation2 + $0x50] sm:$0x1]  ;;  %v1113_v20 = vld [vmem:[#allocation2 + $0x4c] sm:$0xf]  ;;  %v491_v61 = vsel %vm427_vm11, %v8552_v31, %v459_v7  ;;  %v3195_v1 = vshll.u32 %v8600_v17, 16  ;;  %v3199_v37 = vshrl.u32 %v8600_v17, 16  ;;  %v1035_v47 = vsel %vm8281_vm10, %v780_v15, %v1034_v6 }
  0x89   : > { %v3205_v31 = vshll.u32 %v8602_v30, 16  ;;  %v1154_v25 = vld [vmem:[#allocation2 + $0x50] sm:$0x1]  ;;  %v1319_v34 = vrot.slane %v1318_v21, 4  ;;  %v1321_v38 = vshll.u32 %v1113_v20, 16  ;;  %v1325_v36 = vshrl.u32 %v1113_v20, 16 }
  0x8a   : > { %v1331_v29 = vshll.u32 %v1154_v25, 16  ;;  %v779_v43 = vsel %vm8296_vm15, %v771_v59, %v778_v9  ;;  %v3197_v52 = vrot.slane %v3195_v1, 5  ;;  %v3201_v46 = vrot.slane %v3199_v37, 4  ;;  %1036 = vst [vmem:[#allocation2 + $0x5c] sm:$0x1] %v1035_v47 }
  0x8b   : > { %v3207_v23 = vrot.slane %v3205_v31, 5  ;;  %1033 = vst [vmem:[#allocation2 + $0x58] sm:$0xf] %v779_v43  ;;  %v1323_v3 = vrot.slane %v1321_v38, 5  ;;  %v1327_v48 = vrot.slane %v1325_v36, 4  ;;  %v492_v12 = vsel %vm428_vm13, %v8564_v42, %v460_v39 }
  0x8c   : > { %v1333_v27 = vrot.slane %v1331_v29, 5  ;;  %v3198_v26 = vsel %vm8244_vm2, %v3193_v8, %v3197_v52  ;;  %v3202_v51 = vor.u32 %v3201_v46, %v3197_v52  ;;  %v6766_v44 = vpack.c.bf16 %v491_v61, %v491_v61  ;;  %v1037_v46 = vld [vmem:[#allocation2 + $0x60] sm:$0xf] }
  0x8d   : > { %v8634_v55 = vpack.c.bf16 %v492_v12, %v492_v12  ;;  %v1324_v32 = vsel %vm8244_vm2, %v1319_v34, %v1323_v3  ;;  %v1328_v57 = vor.u32 %v1327_v48, %v1323_v3  ;;  %v1114_v58 = vld [vmem:[#allocation2 + $0x54] sm:$0xf]  ;;  %v8639_v40 = vadd.f32 %v8548_v4, %v358_v28 }
  0x8e   : > { %v3035_v13 = vld [vmem:[#allocation2 + $0x54] sm:$0xf]  ;;  %v8642_v42 = vadd.f32 %v8548_v4, %v359_v41  ;;  %v3203_v60 = vrot.slane %v3202_v51, 4  ;;  %v1336_v59 = vshrl.u32 %v1114_v58, 16  ;;  %v1339_v0 = vshll.u32 %v1114_v58, 16 }
  0x8f   : > { %v3210_v62 = vshrl.u32 %v3035_v13, 16  ;;  %v1329_v2 = vrot.slane %v1328_v57, 4  ;;  %v3213_v21 = vshll.u32 %v3035_v13, 16  ;;  %v782_v5 = vshrl.u32 %v6766_v44, 16 }
  0x90   : > { %v785_v6 = vshll.u32 %v6766_v44, 16  ;;  %v3208_v7 = vsel %vm8244_vm2, %v3203_v60, %v3207_v23  ;;  %v1338_v8 = vrot.slane %v1336_v59, 4  ;;  %v1341_v9 = vrot.slane %v1339_v0, 5  ;;  %v7957_v23 = vld [vmem:[%s10077_s3 + $0x80] sm:$0xff]  }
  0x91   : > { %v3212_v15 = vrot.slane %v3210_v62, 4  ;;  %v6506_v39 = vcombine.low %v3198_v26, %v3208_v7  ;;  %v1334_v20 = vsel %vm8244_vm2, %v1329_v2, %v1333_v27  ;;  %v3215_v41 = vrot.slane %v3213_v21, 5  ;;  %v1155_v31 = vld [vmem:[#allocation2 + $0x5c] sm:$0x1]  ;;  %7302 = vmatprep.subr.bf16.mxu1 %v7957_v23  ;;  %v3771_v2 = vld [vmem:[#allocation2 + $0xc] sm:$0xe] }
  0x92   : > { %v1115_v61 = vld [vmem:[#allocation2 + $0x58] sm:$0xf]  ;;  %v784_v1 = vrot.slane %v782_v5, 7  ;;  %v6347_v37 = vcombine.low %v1324_v32, %v1334_v20  ;;  %v1342_v25 = vor.u32 %v1341_v9, %v1338_v8  ;;  %v3037_v36 = vld [vmem:[#allocation2 + $0x5c] sm:$0x1]  ;;  %v1355_v29 = vshll.u32 %v1155_v31, 16 }
  0x93   : > { %v8648_v28 = vld [vmem:[#allocation2 + $0x58] sm:$0xf]  ;;  %v1345_v34 = vshll.u32 %v1115_v61, 16  ;;  %v1349_v38 = vshrl.u32 %v1115_v61, 16  ;;  %7423 = vmatmul.mubr.bf16.gmra.mrb[8].mxu0 %v6506_v39  ;;  %v3216_v43 = vor.u32 %v3215_v41, %v3212_v15  ;;  %v3229_v27 = vshll.u32 %v3037_v36, 16 }
  0x94   : > { %v3219_v50 = vshll.u32 %v8648_v28, 16  ;;  %v3223_v52 = vshrl.u32 %v8648_v28, 16  ;;  %7234 = vmatprep.mubr.bf16.mxu1 %v6347_v37  ;;  %v1343_v47 = vrot.slane %v1342_v25, 4  ;;  %v1357_v12 = vrot.slane %v1355_v29, 5  ;;  %v1041_v8 = vld [vmem:[#allocation2 + $0x68] sm:$0x1] }
  0x95   : > { %v1347_v3 = vrot.slane %v1345_v34, 5  ;;  %v1351_v48 = vrot.slane %v1349_v38, 4  ;;  %v3217_v26 = vrot.slane %v3216_v43, 4  ;;  %v3231_v58 = vrot.slane %v3229_v27, 5 }
  0x96   : > { %v3221_v51 = vrot.slane %v3219_v50, 5  ;;  %v3225_v44 = vrot.slane %v3223_v52, 4  ;;  %v787_v13 = vor.u32 %v785_v6, %v784_v1  ;;  %v788_v0 = vrot.slane %v784_v1, 4 }
  0x97   : > { %v1348_v32 = vsel %vm8244_vm2, %v1343_v47, %v1347_v3  ;;  %v1352_v57 = vor.u32 %v1351_v48, %v1347_v3  ;;  %v790_v62 = vshrl.u32 %v8634_v55, 16  ;;  %v793_v5 = vshll.u32 %v8634_v55, 16  ;;  %v3772_v55 = vld [vmem:[#allocation2 + $0x18] sm:$0xe] }
  0x98   : > { %v3222_v60 = vsel %vm8244_vm2, %v3217_v26, %v3221_v51  ;;  %v3226_v59 = vor.u32 %v3225_v44, %v3221_v51  ;;  %v1038_v7 = vsel %vm8289_vm12, %v787_v13, %v1037_v46  ;;  %vm429_vm14 = vcmp.gt.f32.partialorder %v8639_v40, 0.0  ;;  %v8041_v46 = vld [vmem:[#allocation2 + $0x10] sm:$0xf] }
  0x99   : > { %v1353_v21 = vrot.slane %v1352_v57, 4  ;;  %v792_v15 = vrot.slane %v790_v62, 7  ;;  %1039 = vst [vmem:[#allocation2 + $0x60] sm:$0xf] %v1038_v7  ;;  %vm430_vm0 = vcmp.gt.f32.partialorder %v8642_v42, 0.0  ;;  %vm2195_vm3 = vcmask 1046532  }
  0x9a   : > { %v3227_v9 = vrot.slane %v3226_v59, 4  ;;  %v461_v6 = vmul.f32 0.01, %v8639_v40  ;;  %v462_v20 = vmul.f32 0.01, %v8642_v42  ;;  %vm8671_vm4 = vmor %vm2194_vm1, %vm2195_vm3  ;;  %v6525_v36 = vrot.slane %v3771_v2, 9 }
  0x9b   : > { %v1358_v39 = vsel %vm8244_vm2, %v1353_v21, %v1357_v12  ;;  %v795_v1 = vor.u32 %v793_v5, %v792_v15  ;;  %v797_v37 = vrot.slane %v792_v15, 4  ;;  %v3837_v23 = vrot.slane %v8041_v46, 5 }
  0x9c   : > { %v6348_v61 = vcombine.low %v1348_v32, %v1358_v39  ;;  %v3232_v41 = vsel %vm8244_vm2, %v3227_v9, %v3231_v58  ;;  %v493_v34 = vsel %vm429_vm14, %v8639_v40, %v461_v6  ;;  %v494_v38 = vsel %vm430_vm0, %v8642_v42, %v462_v20  ;;  %v1048_v39 = vld [vmem:[#allocation2 + $0x74] sm:$0x1] }
  0x9d   : > { %v6507_v25 = vcombine.low %v3222_v60, %v3232_v41  ;;  %v796_v29 = vsel %vm8296_vm15, %v788_v0, %v795_v1  ;;  %v1042_v43 = vsel %vm8281_vm10, %v797_v37, %v1041_v8  ;;  %v6768_v50 = vpack.c.bf16 %v493_v34, %v493_v34  ;;  %v1044_v8 = vld [vmem:[#allocation2 + $0x6c] sm:$0xf]  ;;  %v6969_v34 = vld [vmem:[%s8218_s27 + $0x50] sm:$0xff]  }
  0x9e   : > { %7235 = vmatmul.mubr.bf16.gmra.mrb[12].mxu1 %v6348_v61  ;;  %v6769_v52 = vpack.c.bf16 %v494_v38, %v494_v38  ;;  %1040 = vst [vmem:[#allocation2 + $0x64] sm:$0xf] %v796_v29  ;;  %1043 = vst [vmem:[#allocation2 + $0x68] sm:$0x1] %v1042_v43  ;;  %v6526_v47 = vrot.slane %v3772_v55, 9  ;;  %v8688_v40 = vsel %vm8671_vm4, %v8478_v53, %v3847_v33  ;;  %v6855_v42 = vunpack.c.h.bf16 %v8593_v54 }
  0x9f   : > { %7426 = vmatprep.mubr.bf16.mxu0 %v6507_v25  ;;  %v799_v3 = vshrl.u32 %v6768_v50, 16  ;;  %v802_v48 = vshll.u32 %v6768_v50, 16  ;;  %v8693_v44 = vsel %vm8671_vm4, %v6525_v36, %v3837_v23  ;;  %v3839_v32 = vrot.slane %v3837_v23, 4 }
  0xa0   : > { %v807_v27 = vshrl.u32 %v6769_v52, 16  ;;  %v810_v12 = vshll.u32 %v6769_v52, 16  ;;  %v3038_v26 = vld [vmem:[#allocation2 + $0x60] sm:$0xf]  ;;  %v8699_v56 = vsel %vm8671_vm4, %v6526_v47, %v3844_v19  ;;  %v360_v33 = vmul.f32 %v8610_v24, %v6854_v63 }
  0xa1   : > { %v1116_v51 = vld [vmem:[#allocation2 + $0x60] sm:$0xf]  ;;  %v3234_v53 = vshrl.u32 %v3038_v26, 16  ;;  %v3237_v57 = vshll.u32 %v3038_v26, 16  ;;  %v801_v60 = vrot.slane %v799_v3, 7  ;;  %v8708_v0 = vsel %vm8671_vm4, %v3839_v32, %v3840_v45 }
  0xa2   : > { %v1360_v58 = vshrl.u32 %v1116_v51, 16  ;;  %v1363_v13 = vshll.u32 %v1116_v51, 16  ;;  %v809_v59 = vrot.slane %v807_v27, 7  ;;  %v6558_v49 = vcombine.low %v8699_v56, %v8688_v40  ;;  %v3773_v27 = vld [vmem:[#allocation2 + $0x24] sm:$0xe] }
  0xa3   : > { %v3236_v19 = vrot.slane %v3234_v53, 4  ;;  %v3239_v62 = vrot.slane %v3237_v57, 5  ;;  %v804_v63 = vor.u32 %v802_v48, %v801_v60  ;;  %v805_v21 = vrot.slane %v801_v60, 4 }
  0xa4   : > { %v1362_v54 = vrot.slane %v1360_v58, 4  ;;  %v1365_v2 = vrot.slane %v1363_v13, 5  ;;  %v812_v5 = vor.u32 %v810_v12, %v809_v59  ;;  %v814_v7 = vrot.slane %v809_v59, 4 }
  0xa5   : > { %v8712_v9 = vld [vmem:[#allocation2 + $0x64] sm:$0xf]  ;;  %v8714_v22 = vld [vmem:[#allocation2 + $0x68] sm:$0x1]  ;;  %v3240_v15 = vor.u32 %v3239_v62, %v3236_v19  ;;  %v6557_v20 = vcombine.low %v8693_v44, %v8708_v0  ;;  %v361_v55 = vmul.f32 %v8610_v24, %v6855_v42  ;;  %v1045_v48 = vsel %vm8289_vm12, %v804_v63, %v1044_v8 }
  0xa6   : > { %v1117_v45 = vld [vmem:[#allocation2 + $0x64] sm:$0xf]  ;;  %v1366_v6 = vor.u32 %v1365_v2, %v1362_v54  ;;  %v3243_v61 = vshll.u32 %v8712_v9, 16  ;;  %v3247_v41 = vshrl.u32 %v8712_v9, 16  ;;  %v3253_v1 = vshll.u32 %v8714_v22, 16 }
  0xa7   : > { %v1156_v37 = vld [vmem:[#allocation2 + $0x68] sm:$0x1]  ;;  %v1369_v25 = vshll.u32 %v1117_v45, 16  ;;  %v3241_v38 = vrot.slane %v3240_v15, 4  ;;  %v1373_v29 = vshrl.u32 %v1117_v45, 16  ;;  %v813_v42 = vsel %vm8296_vm15, %v805_v21, %v812_v5 }
  0xa8   : > { %v1367_v36 = vrot.slane %v1366_v6, 4  ;;  %v1379_v43 = vshll.u32 %v1156_v37, 16  ;;  %v3245_v50 = vrot.slane %v3243_v61, 5  ;;  %v3249_v52 = vrot.slane %v3247_v41, 4  ;;  %1046 = vst [vmem:[#allocation2 + $0x6c] sm:$0xf] %v1045_v48 }
  0xa9   : > { %v3255_v46 = vrot.slane %v3253_v1, 5  ;;  %v1371_v23 = vrot.slane %v1369_v25, 5  ;;  %v1375_v47 = vrot.slane %v1373_v29, 4  ;;  %1047 = vst [vmem:[#allocation2 + $0x70] sm:$0xf] %v813_v42  ;;  %v1049_v32 = vsel %vm8281_vm10, %v814_v7, %v1048_v39 }
  0xaa   : > { %v1381_v3 = vrot.slane %v1379_v43, 5  ;;  %v3246_v12 = vsel %vm8244_vm2, %v3241_v38, %v3245_v50  ;;  %v3250_v26 = vor.u32 %v3249_v52, %v3245_v50  ;;  %1050 = vst [vmem:[#allocation2 + $0x74] sm:$0x1] %v1049_v32  ;;  %v399_v57 = vadd.f32 %v8548_v4, %v360_v33  ;;  %v8042_v62 = vld [vmem:[#allocation2 + $0x28] sm:$0xf] }
  0xab   : > { %v1372_v51 = vsel %vm8244_vm2, %v1367_v36, %v1371_v23  ;;  %v1376_v53 = vor.u32 %v1375_v47, %v1371_v23  ;;  %v400_v58 = vadd.f32 %v8548_v4, %v361_v55  ;;  %v6858_v13 = vunpack.c.l.bf16 %v6969_v34  ;;  %v8043_v36 = vld [vmem:[#allocation2 + $0x2c] sm:$0x1] }
  0xac   : > { %v3251_v60 = vrot.slane %v3250_v26, 4  ;;  %v6859_v59 = vunpack.c.h.bf16 %v6969_v34  ;;  %v6527_v19 = vrot.slane %v3773_v27, 9  ;;  %v3851_v54 = vrot.slane %v8042_v62, 5 }
  0xad   : > { %v1377_v2 = vrot.slane %v1376_v53, 4  ;;  %vm431_vm5 = vcmp.gt.f32.partialorder %v399_v57, 0.0  ;;  %vm432_vm6 = vcmp.gt.f32.partialorder %v400_v58, 0.0  ;;  %v463_v63 = vmul.f32 0.01, %v399_v57 }
  0xae   : > { %v3256_v21 = vsel %vm8244_vm2, %v3251_v60, %v3255_v46  ;;  %v464_v5 = vmul.f32 0.01, %v400_v58  ;;  %v362_v7 = vmul.f32 %v8610_v24, %v6858_v13  ;;  %v363_v33 = vmul.f32 %v8610_v24, %v6859_v59  ;;  %v1051_v59 = vld [vmem:[#allocation2 + $0x78] sm:$0xf] }
  0xaf   : > { %v6508_v8 = vcombine.low %v3246_v12, %v3256_v21  ;;  %v1382_v15 = vsel %vm8244_vm2, %v1377_v2, %v1381_v3  ;;  %v495_v45 = vsel %vm431_vm5, %v399_v57, %v463_v63  ;;  %v8743_v6 = vsel %vm8671_vm4, %v6527_v19, %v3851_v54  ;;  %v1118_v1 = vld [vmem:[#allocation2 + $0x6c] sm:$0xf]  ;;  %v1055_v19 = vld [vmem:[#allocation2 + $0x80] sm:$0x1] }
  0xb0   : > { %v6349_v39 = vcombine.low %v1372_v51, %v1382_v15  ;;  %v496_v55 = vsel %vm432_vm6, %v400_v58, %v464_v5  ;;  %v6770_v61 = vpack.c.bf16 %v495_v45, %v495_v45  ;;  %v401_v41 = vadd.f32 %v8548_v4, %v362_v7  ;;  %v1119_v37 = vld [vmem:[#allocation2 + $0x70] sm:$0xf] }
  0xb1   : > { %7427 = vmatmul.mubr.bf16.gmra.mrb[12].mxu0 %v6508_v8  ;;  %v6771_v25 = vpack.c.bf16 %v496_v55, %v496_v55  ;;  %v402_v34 = vadd.f32 %v8548_v4, %v363_v33  ;;  %v3853_v38 = vrot.slane %v3851_v54, 4  ;;  %v3854_v29 = vrot.slane %v8043_v36, 5  ;;  %v1157_v43 = vld [vmem:[#allocation2 + $0x74] sm:$0x1]  ;;  %v7950_v54 = vld [vmem:[%s10077_s3 + $0x188] sm:$0xff]  }
  0xb2   : > { %7238 = vmatprep.mubr.bf16.mxu1 %v6349_v39  ;;  %v1384_v50 = vshrl.u32 %v1118_v1, 16  ;;  %v1387_v52 = vshll.u32 %v1118_v1, 16  ;;  %v1393_v46 = vshll.u32 %v1119_v37, 16  ;;  %v1397_v23 = vshrl.u32 %v1119_v37, 16  ;;  %7462 = vmatprep.mubr.bf16.mxu0 %v6557_v20  ;;  %v3774_v45 = vld [vmem:[#allocation2 + $0x30] sm:$0xe] }
  0xb3   : > { %v1403_v47 = vshll.u32 %v1157_v43, 16  ;;  %v816_v3 = vshrl.u32 %v6770_v61, 16  ;;  %v819_v42 = vshll.u32 %v6770_v61, 16  ;;  %v824_v48 = vshrl.u32 %v6771_v25, 16  ;;  %v6970_v39 = vld [vmem:[%s8218_s27 + $0x58] sm:$0xff]   ;;  %v7952_v61 = vld [vmem:[%s10077_s3 + $0x190] sm:$0xff]  }
  0xb4   : > { %v1386_v27 = vrot.slane %v1384_v50, 4  ;;  %v1389_v12 = vrot.slane %v1387_v52, 5  ;;  %v1395_v26 = vrot.slane %v1393_v46, 5  ;;  %v1399_v51 = vrot.slane %v1397_v23, 4  ;;  %v8776_v36 = vld [vmem:[#allocation2 + $0x3c] sm:$0xe] }
  0xb5   : > { %v1405_v32 = vrot.slane %v1403_v47, 5  ;;  %v818_v53 = vrot.slane %v816_v3, 7  ;;  %v826_v57 = vrot.slane %v824_v48, 7  ;;  %v827_v58 = vshll.u32 %v6771_v25, 16  ;;  %v8045_v50 = vld [vmem:[#allocation2 + $0x38] sm:$0x1] }
  0xb6   : > { %v1390_v13 = vor.u32 %v1389_v12, %v1386_v27  ;;  %v1400_v60 = vor.u32 %v1399_v51, %v1395_v26  ;;  %vm433_vm7 = vcmp.gt.f32.partialorder %v401_v41, 0.0  ;;  %vm434_vm8 = vcmp.gt.f32.partialorder %v402_v34, 0.0  ;;  %v6971_v46 = vld [vmem:[%s8218_s27 + $0x60] sm:$0xff]  }
  0xb7   : > { %v821_v44 = vor.u32 %v819_v42, %v818_v53  ;;  %v822_v0 = vrot.slane %v818_v53, 4  ;;  %v829_v20 = vor.u32 %v827_v58, %v826_v57  ;;  %v831_v62 = vrot.slane %v826_v57, 4  ;;  %v1058_v42 = vld [vmem:[#allocation2 + $0x84] sm:$0xf] }
  0xb8   : > { %v1391_v2 = vrot.slane %v1390_v13, 4  ;;  %v1401_v63 = vrot.slane %v1400_v60, 4  ;;  %v465_v21 = vmul.f32 0.01, %v401_v41  ;;  %v466_v5 = vmul.f32 0.01, %v402_v34 }
  0xb9   : > { %7463 = vmatmul.mubr.bf16.vlgmr.msra.gmra.mrb[0].mxu0 %v6558_v49  ;;  %v830_v7 = vsel %vm8296_vm15, %v822_v0, %v829_v20  ;;  %v1052_v33 = vsel %vm8289_vm12, %v821_v44, %v1051_v59  ;;  %v1056_v8 = vsel %vm8281_vm10, %v831_v62, %v1055_v19  ;;  %v3855_v15 = vsel %vm8671_vm4, %v3853_v38, %v3854_v29  ;;  %v8044_v29 = vld [vmem:[#allocation2 + $0x34] sm:$0xf] }
  0xba   : > { %v1396_v55 = vsel %vm8244_vm2, %v1391_v2, %v1395_v26  ;;  %v1406_v40 = vsel %vm8244_vm2, %v1401_v63, %v1405_v32  ;;  %7495 = vmatpush3.bf16.msra.mxu0 %v8505_v18  ;;  %1053 = vst [vmem:[#allocation2 + $0x78] sm:$0xf] %v1052_v33  ;;  %1054 = vst [vmem:[#allocation2 + $0x7c] sm:$0xf] %v830_v7  ;;  %v497_v56 = vsel %vm433_vm7, %v401_v41, %v465_v21  ;;  %v7954_v26 = vld [vmem:[%s10077_s3 + $0x198] sm:$0xff]  }
  0xbb   : > { %1057 = vst [vmem:[#allocation2 + $0x80] sm:$0x1] %v1056_v8  ;;  %v498_v49 = vsel %vm434_vm8, %v402_v34, %v466_v5  ;;  %v6350_v1 = vcombine.low %v1396_v55, %v1406_v40  ;;  %v6772_v37 = vpack.c.bf16 %v497_v56, %v497_v56  ;;  %v6559_v38 = vcombine.low %v8743_v6, %v3855_v15  ;;  %v1062_v33 = vld [vmem:[#allocation2 + $0x8c] sm:$0x1]  ;;  %v7958_v55 = vld [vmem:[%s10077_s3 + $0x1a0] sm:$0xff]  }
  0xbc   : > { %v6773_v25 = vpack.c.bf16 %v498_v49, %v498_v49  ;;  %7496 = vmatprep.subr.bf16.mxu0 %v7950_v54  ;;  %v6528_v18 = vrot.slane %v3774_v45, 9  ;;  %v3858_v43 = vrot.slane %v8044_v29, 5  ;;  %v3861_v52 = vrot.slane %v8045_v50, 5 }
  0xbd   : > { %v6862_v41 = vunpack.c.l.bf16 %v6970_v39  ;;  %7239 = vmatmul.mubr.bf16.gmra.mrb[16].mxu1 %v6350_v1  ;;  %v833_v34 = vshrl.u32 %v6772_v37, 16  ;;  %v836_v23 = vshll.u32 %v6772_v37, 16  ;;  %7466 = vmatprep.mubr.bf16.mxu0 %v6559_v38  ;;  %v6863_v27 = vunpack.c.h.bf16 %v6970_v39 }
  0xbe   : > { %v841_v47 = vshrl.u32 %v6773_v25, 16  ;;  %v844_v3 = vshll.u32 %v6773_v25, 16  ;;  %v3859_v6 = vsel %vm8671_vm4, %v6528_v18, %v3858_v43  ;;  %v3860_v48 = vrot.slane %v3858_v43, 4  ;;  %7497 = vmatpush3.bf16.msra.mxu0 %v7950_v54 }
  0xbf   : > { %v364_v12 = vmul.f32 %v8610_v24, %v6862_v41  ;;  %v835_v51 = vrot.slane %v833_v34, 7  ;;  %v6866_v53 = vunpack.c.l.bf16 %v6971_v46  ;;  %v6867_v57 = vunpack.c.h.bf16 %v6971_v46  ;;  %7498 = vmatprep.subr.bf16.mxu0 %v7952_v61  ;;  %v8805_v41 = vld [vmem:[%s10076_s2] ss:$0 sm:$0xff] }
  0xc0   : > { %v843_v32 = vrot.slane %v841_v47, 7  ;;  %v3862_v58 = vsel %vm8671_vm4, %v3860_v48, %v3861_v52  ;;  %v365_v13 = vmul.f32 %v8610_v24, %v6863_v27  ;;  %v6529_v59 = vrot.slane %v8776_v36, 9  ;;  %v7970_v36 = vld [vmem:[%s10077_s3 + $0x1b8] sm:$0xff]  }
  0xc1   : > { %v403_v60 = vadd.f32 %v8548_v4, %v364_v12  ;;  %v1120_v19 = vld [vmem:[#allocation2 + $0x78] sm:$0xf]  ;;  %v1121_v44 = vld [vmem:[#allocation2 + $0x7c] sm:$0xf]  ;;  %v838_v20 = vor.u32 %v836_v23, %v835_v51  ;;  %v6560_v54 = vcombine.low %v3859_v6, %v3862_v58  ;;  %v366_v2 = vmul.f32 %v8610_v24, %v6866_v53 }
  0xc2   : > { %v1158_v0 = vld [vmem:[#allocation2 + $0x80] sm:$0x1]  ;;  %v846_v62 = vor.u32 %v844_v3, %v843_v32  ;;  %v1408_v63 = vshrl.u32 %v1120_v19, 16  ;;  %v1411_v21 = vshll.u32 %v1120_v19, 16  ;;  %v1417_v5 = vshll.u32 %v1121_v44, 16  ;;  %7499 = vmatpush3.bf16.msra.mxu0 %v7952_v61 }
  0xc3   : > { %v1421_v7 = vshrl.u32 %v1121_v44, 16  ;;  %v1427_v8 = vshll.u32 %v1158_v0, 16  ;;  %v839_v15 = vrot.slane %v835_v51, 4  ;;  %v848_v45 = vrot.slane %v843_v32, 4  ;;  %7467 = vmatmul.mubr.bf16.gmra.mrb[4].mxu0 %v6560_v54  ;;  %7500 = vmatprep.subr.bf16.mxu0 %v7954_v26 }
  0xc4   : > { %v1059_v39 = vsel %vm8289_vm12, %v838_v20, %v1058_v42  ;;  %v1410_v40 = vrot.slane %v1408_v63, 4  ;;  %v1413_v56 = vrot.slane %v1411_v21, 5  ;;  %v1419_v49 = vrot.slane %v1417_v5, 5 }
  0xc5   : > { %v1423_v1 = vrot.slane %v1421_v7, 4  ;;  %1060 = vst [vmem:[#allocation2 + $0x84] sm:$0xf] %v1059_v39  ;;  %v1429_v37 = vrot.slane %v1427_v8, 5  ;;  %v847_v61 = vsel %vm8296_vm15, %v839_v15, %v846_v62  ;;  %v1063_v25 = vsel %vm8281_vm10, %v848_v45, %v1062_v33  ;;  %v1065_v8 = vld [vmem:[#allocation2 + $0x90] sm:$0xf] }
  0xc6   : > { %v404_v38 = vadd.f32 %v8548_v4, %v365_v13  ;;  %v1414_v18 = vor.u32 %v1413_v56, %v1410_v40  ;;  %1061 = vst [vmem:[#allocation2 + $0x88] sm:$0xf] %v847_v61  ;;  %1064 = vst [vmem:[#allocation2 + $0x8c] sm:$0x1] %v1063_v25  ;;  %vm435_vm9 = vcmp.gt.f32.partialorder %v403_v60, 0.0  ;;  %7501 = vmatpush3.bf16.msra.mxu0 %v7954_v26  ;;  %v7962_v4 = vld [vmem:[%s10077_s3 + $0x1a8] sm:$0xff]  }
  0xc7   : > { %v1424_v29 = vor.u32 %v1423_v1, %v1419_v49  ;;  %v467_v43 = vmul.f32 0.01, %v403_v60  ;;  %v367_v52 = vmul.f32 %v8610_v24, %v6867_v57  ;;  %v405_v46 = vadd.f32 %v8805_v41, %v366_v2  ;;  %7502 = vmatprep.subr.bf16.mxu0 %v7958_v55 }
  0xc8   : > { %vm436_vm11 = vcmp.gt.f32.partialorder %v404_v38, 0.0  ;;  %v468_v50 = vmul.f32 0.01, %v404_v38  ;;  %v1415_v34 = vrot.slane %v1414_v18, 4  ;;  %v3865_v3 = vrot.slane %v8567_v11, 5  ;;  %v7966_v11 = vld [vmem:[%s10077_s3 + $0x1b0] sm:$0xff]  }
  0xc9   : > { %v1425_v23 = vrot.slane %v1424_v29, 4  ;;  %v499_v47 = vsel %vm435_vm9, %v403_v60, %v467_v43  ;;  %v406_v48 = vadd.f32 %v8805_v41, %v367_v52  ;;  %vm437_vm13 = vcmp.gt.f32.partialorder %v405_v46, 0.0  ;;  %v3776_v18 = vld [vmem:[#allocation2 + $0x48] sm:$0xe] }
  0xca   : > { %v500_v42 = vsel %vm436_vm11, %v404_v38, %v468_v50  ;;  %v6774_v6 = vpack.c.bf16 %v499_v47, %v499_v47  ;;  %v1420_v27 = vsel %vm8244_vm2, %v1415_v34, %v1419_v49  ;;  %v469_v51 = vmul.f32 0.01, %v405_v46  ;;  %7503 = vmatpush3.bf16.msra.mxu0 %v7958_v55  ;;  %v1069_v49 = vld [vmem:[#allocation2 + $0x98] sm:$0x1] }
  0xcb   : > { %v1430_v12 = vsel %vm8244_vm2, %v1425_v23, %v1429_v37  ;;  %v6775_v26 = vpack.c.bf16 %v500_v42, %v500_v42  ;;  %vm438_vm14 = vcmp.gt.f32.partialorder %v406_v48, 0.0  ;;  %7504 = vmatprep.subr.bf16.mxu0 %v7962_v4  ;;  %v3866_v2 = vsel %vm8671_vm4, %v6529_v59, %v3865_v3  ;;  %v8047_v23 = vld [vmem:[#allocation2 + $0x44] sm:$0x1] }
  0xcc   : > { %v6351_v32 = vcombine.low %v1420_v27, %v1430_v12  ;;  %v8817_v53 = vld [vmem:[#allocation2 + $0x84] sm:$0xf]  ;;  %v850_v57 = vshrl.u32 %v6774_v6, 16  ;;  %v853_v58 = vshll.u32 %v6774_v6, 16  ;;  %v501_v54 = vsel %vm437_vm13, %v405_v46, %v469_v51  ;;  %v6972_v12 = vld [vmem:[%s8218_s27 + $0x68] sm:$0xff]  }
  0xcd   : > { %v1432_v13 = vshrl.u32 %v8817_v53, 16  ;;  %v1435_v60 = vshll.u32 %v8817_v53, 16  ;;  %v858_v19 = vshrl.u32 %v6775_v26, 16  ;;  %v861_v44 = vshll.u32 %v6775_v26, 16  ;;  %v8824_v0 = vld [vmem:[#allocation2 + $0x88] sm:$0xf] }
  0xce   : > { %7242 = vmatprep.mubr.bf16.mxu1 %v6351_v32  ;;  %v1159_v20 = vld [vmem:[#allocation2 + $0x8c] sm:$0x1]  ;;  %v852_v62 = vrot.slane %v850_v57, 7  ;;  %v3867_v63 = vrot.slane %v3865_v3, 4  ;;  %v1441_v7 = vshll.u32 %v8824_v0, 16  ;;  %v1445_v33 = vshrl.u32 %v8824_v0, 16  ;;  %7505 = vmatpush3.bf16.msra.mxu0 %v7962_v4 }
  0xcf   : > { %v1434_v21 = vrot.slane %v1432_v13, 4  ;;  %v1437_v5 = vrot.slane %v1435_v60, 5  ;;  %v1451_v15 = vshll.u32 %v1159_v20, 16  ;;  %v860_v55 = vrot.slane %v858_v19, 7  ;;  %7506 = vmatprep.subr.bf16.mxu0 %v7966_v11  ;;  %v8846_v3 = vld [vmem:[%s10077_s3 + $0x1c0] sm:$0xff]  }
  0xd0   : > { %v855_v45 = vor.u32 %v853_v58, %v852_v62  ;;  %v856_v39 = vrot.slane %v852_v62, 4  ;;  %v1443_v59 = vrot.slane %v1441_v7, 5  ;;  %v1447_v56 = vrot.slane %v1445_v33, 4  ;;  %v1072_v13 = vld [vmem:[#allocation2 + $0x9c] sm:$0xf] }
  0xd1   : > { %v1438_v40 = vor.u32 %v1437_v5, %v1434_v21  ;;  %v470_v1 = vmul.f32 0.01, %v406_v48  ;;  %v1453_v37 = vrot.slane %v1451_v15, 5  ;;  %v863_v61 = vor.u32 %v861_v44, %v860_v55  ;;  %v1076_v5 = vld [vmem:[#allocation2 + $0xa4] sm:$0x1] }
  0xd2   : > { %v865_v25 = vrot.slane %v860_v55, 4  ;;  %v1066_v38 = vsel %vm8289_vm12, %v855_v45, %v1065_v8  ;;  %v1448_v43 = vor.u32 %v1447_v56, %v1443_v59  ;;  %v6776_v52 = vpack.c.bf16 %v501_v54, %v501_v54  ;;  %7507 = vmatpush3.bf16.msra.mxu0 %v7966_v11 }
  0xd3   : > { %v1439_v29 = vrot.slane %v1438_v40, 4  ;;  %1067 = vst [vmem:[#allocation2 + $0x90] sm:$0xf] %v1066_v38  ;;  %v502_v50 = vsel %vm438_vm14, %v406_v48, %v470_v1  ;;  %v864_v46 = vsel %vm8296_vm15, %v856_v39, %v863_v61  ;;  %v3868_v47 = vrot.slane %v8047_v23, 5  ;;  %7508 = vmatprep.subr.bf16.mxu0 %v7970_v36  ;;  %v6973_v40 = vld [vmem:[%s8218_s27 + $0x70] sm:$0xff]  }
  0xd4   : > { %v1070_v4 = vsel %vm8281_vm10, %v865_v25, %v1069_v49  ;;  %v6777_v34 = vpack.c.bf16 %v502_v50, %v502_v50  ;;  %v1449_v6 = vrot.slane %v1448_v43, 4  ;;  %1068 = vst [vmem:[#allocation2 + $0x94] sm:$0xf] %v864_v46  ;;  %v867_v48 = vshrl.u32 %v6776_v52, 16 }
  0xd5   : > { %v1444_v42 = vsel %vm8244_vm2, %v1439_v29, %v1443_v59  ;;  %1071 = vst [vmem:[#allocation2 + $0x98] sm:$0x1] %v1070_v4  ;;  %v870_v27 = vshll.u32 %v6776_v52, 16  ;;  %v3869_v32 = vsel %vm8671_vm4, %v3867_v63, %v3868_v47  ;;  %v6530_v57 = vrot.slane %v3776_v18, 9 }
  0xd6   : > { %v875_v26 = vshrl.u32 %v6777_v34, 16  ;;  %v878_v51 = vshll.u32 %v6777_v34, 16  ;;  %v1454_v58 = vsel %vm8244_vm2, %v1449_v6, %v1453_v37  ;;  %v869_v11 = vrot.slane %v867_v48, 7  ;;  %7509 = vmatpush3.bf16.msra.mxu0 %v7970_v36  ;;  %v8879_v37 = vld [vmem:[%s10075_s1] ss:$0 sm:$0xff] }
  0xd7   : > { %v6561_v60 = vcombine.low %v3866_v2, %v3869_v32  ;;  %v3872_v19 = vrot.slane %v8600_v17, 5  ;;  %v6352_v44 = vcombine.low %v1444_v42, %v1454_v58  ;;  %v3875_v62 = vrot.slane %v8602_v30, 5  ;;  %7542 = vmatprep.subr.bf16.mxu0 %v8846_v3  ;;  %v8886_v42 = vld [vmem:[#allocation2 + $0x54] sm:$0xe] }
  0xd8   : > { %v877_v20 = vrot.slane %v875_v26, 7  ;;  %v6870_v54 = vunpack.c.l.bf16 %v6972_v12  ;;  %v872_v21 = vor.u32 %v870_v27, %v869_v11  ;;  %v873_v63 = vrot.slane %v869_v11, 4 }
  0xd9   : > { %7470 = vmatprep.mubr.bf16.mxu0 %v6561_v60  ;;  %v3873_v7 = vsel %vm8671_vm4, %v6530_v57, %v3872_v19  ;;  %v3874_v33 = vrot.slane %v3872_v19, 4  ;;  %7243 = vmatmul.mubr.bf16.gmra.mrb[20].mxu1 %v6352_v44  ;;  %v6871_v15 = vunpack.c.h.bf16 %v6972_v12  ;;  %v6874_v46 = vunpack.c.l.bf16 %v6973_v40 }
  0xda   : > { %v8860_v2 = vld [vmem:[#allocation2 + $0x90] sm:$0xf]  ;;  %v880_v17 = vor.u32 %v878_v51, %v877_v20  ;;  %v882_v8 = vrot.slane %v877_v20, 4  ;;  %v368_v30 = vmul.f32 %v8610_v24, %v6870_v54  ;;  %v1073_v55 = vsel %vm8289_vm12, %v872_v21, %v1072_v13 }
  0xdb   : > { %v1456_v45 = vshrl.u32 %v8860_v2, 16  ;;  %v1459_v39 = vshll.u32 %v8860_v2, 16  ;;  %v3876_v36 = vsel %vm8671_vm4, %v3874_v33, %v3875_v62  ;;  %v8870_v59 = vld [vmem:[#allocation2 + $0x94] sm:$0xf]  ;;  %1074 = vst [vmem:[#allocation2 + $0x9c] sm:$0xf] %v1073_v55  ;;  %v369_v61 = vmul.f32 %v8879_v37, %v6871_v15 }
  0xdc   : > { %v1160_v56 = vld [vmem:[#allocation2 + $0x98] sm:$0x1]  ;;  %v881_v49 = vsel %vm8296_vm15, %v873_v63, %v880_v17  ;;  %v1077_v24 = vsel %vm8281_vm10, %v882_v8, %v1076_v5  ;;  %v6562_v1 = vcombine.low %v3873_v7, %v3876_v36  ;;  %v1465_v18 = vshll.u32 %v8870_v59, 16 }
  0xdd   : > { %v1458_v25 = vrot.slane %v1456_v45, 4  ;;  %v1461_v38 = vrot.slane %v1459_v39, 5  ;;  %v1469_v29 = vshrl.u32 %v8870_v59, 16  ;;  %1075 = vst [vmem:[#allocation2 + $0xa0] sm:$0xf] %v881_v49  ;;  %v1475_v43 = vshll.u32 %v1160_v56, 16 }
  0xde   : > { %1078 = vst [vmem:[#allocation2 + $0xa4] sm:$0x1] %v1077_v24  ;;  %7471 = vmatmul.mubr.bf16.gmra.mrb[8].mxu0 %v6562_v1  ;;  %v407_v50 = vadd.f32 %v8805_v41, %v368_v30  ;;  %v408_v52 = vadd.f32 %v8805_v41, %v369_v61  ;;  %v1467_v34 = vrot.slane %v1465_v18, 5  ;;  %v6875_v47 = vunpack.c.h.bf16 %v6973_v40 }
  0xdf   : > { %v1462_v4 = vor.u32 %v1461_v38, %v1458_v25  ;;  %v1471_v23 = vrot.slane %v1469_v29, 4  ;;  %v1477_v6 = vrot.slane %v1475_v43, 5  ;;  %v370_v51 = vmul.f32 %v8879_v37, %v6874_v46  ;;  %v1079_v38 = vld [vmem:[#allocation2 + $0xa8] sm:$0xf] }
  0xe0   : > { %vm439_vm0 = vcmp.gt.f32.partialorder %v407_v50, 0.0  ;;  %vm440_vm1 = vcmp.gt.f32.partialorder %v408_v52, 0.0  ;;  %v471_v48 = vmul.f32 0.01, %v407_v50  ;;  %v472_v26 = vmul.f32 0.01, %v408_v52 }
  0xe1   : > { %v1463_v27 = vrot.slane %v1462_v4, 4  ;;  %v1472_v12 = vor.u32 %v1471_v23, %v1467_v34  ;;  %v371_v57 = vmul.f32 %v8879_v37, %v6875_v47  ;;  %v6531_v58 = vrot.slane %v8886_v42, 9 }
  0xe2   : > { %v503_v32 = vsel %vm439_vm0, %v407_v50, %v471_v48  ;;  %v3879_v11 = vrot.slane %v8648_v28, 5  ;;  %v8894_v19 = vld [vmem:[#allocation2 + $0x9c] sm:$0xf]  ;;  %v504_v44 = vsel %vm440_vm1, %v408_v52, %v472_v26  ;;  %v409_v7 = vadd.f32 %v8805_v41, %v370_v51 }
  0xe3   : > { %v1468_v13 = vsel %vm8244_vm2, %v1463_v27, %v1467_v34  ;;  %v1473_v60 = vrot.slane %v1472_v12, 4  ;;  %v6778_v20 = vpack.c.bf16 %v503_v32, %v503_v32  ;;  %v1480_v21 = vshrl.u32 %v8894_v19, 16  ;;  %v1083_v34 = vld [vmem:[#allocation2 + $0xb0] sm:$0x1] }
  0xe4   : > { %v8896_v62 = vld [vmem:[#allocation2 + $0xa0] sm:$0xf]  ;;  %v1483_v63 = vshll.u32 %v8894_v19, 16  ;;  %v6779_v5 = vpack.c.bf16 %v504_v44, %v504_v44  ;;  %v410_v18 = vadd.f32 %v8805_v41, %v371_v57  ;;  %vm441_vm3 = vcmp.gt.f32.partialorder %v409_v7, 0.0 }
  0xe5   : > { %v1161_v54 = vld [vmem:[#allocation2 + $0xa4] sm:$0x1]  ;;  %v1478_v28 = vsel %vm8244_vm2, %v1473_v60, %v1477_v6  ;;  %v1489_v33 = vshll.u32 %v8896_v62, 16  ;;  %v1493_v17 = vshrl.u32 %v8896_v62, 16  ;;  %v1482_v30 = vrot.slane %v1480_v21, 4 }
  0xe6   : > { %v1499_v8 = vshll.u32 %v1161_v54, 16  ;;  %v6353_v15 = vcombine.low %v1468_v13, %v1478_v28  ;;  %v1485_v45 = vrot.slane %v1483_v63, 5  ;;  %v884_v39 = vshrl.u32 %v6778_v20, 16  ;;  %v3778_v57 = vld [vmem:[#allocation2 + $0x60] sm:$0xe] }
  0xe7   : > { %v1491_v55 = vrot.slane %v1489_v33, 5  ;;  %v1495_v36 = vrot.slane %v1493_v17, 4  ;;  %v887_v56 = vshll.u32 %v6778_v20, 16  ;;  %v892_v1 = vshrl.u32 %v6779_v5, 16  ;;  %v3779_v54 = vld [vmem:[#allocation2 + $0x6c] sm:$0xe] }
  0xe8   : > { %v1501_v40 = vrot.slane %v1499_v8, 5  ;;  %7246 = vmatprep.mubr.bf16.mxu1 %v6353_v15  ;;  %v1486_v49 = vor.u32 %v1485_v45, %v1482_v30  ;;  %v886_v24 = vrot.slane %v884_v39, 7  ;;  %v895_v61 = vshll.u32 %v6779_v5, 16  ;;  %v3042_v39 = vld [vmem:[#allocation2 + $0x70] sm:$0xf] }
  0xe9   : > { %v1496_v25 = vor.u32 %v1495_v36, %v1491_v55  ;;  %v473_v29 = vmul.f32 0.01, %v409_v7  ;;  %v894_v46 = vrot.slane %v892_v1, 7  ;;  %vm442_vm5 = vcmp.gt.f32.partialorder %v410_v18, 0.0  ;;  %v1086_v36 = vld [vmem:[#allocation2 + $0xb4] sm:$0xf] }
  0xea   : > { %v1487_v43 = vrot.slane %v1486_v49, 4  ;;  %v889_v50 = vor.u32 %v887_v56, %v886_v24  ;;  %v890_v52 = vrot.slane %v886_v24, 4  ;;  %v474_v23 = vmul.f32 0.01, %v410_v18  ;;  %v1090_v1 = vld [vmem:[#allocation2 + $0xbc] sm:$0x1] }
  0xeb   : > { %v1497_v4 = vrot.slane %v1496_v25, 4  ;;  %v505_v47 = vsel %vm441_vm3, %v409_v7, %v473_v29  ;;  %v897_v6 = vor.u32 %v895_v61, %v894_v46  ;;  %v899_v48 = vrot.slane %v894_v46, 4  ;;  %v8049_v7 = vld [vmem:[#allocation2 + $0x5c] sm:$0x1]  ;;  %v3043_v46 = vld [vmem:[#allocation2 + $0x74] sm:$0x1] }
  0xec   : > { %v1492_v42 = vsel %vm8244_vm2, %v1487_v43, %v1491_v55  ;;  %v1080_v27 = vsel %vm8289_vm12, %v889_v50, %v1079_v38  ;;  %v506_v26 = vsel %vm442_vm5, %v410_v18, %v474_v23  ;;  %v6780_v51 = vpack.c.bf16 %v505_v47, %v505_v47 }
  0xed   : > { %v1502_v12 = vsel %vm8244_vm2, %v1497_v4, %v1501_v40  ;;  %1081 = vst [vmem:[#allocation2 + $0xa8] sm:$0xf] %v1080_v27  ;;  %v3880_v32 = vsel %vm8671_vm4, %v6531_v58, %v3879_v11  ;;  %v898_v60 = vsel %vm8296_vm15, %v890_v52, %v897_v6  ;;  %v1084_v44 = vsel %vm8281_vm10, %v899_v48, %v1083_v34 }
  0xee   : > { %v6354_v13 = vcombine.low %v1492_v42, %v1502_v12  ;;  %v6781_v20 = vpack.c.bf16 %v506_v26, %v506_v26  ;;  %1082 = vst [vmem:[#allocation2 + $0xac] sm:$0xf] %v898_v60  ;;  %1085 = vst [vmem:[#allocation2 + $0xb0] sm:$0x1] %v1084_v44  ;;  %v901_v21 = vshrl.u32 %v6780_v51, 16  ;;  %v904_v63 = vshll.u32 %v6780_v51, 16 }
  0xef   : > { %v3881_v5 = vrot.slane %v3879_v11, 4  ;;  %v3882_v28 = vrot.slane %v8049_v7, 5  ;;  %v6532_v17 = vrot.slane %v3778_v57, 9  ;;  %v3886_v8 = vrot.slane %v8712_v9, 5  ;;  %v3780_v44 = vld [vmem:[#allocation2 + $0x78] sm:$0xe] }
  0xf0   : > { %7247 = vmatmul.mubr.bf16.gmra.mrb[24].mxu1 %v6354_v13  ;;  %v909_v33 = vshrl.u32 %v6781_v20, 16  ;;  %v912_v58 = vshll.u32 %v6781_v20, 16  ;;  %v903_v15 = vrot.slane %v901_v21, 7  ;;  %v3889_v45 = vrot.slane %v8714_v22, 5  ;;  %v8946_v21 = vld [vmem:[#allocation2 + $0x80] sm:$0x1] }
  0xf1   : > { %v3883_v30 = vsel %vm8671_vm4, %v3881_v5, %v3882_v28  ;;  %v3887_v11 = vsel %vm8671_vm4, %v6532_v17, %v3886_v8  ;;  %v3888_v56 = vrot.slane %v3886_v8, 4  ;;  %v6533_v61 = vrot.slane %v3779_v54, 9  ;;  %v8944_v54 = vld [vmem:[#allocation2 + $0x7c] sm:$0xf] }
  0xf2   : > { %v911_v55 = vrot.slane %v909_v33, 7  ;;  %v6563_v40 = vcombine.low %v3880_v32, %v3883_v30  ;;  %v906_v49 = vor.u32 %v904_v63, %v903_v15  ;;  %v907_v24 = vrot.slane %v903_v15, 4 }
  0xf3   : > { %v3890_v22 = vsel %vm8671_vm4, %v3888_v56, %v3889_v45  ;;  %v3893_v18 = vrot.slane %v3042_v39, 5  ;;  %v3896_v32 = vrot.slane %v3043_v46, 5  ;;  %v6534_v33 = vrot.slane %v3780_v44, 9  ;;  %v3048_v45 = vld [vmem:[#allocation2 + $0x88] sm:$0xf] }
  0xf4   : > { %v8924_v25 = vld [vmem:[#allocation2 + $0xa8] sm:$0xf]  ;;  %v914_v9 = vor.u32 %v912_v58, %v911_v55  ;;  %v916_v38 = vrot.slane %v911_v55, 4  ;;  %7474 = vmatprep.mubr.bf16.mxu0 %v6563_v40  ;;  %v1087_v50 = vsel %vm8289_vm12, %v906_v49, %v1086_v36  ;;  %v6564_v52 = vcombine.low %v3887_v11, %v3890_v22  ;;  %v3049_v39 = vld [vmem:[#allocation2 + $0x8c] sm:$0x1] }
  0xf5   : > { %v1504_v29 = vshrl.u32 %v8924_v25, 16  ;;  %v1507_v43 = vshll.u32 %v8924_v25, 16  ;;  %v8932_v4 = vld [vmem:[#allocation2 + $0xac] sm:$0xf]  ;;  %v1162_v34 = vld [vmem:[#allocation2 + $0xb0] sm:$0x1]  ;;  %v3894_v51 = vsel %vm8671_vm4, %v6533_v61, %v3893_v18 }
  0xf6   : > { %v915_v23 = vsel %vm8296_vm15, %v907_v24, %v914_v9  ;;  %1088 = vst [vmem:[#allocation2 + $0xb4] sm:$0xf] %v1087_v50  ;;  %v1091_v47 = vsel %vm8281_vm10, %v916_v38, %v1090_v1  ;;  %v3895_v42 = vrot.slane %v3893_v18, 4  ;;  %v1513_v27 = vshll.u32 %v8932_v4, 16  ;;  %7475 = vmatmul.mubr.bf16.gmra.mrb[12].mxu0 %v6564_v52  ;;  %v3781_v55 = vld [vmem:[#allocation2 + $0x84] sm:$0xe] }
  0xf7   : > { %v1506_v6 = vrot.slane %v1504_v29, 4  ;;  %v1509_v48 = vrot.slane %v1507_v43, 5  ;;  %v1517_v12 = vshrl.u32 %v8932_v4, 16  ;;  %1089 = vst [vmem:[#allocation2 + $0xb8] sm:$0xf] %v915_v23  ;;  %v1523_v26 = vshll.u32 %v1162_v34, 16 }
  0xf8   : > { %1092 = vst [vmem:[#allocation2 + $0xbc] sm:$0x1] %v1091_v47  ;;  %v1515_v13 = vrot.slane %v1513_v27, 5  ;;  %v3897_v20 = vsel %vm8671_vm4, %v3895_v42, %v3896_v32  ;;  %v3900_v15 = vrot.slane %v8944_v54, 5  ;;  %v3903_v30 = vrot.slane %v8946_v21, 5 }
  0xf9   : > { %v1510_v57 = vor.u32 %v1509_v48, %v1506_v6  ;;  %v1519_v60 = vrot.slane %v1517_v12, 4  ;;  %v1525_v7 = vrot.slane %v1523_v26, 5  ;;  %v6565_v28 = vcombine.low %v3894_v51, %v3897_v20  ;;  %v3782_v9 = vld [vmem:[#allocation2 + $0x90] sm:$0xe]  ;;  %v3051_v43 = vld [vmem:[#allocation2 + $0x94] sm:$0xf] }
  0xfa   : > { %v3901_v29 = vsel %vm8671_vm4, %v6534_v33, %v3900_v15  ;;  %v3052_v50 = vld [vmem:[#allocation2 + $0x98] sm:$0x1]  ;;  %v3902_v23 = vrot.slane %v3900_v15, 4  ;;  %v6535_v42 = vrot.slane %v3781_v55, 9  ;;  %v3907_v6 = vrot.slane %v3048_v45, 5 }
  0xfb   : > { %v1511_v63 = vrot.slane %v1510_v57, 4  ;;  %v1520_v5 = vor.u32 %v1519_v60, %v1515_v13  ;;  %7478 = vmatprep.mubr.bf16.mxu0 %v6565_v28  ;;  %v3910_v48 = vrot.slane %v3049_v39, 5  ;;  %v6536_v26 = vrot.slane %v3782_v9, 9  ;;  %v3783_v32 = vld [vmem:[#allocation2 + $0x9c] sm:$0xe] }
  0xfc   : > { %v3904_v12 = vsel %vm8671_vm4, %v3902_v23, %v3903_v30  ;;  %v3914_v51 = vrot.slane %v3051_v43, 5  ;;  %v3908_v60 = vsel %vm8671_vm4, %v6535_v42, %v3907_v6  ;;  %v3909_v44 = vrot.slane %v3907_v6, 4  ;;  %v3054_v20 = vld [vmem:[#allocation2 + $0xa0] sm:$0xf]  ;;  %v3057_v55 = vld [vmem:[#allocation2 + $0xac] sm:$0xf] }
  0xfd   : > { %v1516_v58 = vsel %vm8244_vm2, %v1511_v63, %v1515_v13  ;;  %v1521_v17 = vrot.slane %v1520_v5, 4  ;;  %v8950_v8 = vld [vmem:[#allocation2 + $0xb4] sm:$0xf]  ;;  %v6566_v13 = vcombine.low %v3901_v29, %v3904_v12  ;;  %v8050_v5 = vld [vmem:[#allocation2] sm:$0xf]  ;;  %v6537_v39 = vrot.slane %v3783_v32, 9 }
  0xfe   : > { %v8954_v36 = vld [vmem:[#allocation2 + $0xb8] sm:$0xf]  ;;  %v1528_v11 = vshrl.u32 %v8950_v8, 16  ;;  %v1531_v56 = vshll.u32 %v8950_v8, 16  ;;  %v3916_v33 = vrot.slane %v3914_v51, 4  ;;  %v3911_v30 = vsel %vm8671_vm4, %v3909_v44, %v3910_v48 }
  0xff   : > { %v1163_v40 = vld [vmem:[#allocation2 + $0xbc] sm:$0x1]  ;;  %v1526_v49 = vsel %vm8244_vm2, %v1521_v17, %v1525_v7  ;;  %v1537_v24 = vshll.u32 %v8954_v36, 16  ;;  %v1541_v1 = vshrl.u32 %v8954_v36, 16  ;;  %v8968_v7 = vld [vmem:[#allocation2 + $0x4] sm:$0xf]  ;;  %7479 = vmatmul.mubr.bf16.gmra.mrb[16].mxu0 %v6566_v13  ;;  %v3915_v45 = vsel %vm8671_vm4, %v6536_v26, %v3914_v51 }
 0x100   : > { %v1547_v61 = vshll.u32 %v1163_v40, 16  ;;  %v6355_v38 = vcombine.low %v1516_v58, %v1526_v49  ;;  %v1530_v22 = vrot.slane %v1528_v11, 4  ;;  %v1533_v18 = vrot.slane %v1531_v56, 5  ;;  %v3055_v17 = vld [vmem:[#allocation2 + $0xa4] sm:$0x1] }
 0x101   : > { %v1539_v52 = vrot.slane %v1537_v24, 5  ;;  %v1543_v46 = vrot.slane %v1541_v1, 4  ;;  %v6365_v28 = vcombine.low %v8050_v5, %v8968_v7  ;;  %v3917_v58 = vrot.slane %v3052_v50, 5  ;;  %v3784_v24 = vld [vmem:[#allocation2 + $0xa8] sm:$0xe] }
 0x102   : > { %v1549_v34 = vrot.slane %v1547_v61, 5  ;;  %7250 = vmatprep.mubr.bf16.mxu1 %v6355_v38  ;;  %v1534_v47 = vor.u32 %v1533_v18, %v1530_v22  ;;  %v6567_v11 = vcombine.low %v3908_v60, %v3911_v30  ;;  %v3921_v49 = vrot.slane %v3054_v20, 5  ;;  %v3060_v1 = vld [vmem:[#allocation2 + $0xb8] sm:$0xf]  ;;  %v3058_v38 = vld [vmem:[#allocation2 + $0xb0] sm:$0x1] }
 0x103   : > { %v1544_v27 = vor.u32 %v1543_v46, %v1539_v52  ;;  %v3918_v56 = vsel %vm8671_vm4, %v3916_v33, %v3917_v58  ;;  %v3924_v9 = vrot.slane %v3055_v17, 5  ;;  %v3785_v22 = vld [vmem:[#allocation2 + $0xb4] sm:$0xe]  ;;  %v3928_v43 = vrot.slane %v3057_v55, 5  ;;  %v3061_v50 = vld [vmem:[#allocation2 + $0xbc] sm:$0x1] }
 0x104   : > { %v1535_v57 = vrot.slane %v1534_v47, 4  ;;  %7482 = vmatprep.mubr.bf16.mxu0 %v6567_v11  ;;  %v3922_v18 = vsel %vm8671_vm4, %v6537_v39, %v3921_v49  ;;  %v3923_v29 = vrot.slane %v3921_v49, 4  ;;  %v6568_v46 = vcombine.low %v3915_v45, %v3918_v56  ;;  %v8986_v13 = vld [vmem:[#allocation2 + $0x10] sm:$0xf]  ;;  %v8054_v20 = vld [vmem:[#allocation2 + $0x18] sm:$0xf] }
 0x105   : > { %v1545_v63 = vrot.slane %v1544_v27, 4  ;;  %v3935_v23 = vrot.slane %v3060_v1, 5  ;;  %v3930_v42 = vrot.slane %v3928_v43, 4  ;;  %v3931_v6 = vrot.slane %v3058_v38, 5  ;;  %v7961_v17 = vld [vmem:[%s10077_s3 + $0x88] sm:$0xff]   ;;  %v7965_v49 = vld [vmem:[%s10077_s3 + $0x90] sm:$0xff]  }
 0x106   : > { %v1540_v15 = vsel %vm8244_vm2, %v1535_v57, %v1539_v52  ;;  %v6974_v52 = vld [vmem:[%s8218_s27 + $0x78] sm:$0xff]   ;;  %v3925_v47 = vsel %vm8671_vm4, %v3923_v29, %v3924_v9  ;;  %v6539_v48 = vrot.slane %v3785_v22, 9  ;;  %v3938_v26 = vrot.slane %v3061_v50, 5  ;;  %v8052_v57 = vld [vmem:[#allocation2 + $0xc] sm:$0xf]  ;;  %s266_s27 = scalar_lea.vmem %s10079_s5, %s8200_s13 }
 0x107   : > { %v1550_v40 = vsel %vm8244_vm2, %v1545_v63, %v1549_v34  ;;  %v6538_v34 = vrot.slane %v3784_v24, 9  ;;  %v6569_v27 = vcombine.low %v3922_v18, %v3925_v47  ;;  %v3937_v12 = vrot.slane %v3935_v23, 4  ;;  %7483 = vmatmul.mubr.bf16.gmra.mrb[20].mxu0 %v6568_v46  ;;  %v8990_v63 = vld [vmem:[#allocation2 + $0x1c] sm:$0xf]  ;;  %v9013_v9 = vld [vmem:[#allocation2 + $0x28] sm:$0xf] }
 0x108   : > { %v6356_v61 = vcombine.low %v1540_v15, %v1550_v40  ;;  %v6878_v51 = vunpack.c.l.bf16 %v6974_v52  ;;  %v6879_v32 = vunpack.c.h.bf16 %v6974_v52  ;;  %v6366_v60 = vcombine.low %v8052_v57, %v8986_v13  ;;  %v8059_v18 = vld [vmem:[#allocation2 + $0x30] sm:$0xf]  ;;  %v9016_v29 = vld [vmem:[#allocation2 + $0x34] sm:$0xf]  ;;  %v7969_v46 = vld [vmem:[%s10077_s3 + $0x98] sm:$0xff]  }
 0x109   : > { %v6367_v5 = vcombine.low %v8054_v20, %v8990_v63  ;;  %7486 = vmatprep.mubr.bf16.mxu0 %v6569_v27  ;;  %v3932_v33 = vsel %vm8671_vm4, %v3930_v42, %v3931_v6  ;;  %v3936_v15 = vsel %vm8671_vm4, %v6539_v48, %v3935_v23  ;;  %v3939_v30 = vsel %vm8671_vm4, %v3937_v12, %v3938_v26  ;;  %v1093_v6 = vld [vmem:[#allocation2 + $0xc0] sm:$0xf]  ;;  %v1097_v12 = vld [vmem:[#allocation2 + $0xc8] sm:$0x1] }
 0x10a   : > { %7251 = vmatmul.mubr.bf16.gmra.mrb[28].mxu1 %v6356_v61  ;;  %v372_v44 = vmul.f32 %v8879_v37, %v6878_v51  ;;  %v373_v58 = vmul.f32 %v8879_v37, %v6879_v32  ;;  %v8056_v37 = vld [vmem:[%s10077_s3 + $0x80] sm:$0xff]   ;;  %v6571_v11 = vcombine.low %v3936_v15, %v3939_v30  ;;  %v3291_v16 = vshll.u32 %v8944_v54, 16 }
 0x10b   : > { %7270 = vmatprep.mubr.bf16.mxu1 %v6365_v28  ;;  %v3929_v28 = vsel %vm8671_vm4, %v6538_v34, %v3928_v43  ;;  %v8057_v61 = vld [vmem:[#allocation2 + $0x24] sm:$0xf]  ;;  %v6369_v43 = vcombine.low %v8059_v18, %v9016_v29  ;;  %v3295_v15 = vshrl.u32 %v8944_v54, 16  ;;  %v7991_v54 = vld [vmem:[%s10077_s3 + $0xb8] sm:$0xff]  }
 0x10c   : > { %v411_v45 = vadd.f32 %v8805_v41, %v372_v44  ;;  %v412_v39 = vadd.f32 %v8805_v41, %v373_v58  ;;  %v6570_v55 = vcombine.low %v3929_v28, %v3932_v33  ;;  %v6368_v38 = vcombine.low %v8057_v61, %v9013_v9  ;;  %v7973_v32 = vld [vmem:[%s10077_s3 + $0xa0] sm:$0xff]   ;;  %v8063_v33 = vld [vmem:[#allocation2 + $0x48] sm:$0xf]  ;;  %v9034_v58 = vld [vmem:[#allocation2 + $0x4c] sm:$0xf] }
 0x10d   : > { %v9027_v44 = vld [vmem:[#allocation2 + $0x40] sm:$0xf]  ;;  %v9054_v61 = vrot.slane %v3291_v16, 5  ;;  %v2227_v16 = vrot.slane %v9016_v29, 5 }
 0x10e   : > { %vm443_vm6 = vcmp.gt.f32.partialorder %v411_v45, 0.0  ;;  %v475_v40 = vmul.f32 0.01, %v411_v45  ;;  %vm444_vm7 = vcmp.gt.f32.partialorder %v412_v39, 0.0  ;;  %v476_v56 = vmul.f32 0.01, %v412_v39 }
 0x10f   : > { %7487 = vmatmul.mubr.bf16.gmra.mrb[24].mxu0 %v6570_v55  ;;  %10099 = vst [vmem:[#allocation3_spill] sm:$0xff] %v9054_v61 }
 0x110   : > { %v507_v24 = vsel %vm443_vm6, %v411_v45, %v475_v40  ;;  %v508_v41 = vsel %vm444_vm7, %v412_v39, %v476_v56  ;;  %7490 = vmatprep.mubr.bf16.mxu0 %v6571_v11  ;;  %v8065_v45 = vld [vmem:[#allocation2 + $0x54] sm:$0xf]  ;;  %v9045_v39 = vld [vmem:[#allocation2 + $0x58] sm:$0xf] }
 0x111   : > { %v6782_v1 = vpack.c.bf16 %v507_v24, %v507_v24  ;;  %v6783_v22 = vpack.c.bf16 %v508_v41, %v508_v41  ;;  %v6372_v55 = vcombine.low %v8065_v45, %v9045_v39  ;;  %v8067_v24 = vld [vmem:[#allocation2 + $0x60] sm:$0xf]  ;;  %v9048_v41 = vld [vmem:[#allocation2 + $0x64] sm:$0xf] }
 0x112   : > { %7271 = vmatmul.mubr.bf16.vlgmr.msra.gmra.mrb[0].mxu1 %v6366_v60  ;;  %v8061_v60 = vld [vmem:[#allocation2 + $0x3c] sm:$0xf] }
 0x113   : > { %7303 = vmatpush3.bf16.msra.mxu1 %v8056_v37  ;;  %7274 = vmatprep.mubr.bf16.mxu1 %v6367_v5  ;;  %v918_v50 = vshrl.u32 %v6782_v1, 16  ;;  %v921_v52 = vshll.u32 %v6782_v1, 16  ;;  %v926_v34 = vshrl.u32 %v6783_v22, 16  ;;  %v929_v23 = vshll.u32 %v6783_v22, 16 }
 0x114   : > { %7304 = vmatprep.subr.bf16.mxu1 %v7961_v17  ;;  %v6370_v20 = vcombine.low %v8061_v60, %v9027_v44  ;;  %v6373_v1 = vcombine.low %v8067_v24, %v9048_v41  ;;  %v2148_v60 = vld [vmem:[#allocation2 + $0x18] sm:$0xe] }
 0x115   : > { %v920_v47 = vrot.slane %v918_v50, 7  ;;  %v928_v42 = vrot.slane %v926_v34, 7  ;;  %v6391_v45 = vrot.slane %v2148_v60, 9  ;;  %v9131_v60 = vld [vmem:[#allocation2 + $0x48] sm:$0xe] }
 0x117   : > { %7305 = vmatpush3.bf16.msra.mxu1 %v7961_v17  ;;  %v923_v48 = vor.u32 %v921_v52, %v920_v47  ;;  %v924_v27 = vrot.slane %v920_v47, 4  ;;  %v931_v26 = vor.u32 %v929_v23, %v928_v42  ;;  %v933_v51 = vrot.slane %v928_v42, 4  ;;  %v7974_v52 = vld [vmem:[#allocation2 + $0x18] sm:$0xff]   ;;  %v9064_v23 = vld [vmem:[%s10077_s3 + $0xc0] sm:$0xff]   ;;  %v8069_v47 = vld [vmem:[#allocation2 + $0x8] sm:$0x1] }
 0x118   : > { %7306 = vmatprep.subr.bf16.mxu1 %v7965_v49  ;;  %v6371_v17 = vcombine.low %v8063_v33, %v9034_v58  ;;  %v2202_v42 = vrot.slane %v8069_v47, 5  ;;  %v2220_v33 = vrot.slane %v9013_v9, 5  ;;  %v6377_v47 = vcombine.low %v8860_v2, %v8870_v59 }
 0x119   : > { %v1094_v57 = vsel %vm8289_vm12, %v923_v48, %v1093_v6  ;;  %v932_v5 = vsel %vm8296_vm15, %v924_v27, %v931_v26  ;;  %v1098_v28 = vsel %vm8281_vm10, %v933_v51, %v1097_v12  ;;  %v2147_v48 = vld [vmem:[#allocation2 + $0xc] sm:$0xe]  ;;  %v9068_v12 = vld [vmem:[#allocation2 + $0x70] sm:$0xf] }
 0x11a   : > { %7275 = vmatmul.mubr.bf16.gmra.mrb[4].mxu1 %v6368_v38  ;;  %1095 = vst [vmem:[#allocation2 + $0xc0] sm:$0xf] %v1094_v57  ;;  %1096 = vst [vmem:[#allocation2 + $0xc4] sm:$0xf] %v932_v5  ;;  %v3297_v38 = vrot.slane %v3295_v15, 4  ;;  %v2206_v57 = vrot.slane %v8986_v13, 5 }
 0x11b   : > { %7278 = vmatprep.mubr.bf16.mxu1 %v6369_v43  ;;  %7307 = vmatpush3.bf16.msra.mxu1 %v7965_v49  ;;  %1099 = vst [vmem:[#allocation2 + $0xc8] sm:$0x1] %v1098_v28  ;;  %v2199_v43 = vrot.slane %v8968_v7, 5  ;;  %v3301_v7 = vshll.u32 %v8946_v21, 16  ;;  %v8070_v27 = vld [vmem:[#allocation2 + $0x6c] sm:$0xf] }
 0x11c   : > { %7308 = vmatprep.subr.bf16.mxu1 %v7969_v46  ;;  %v3298_v6 = vor.u32 %v3297_v38, %v9054_v61  ;;  %v6374_v26 = vcombine.low %v8070_v27, %v9068_v12  ;;  %v9072_v5 = vld [vmem:[#allocation2 + $0x7c] sm:$0xf]  ;;  %v2213_v21 = vrot.slane %v8990_v63, 5 }
 0x11d   : > { %v9081_v15 = vrot.slane %v3301_v7, 5  ;;  %v4657_v27 = vld [vmem:[#allocation2 + $0x1c] sm:$0xf] }
 0x11e   : > { %v9079_v13 = vrot.slane %v3298_v6, 4  ;;  %v6379_v6 = vcombine.low %v8924_v25, %v8932_v4  ;;  %v9116_v59 = vsel %vm8671_vm4, %v6391_v45, %v2213_v21  ;;  %v4718_v45 = vshrl.u32 %v4657_v27, 16  ;;  %v8001_v25 = vld [vmem:[%s10077_s3 + $0x1e8] sm:$0xff]  }
 0x11f   : > { %7309 = vmatpush3.bf16.msra.mxu1 %v7969_v46  ;;  %v2146_v46 = vld [vmem:[#allocation2] sm:$0xe]  ;;  %10101 = vst [vmem:[#allocation5_spill] sm:$0xff] %v9081_v15  ;;  %v8089_v15 = vld [vmem:[#allocation2 + $0xa4] sm:$0x1] }
 0x120   : > { %7310 = vmatprep.subr.bf16.mxu1 %v7973_v32  ;;  %v6389_v51 = vrot.slane %v2146_v46, 9  ;;  %10100 = vst [vmem:[#allocation4_spill] sm:$0xff] %v9079_v13 }
 0x121   : > { %v3786_v30 = vld [vmem:[#allocation2 + $0xc0] sm:$0xe]  ;;  %v3063_v40 = vld [vmem:[#allocation2 + $0xc4] sm:$0xf] }
 0x122   : > { %7279 = vmatmul.mubr.bf16.gmra.mrb[8].mxu1 %v6370_v20  ;;  %v3064_v37 = vld [vmem:[#allocation2 + $0xc8] sm:$0x1]  ;;  %v6540_v11 = vrot.slane %v3786_v30, 9  ;;  %v3942_v56 = vrot.slane %v3063_v40, 5  ;;  %v8072_v20 = vld [vmem:[#allocation2 + $0x78] sm:$0xf]  ;;  %v9085_v63 = vsel %vm8671_vm4, %v6389_v51, %v2199_v43 }
 0x123   : > { %7282 = vmatprep.mubr.bf16.mxu1 %v6371_v17  ;;  %7311 = vmatpush3.bf16.msra.mxu1 %v7973_v32  ;;  %v3945_v49 = vrot.slane %v3064_v37, 5  ;;  %v2201_v32 = vrot.slane %v2199_v43, 4  ;;  %v6375_v28 = vcombine.low %v8072_v20, %v9072_v5  ;;  %v8074_v17 = vld [vmem:[#allocation2 + $0x14] sm:$0x1]  ;;  %v6390_v30 = vrot.slane %v2147_v48, 9  ;;  %v7976_v40 = vld [vmem:[#allocation2 + $0x24] sm:$0xff]  }
 0x124   : > { %7312 = vmatprep.subr.bf16.mxu1 %v7979_v14  ;;  %v3943_v22 = vsel %vm8671_vm4, %v6540_v11, %v3942_v56  ;;  %v3944_v18 = vrot.slane %v3942_v56, 4  ;;  %v2208_v37 = vrot.slane %v2206_v57, 4  ;;  %v8075_v11 = vld [vmem:[#allocation2 + $0x20] sm:$0x1]  ;;  %v7980_v56 = vld [vmem:[#allocation2 + $0x30] sm:$0xff]  }
 0x125   : > { %v9089_v9 = vsel %vm8671_vm4, %v2201_v32, %v2202_v42  ;;  %v2216_v29 = vrot.slane %v8075_v11, 5  ;;  %v6378_v42 = vcombine.low %v8894_v19, %v8896_v62  ;;  %v9108_v48 = vsel %vm8671_vm4, %v6390_v30, %v2206_v57  ;;  %v8078_v11 = vld [vmem:[#allocation2 + $0x44] sm:$0x1] }
 0x126   : > { %v3946_v50 = vsel %vm8671_vm4, %v3944_v18, %v3945_v49  ;;  %v2215_v49 = vrot.slane %v2213_v21, 4  ;;  %v7981_v18 = vld [vmem:[%s10077_s3 + $0x1c8] sm:$0xff]   ;;  %v6421_v7 = vcombine.low %v9085_v63, %v9089_v9  ;;  %v4714_v30 = vshll.u32 %v4657_v27, 16 }
 0x127   : > { %7313 = vmatpush3.bf16.msra.mxu1 %v7979_v14  ;;  %v6572_v34 = vcombine.low %v3943_v22, %v3946_v50  ;;  %v2209_v14 = vrot.slane %v8074_v17, 5  ;;  %v6376_v22 = vcombine.low %v8817_v53, %v8824_v0  ;;  %v2229_v50 = vrot.slane %v2227_v16, 4  ;;  %v4656_v0 = vld [vmem:[#allocation2 + $0x18] sm:$0xf]  ;;  %v7982_v17 = vld [vmem:[#allocation2 + $0x3c] sm:$0xff]  }
 0x128   : > { %7314 = vmatprep.subr.bf16.mxu1 %v7985_v10  ;;  %v6380_v53 = vcombine.low %v8950_v8, %v8954_v36  ;;  %v4705_v21 = vshrl.u32 %v4656_v0, 16  ;;  %v4720_v27 = vrot.slane %v4718_v45, 4  ;;  %v8009_v8 = vld [vmem:[%s10077_s3 + $0x1f8] sm:$0xff]  }
 0x129   : > { %7491 = vmatmul.mubr.bf16.gmra.mrb[28].mxu0 %v6572_v34  ;;  %v2151_v34 = vld [vmem:[#allocation2 + $0x3c] sm:$0xe]  ;;  %v9112_v2 = vsel %vm8671_vm4, %v2208_v37, %v2209_v14 }
 0x12a   : > { %7283 = vmatmul.mubr.bf16.gmra.mrb[12].mxu1 %v6372_v55  ;;  %7510 = vmatprep.mubr.bf16.mxu0 %v7974_v52  ;;  %v2150_v55 = vld [vmem:[#allocation2 + $0x30] sm:$0xe]  ;;  %v8077_v52 = vld [vmem:[#allocation2 + $0x38] sm:$0x1]  ;;  %v6394_v57 = vrot.slane %v2151_v34, 9 }
 0x12b   : > { %7286 = vmatprep.mubr.bf16.mxu1 %v6373_v1  ;;  %7315 = vmatpush3.bf16.msra.mxu1 %v7985_v10  ;;  %v2149_v10 = vld [vmem:[#allocation2 + $0x24] sm:$0xe]  ;;  %v2222_v1 = vrot.slane %v2220_v33, 4  ;;  %v6393_v43 = vrot.slane %v2150_v55, 9  ;;  %v2230_v46 = vrot.slane %v8077_v52, 5  ;;  %v7986_v55 = vld [vmem:[#allocation2 + $0x48] sm:$0xff]  }
 0x12c   : > { %7316 = vmatprep.subr.bf16.mxu1 %v7991_v54  ;;  %v6392_v24 = vrot.slane %v2149_v10, 9  ;;  %v2234_v10 = vrot.slane %v9027_v44, 5  ;;  %v2154_v52 = vld [vmem:[#allocation2 + $0x60] sm:$0xe] }
 0x12d   : > { %v9138_v20 = vsel %vm8671_vm4, %v6393_v43, %v2227_v16  ;;  %v7993_v16 = vld [vmem:[%s10077_s3 + $0x1d8] sm:$0xff]   ;;  %v4660_v43 = vld [vmem:[#allocation2 + $0x28] sm:$0xf]  ;;  %v6397_v37 = vrot.slane %v2154_v52, 9 }
 0x12e   : > { %v9125_v51 = vsel %vm8671_vm4, %v6392_v24, %v2220_v33  ;;  %v4708_v33 = vshll.u32 %v4656_v0, 16  ;;  %v9159_v24 = vsel %vm8671_vm4, %v6394_v57, %v2234_v10  ;;  %v9164_v0 = vrot.slane %v4714_v30, 5  ;;  %v8081_v30 = vld [vmem:[#allocation2 + $0x68] sm:$0x1] }
 0x12f   : > { %7317 = vmatpush3.bf16.msra.mxu1 %v7991_v54  ;;  %v8076_v54 = vld [vmem:[#allocation2 + $0x2c] sm:$0x1]  ;;  %v4742_v44 = vshrl.u32 %v4660_v43, 16 }
 0x130   : > { %7350 = vmatprep.subr.bf16.mxu1 %v9064_v23  ;;  %v2223_v38 = vrot.slane %v8076_v54, 5  ;;  %v8079_v54 = vld [vmem:[#allocation2 + $0x50] sm:$0x1]  ;;  %v4710_v34 = vrot.slane %v4708_v33, 5 }
 0x131   : > { %7511 = vmatmul.mubr.bf16.vlgmr.msra.gmra.mrb[0].mxu0 %v7976_v40  ;;  %v2258_v40 = vrot.slane %v8081_v30, 5 }
 0x132   : > { %7287 = vmatmul.mubr.bf16.gmra.mrb[16].mxu1 %v6374_v26  ;;  %7543 = vmatpush3.bf16.msra.mxu0 %v8846_v3  ;;  %v9121_v26 = vsel %vm8671_vm4, %v2215_v49, %v2216_v29  ;;  %v9129_v32 = vsel %vm8671_vm4, %v2222_v1, %v2223_v38  ;;  %v7987_v3 = vld [vmem:[%s10077_s3 + $0x1d0] sm:$0xff]   ;;  %v2237_v29 = vrot.slane %v8078_v11, 5  ;;  %v4659_v49 = vld [vmem:[#allocation2 + $0x24] sm:$0xf]  ;;  %v2241_v1 = vrot.slane %v9034_v58, 5 }
 0x133   : > { %7290 = vmatprep.mubr.bf16.mxu1 %v6375_v28  ;;  %7514 = vmatprep.mubr.bf16.mxu0 %v7980_v56  ;;  %v9142_v28 = vsel %vm8671_vm4, %v2229_v50, %v2230_v46  ;;  %v6395_v56 = vrot.slane %v9131_v60, 9  ;;  %v2244_v38 = vrot.slane %v8079_v54, 5  ;;  %v2248_v50 = vrot.slane %v9045_v39, 5  ;;  %v7997_v39 = vld [vmem:[%s10077_s3 + $0x1e0] sm:$0xff]  }
 0x134   : > { %7544 = vmatprep.subr.bf16.mxu0 %v7981_v18  ;;  %v4707_v46 = vrot.slane %v4705_v21, 4  ;;  %v4729_v57 = vshrl.u32 %v4659_v49, 16  ;;  %v4732_v60 = vshll.u32 %v4659_v49, 16  ;;  %v2236_v58 = vrot.slane %v2234_v10, 4  ;;  %v8080_v21 = vld [vmem:[#allocation2 + $0x5c] sm:$0x1] }
 0x135   : > { %v4738_v54 = vshll.u32 %v4660_v43, 16  ;;  %v2251_v33 = vrot.slane %v8080_v21, 5  ;;  %v2250_v45 = vrot.slane %v2248_v50, 4  ;;  %v2262_v10 = vrot.slane %v9068_v12, 5  ;;  %v7988_v21 = vld [vmem:[#allocation2 + $0x54] sm:$0xff]  }
 0x136   : > { %7545 = vmatpush3.bf16.msra.mxu0 %v7981_v18  ;;  %v2255_v18 = vrot.slane %v9048_v41, 5  ;;  %v2243_v41 = vrot.slane %v2241_v1, 4  ;;  %v4711_v43 = vor.u32 %v4710_v34, %v4707_v46  ;;  %v4734_v14 = vrot.slane %v4732_v60, 5  ;;  %v7992_v34 = vld [vmem:[#allocation2 + $0x60] sm:$0xff]  }
 0x137   : > { %7546 = vmatprep.subr.bf16.mxu0 %v7987_v3  ;;  %v9176_v52 = vsel %vm8671_vm4, %v2236_v58, %v2237_v29  ;;  %v9180_v30 = vsel %vm8671_vm4, %v6395_v56, %v2241_v1  ;;  %v9182_v12 = vrot.slane %v4738_v54, 5  ;;  %v4744_v46 = vrot.slane %v4742_v44, 4  ;;  %v4661_v56 = vld [vmem:[#allocation2 + $0x2c] sm:$0x1]  ;;  %v8082_v1 = vld [vmem:[#allocation2 + $0x74] sm:$0x1] }
 0x138   : > { %v2257_v49 = vrot.slane %v2255_v18, 4  ;;  %v9189_v19 = vsel %vm8671_vm4, %v2243_v41, %v2244_v38  ;;  %v2264_v44 = vrot.slane %v2262_v10, 4  ;;  %v2265_v38 = vrot.slane %v8082_v1, 5 }
 0x139   : > { %7515 = vmatmul.mubr.bf16.gmra.mrb[4].mxu0 %v7982_v17  ;;  %v2155_v17 = vld [vmem:[#allocation2 + $0x6c] sm:$0xe]  ;;  %v4745_v58 = vor.u32 %v4744_v46, %v9182_v12  ;;  %v2269_v54 = vrot.slane %v9072_v5, 5 }
 0x13a   : > { %7291 = vmatmul.mubr.bf16.gmra.mrb[20].mxu1 %v6376_v22  ;;  %v2153_v22 = vld [vmem:[#allocation2 + $0x54] sm:$0xe]  ;;  %7518 = vmatprep.mubr.bf16.mxu0 %v7986_v55  ;;  %v4731_v55 = vrot.slane %v4729_v57, 4  ;;  %v6398_v29 = vrot.slane %v2155_v17, 9  ;;  %v2156_v57 = vld [vmem:[#allocation2 + $0x78] sm:$0xe] }
 0x13b   : > { %7294 = vmatprep.mubr.bf16.mxu1 %v6377_v47  ;;  %v4658_v47 = vld [vmem:[#allocation2 + $0x20] sm:$0x1]  ;;  %v6396_v11 = vrot.slane %v2153_v22, 9  ;;  %7547 = vmatpush3.bf16.msra.mxu0 %v7987_v3  ;;  %v4721_v3 = vor.u32 %v4720_v27, %v9164_v0  ;;  %v6399_v17 = vrot.slane %v2156_v57, 9  ;;  %v2271_v1 = vrot.slane %v2269_v54, 4 }
 0x13c   : > { %7548 = vmatprep.subr.bf16.mxu0 %v7993_v16  ;;  %v4724_v22 = vshll.u32 %v4658_v47, 16  ;;  %v4735_v27 = vor.u32 %v4734_v14, %v4731_v55  ;;  %v9225_v5 = vsel %vm8671_vm4, %v6398_v29, %v2262_v10  ;;  %v8083_v10 = vld [vmem:[#allocation2 + $0x88] sm:$0xf]  ;;  %v4665_v57 = vld [vmem:[#allocation2 + $0x3c] sm:$0xf] }
 0x13d   : > { %v9193_v62 = vsel %vm8671_vm4, %v6396_v11, %v2248_v50  ;;  %v4712_v50 = vrot.slane %v4711_v43, 4  ;;  %v4748_v11 = vshll.u32 %v4661_v56, 16  ;;  %v7994_v43 = vld [vmem:[#allocation2 + $0x6c] sm:$0xff]   ;;  %v2276_v29 = vrot.slane %v8083_v10, 5 }
 0x13e   : > { %v4726_v47 = vrot.slane %v4724_v22, 5  ;;  %v4663_v22 = vld [vmem:[#allocation2 + $0x34] sm:$0xf]  ;;  %v9236_v46 = vrot.slane %v4735_v27, 4  ;;  %v4746_v56 = vrot.slane %v4745_v58, 4  ;;  %v9253_v63 = vsel %vm8671_vm4, %v6399_v17, %v2269_v54 }
 0x13f   : > { %7549 = vmatpush3.bf16.msra.mxu0 %v7993_v16  ;;  %v9208_v16 = vsel %vm8671_vm4, %v2257_v49, %v2258_v40  ;;  %v4717_v55 = vsel %vm8244_vm2, %v4712_v50, %v9164_v0  ;;  %v4666_v27 = vld [vmem:[#allocation2 + $0x40] sm:$0xf]  ;;  %v2278_v58 = vrot.slane %v2276_v29, 4  ;;  %v4664_v54 = vld [vmem:[#allocation2 + $0x38] sm:$0x1]  ;;  %v4780_v17 = vshll.u32 %v4665_v57, 16 }
 0x140   : > { %7550 = vmatprep.subr.bf16.mxu0 %v7997_v39  ;;  %v4671_v40 = vld [vmem:[#allocation2 + $0x54] sm:$0xf] }
 0x141   : > { %7519 = vmatmul.mubr.bf16.gmra.mrb[8].mxu0 %v7988_v21 }
 0x142   : > { %7295 = vmatmul.mubr.bf16.gmra.mrb[24].mxu1 %v6378_v42  ;;  %v9197_v42 = vsel %vm8671_vm4, %v6397_v37, %v2255_v18  ;;  %v4662_v37 = vld [vmem:[#allocation2 + $0x30] sm:$0xf]  ;;  %v4722_v18 = vrot.slane %v4721_v3, 4  ;;  %7522 = vmatprep.mubr.bf16.mxu0 %v7992_v34  ;;  %v7996_v3 = vld [vmem:[#allocation2 + $0x78] sm:$0xff]   ;;  %v2157_v34 = vld [vmem:[#allocation2 + $0x84] sm:$0xe] }
 0x143   : > { %7298 = vmatprep.mubr.bf16.mxu1 %v6379_v6  ;;  %v9204_v6 = vsel %vm8671_vm4, %v2250_v45, %v2251_v33  ;;  %7551 = vmatpush3.bf16.msra.mxu0 %v7997_v39  ;;  %v4753_v33 = vshrl.u32 %v4662_v37, 16  ;;  %v4756_v14 = vshll.u32 %v4662_v37, 16  ;;  %v8005_v45 = vld [vmem:[%s10077_s3 + $0x1f0] sm:$0xff]   ;;  %v9229_v39 = vsel %vm8671_vm4, %v2264_v44, %v2265_v38  ;;  %v8084_v38 = vld [vmem:[#allocation2 + $0x80] sm:$0x1] }
 0x144   : > { %7552 = vmatprep.subr.bf16.mxu0 %v8001_v25  ;;  %v4727_v21 = vsel %vm8244_vm2, %v4722_v18, %v4726_v47  ;;  %v4750_v44 = vrot.slane %v4748_v11, 5  ;;  %v2272_v37 = vrot.slane %v8084_v38, 5  ;;  %v4762_v18 = vshll.u32 %v4663_v22, 16  ;;  %v8085_v11 = vld [vmem:[#allocation2 + $0x8c] sm:$0x1] }
 0x145   : > { %v4755_v0 = vrot.slane %v4753_v33, 4  ;;  %v4758_v50 = vrot.slane %v4756_v14, 5  ;;  %v4766_v47 = vshrl.u32 %v4663_v22, 16  ;;  %v6400_v9 = vrot.slane %v2157_v34, 9  ;;  %v9259_v22 = vld [vmem:[#allocation2 + $0x4c] sm:$0xf] }
 0x146   : > { %v2279_v33 = vrot.slane %v8085_v11, 5  ;;  %v4777_v14 = vshrl.u32 %v4665_v57, 16  ;;  %v4790_v34 = vshrl.u32 %v4666_v27, 16  ;;  %v9267_v10 = vrot.slane %v4762_v18, 5  ;;  %v4667_v11 = vld [vmem:[#allocation2 + $0x44] sm:$0x1] }
 0x147   : > { %7553 = vmatpush3.bf16.msra.mxu0 %v8001_v25  ;;  %v4741_v25 = vsel %vm8244_vm2, %v9236_v46, %v9182_v12  ;;  %v4751_v12 = vsel %vm8244_vm2, %v4746_v56, %v4750_v44  ;;  %v4759_v46 = vor.u32 %v4758_v50, %v4755_v0  ;;  %v4768_v38 = vrot.slane %v4766_v47, 4  ;;  %v9277_v56 = vld [vmem:[%s10077_s3 + $0x200] sm:$0xff]  }
 0x148   : > { %7554 = vmatprep.subr.bf16.mxu0 %v8005_v45  ;;  %v4810_v57 = vshll.u32 %v9259_v22, 16  ;;  %v9283_v0 = vsel %vm8671_vm4, %v6400_v9, %v2276_v29  ;;  %v4772_v50 = vshll.u32 %v4664_v54, 16  ;;  %v4779_v18 = vrot.slane %v4777_v14, 4  ;;  %v8003_v29 = vld [vmem:[%s10077_s3 + $0xd0] sm:$0xff]  }
 0x149   : > { %7523 = vmatmul.mubr.bf16.gmra.mrb[12].mxu0 %v7994_v43  ;;  %v7999_v43 = vld [vmem:[%s10077_s3 + $0xc8] sm:$0xff]   ;;  %v10102_v47 = vcombine.low %v9108_v48, %v9112_v2  ;;  %v4792_v49 = vrot.slane %v4790_v34, 4  ;;  %v4796_v41 = vshll.u32 %v4667_v11, 16  ;;  %v10103_v44 = vcombine.low %v9116_v59, %v9121_v26  ;;  %v9306_v54 = vld [vmem:[#allocation2 + $0x90] sm:$0xe] }
 0x14a   : > { %7299 = vmatmul.mubr.bf16.gmra.mrb[28].mxu1 %v6380_v53  ;;  %v9249_v53 = vcombine.low %v4717_v55, %v4727_v21  ;;  %v9263_v55 = vsel %vm8671_vm4, %v2271_v1, %v2272_v37  ;;  %v4786_v21 = vshll.u32 %v4666_v27, 16  ;;  %7526 = vmatprep.mubr.bf16.mxu0 %v7996_v3  ;;  %v4814_v3 = vshrl.u32 %v9259_v22, 16  ;;  %v8000_v27 = vld [vmem:[#allocation2 + $0x90] sm:$0xff]  }
 0x14b   : > { %7318 = vmatprep.mubr.bf16.mxu1 %v6421_v7  ;;  %v4668_v7 = vld [vmem:[#allocation2 + $0x48] sm:$0xf]  ;;  %7555 = vmatpush3.bf16.msra.mxu0 %v8005_v45  ;;  %v9297_v9 = vcombine.low %v4741_v25, %v4751_v12  ;;  %v9301_v48 = vsel %vm8671_vm4, %v2278_v58, %v2279_v33  ;;  %v9303_v2 = vrot.slane %v4759_v46, 4  ;;  %v4769_v14 = vor.u32 %v4768_v38, %v9267_v10  ;;  %v8086_v33 = vld [vmem:[#allocation2 + $0x94] sm:$0xf] }
 0x14c   : > { %7556 = vmatprep.subr.bf16.mxu0 %v8009_v8  ;;  %v4801_v1 = vshrl.u32 %v4668_v7, 16  ;;  %v4804_v37 = vshll.u32 %v4668_v7, 16  ;;  %v7998_v45 = vld [vmem:[#allocation2 + $0x84] sm:$0xff]   ;;  %v4782_v7 = vrot.slane %v4780_v17, 5  ;;  %v9288_v36 = vrot.slane %v4786_v21, 5 }
 0x14d   : > { %v9310_v17 = vrot.slane %v4810_v57, 5  ;;  %v4816_v25 = vrot.slane %v4814_v3, 4  ;;  %v9312_v21 = vld [vmem:[#allocation2 + $0x58] sm:$0xf]  ;;  %v9315_v58 = vrot.slane %v4772_v50, 5  ;;  %v2283_v34 = vrot.slane %v8086_v33, 5 }
 0x14e   : > { %v4803_v59 = vrot.slane %v4801_v1, 4  ;;  %v4806_v26 = vrot.slane %v4804_v37, 5  ;;  %v4825_v12 = vshrl.u32 %v4671_v40, 16  ;;  %v4828_v46 = vshll.u32 %v4671_v40, 16  ;;  %v2159_v57 = vld [vmem:[#allocation2 + $0x9c] sm:$0xe] }
 0x14f   : > { %7557 = vmatpush3.bf16.msra.mxu0 %v8009_v8  ;;  %v4783_v38 = vor.u32 %v4782_v7, %v4779_v18  ;;  %v4793_v11 = vor.u32 %v4792_v49, %v9288_v36  ;;  %v9318_v8 = vrot.slane %v4796_v41, 5  ;;  %v6401_v1 = vrot.slane %v9306_v54, 9  ;;  %v8087_v3 = vld [vmem:[#allocation2 + $0xa0] sm:$0xf]  ;;  %v8007_v40 = vld [vmem:[%s10077_s3 + $0xd8] sm:$0xff]  }
 0x150   : > { %7590 = vmatprep.subr.bf16.mxu0 %v9277_v56  ;;  %v4770_v37 = vrot.slane %v4769_v14, 4  ;;  %v4765_v41 = vsel %vm8244_vm2, %v9303_v2, %v9267_v10  ;;  %v4807_v49 = vor.u32 %v4806_v26, %v4803_v59  ;;  %v2285_v18 = vrot.slane %v2283_v34, 4  ;;  %v8088_v7 = vld [vmem:[#allocation2 + $0x98] sm:$0x1]  ;;  %v9335_v2 = vld [vmem:[#allocation2 + $0x5c] sm:$0x1] }
 0x151   : > { %7527 = vmatmul.mubr.bf16.gmra.mrb[16].mxu0 %v7998_v45  ;;  %v4838_v45 = vshrl.u32 %v9312_v21, 16  ;;  %v2286_v14 = vrot.slane %v8088_v7, 5  ;;  %v4827_v54 = vrot.slane %v4825_v12, 4  ;;  %v4830_v33 = vrot.slane %v4828_v46, 5  ;;  %v8004_v26 = vld [vmem:[#allocation2 + $0xa8] sm:$0xff]  }
 0x152   : > { %7319 = vmatmul.mubr.bf16.vlgmr.msra.gmra.mrb[0].mxu1 %v10102_v47  ;;  %7530 = vmatprep.mubr.bf16.mxu0 %v8000_v27  ;;  %v4834_v47 = vshll.u32 %v9312_v21, 16  ;;  %v8002_v27 = vld [vmem:[#allocation2 + $0x9c] sm:$0xff]   ;;  %v4784_v60 = vrot.slane %v4783_v38, 4  ;;  %v4794_v61 = vrot.slane %v4793_v11, 4  ;;  %v6402_v13 = vrot.slane %v2159_v57, 9 }
 0x153   : > { %7351 = vmatpush3.bf16.msra.mxu1 %v9064_v23  ;;  %7322 = vmatprep.mubr.bf16.mxu1 %v10103_v44  ;;  %v9308_v23 = vld [vmem:[#allocation2 + $0x50] sm:$0x1]  ;;  %v2290_v44 = vrot.slane %v8087_v3, 5  ;;  %v10104_v3 = vcombine.low %v9125_v51, %v9129_v32  ;;  %v2293_v10 = vrot.slane %v8089_v15, 5  ;;  %v10105_v59 = vcombine.low %v9138_v20, %v9142_v28  ;;  %v2160_v46 = vld [vmem:[#allocation2 + $0xa8] sm:$0xe] }
 0x154   : > { %7352 = vmatprep.subr.bf16.mxu1 %v7999_v43  ;;  %v4820_v50 = vshll.u32 %v9308_v23, 16  ;;  %v9343_v32 = vrot.slane %v4834_v47, 5  ;;  %v8011_v15 = vld [vmem:[%s10077_s3 + $0xe0] sm:$0xff]   ;;  %v4808_v38 = vrot.slane %v4807_v49, 4  ;;  %v4840_v20 = vrot.slane %v4838_v45, 4 }
 0x155   : > { %v2292_v12 = vrot.slane %v2290_v44, 4  ;;  %v2297_v28 = vrot.slane %v8932_v4, 5  ;;  %v4831_v57 = vor.u32 %v4830_v33, %v4827_v54  ;;  %v4799_v4 = vsel %vm8244_vm2, %v4794_v61, %v9318_v8  ;;  %v8013_v61 = vld [vmem:[%s10077_s3 + $0xe8] sm:$0xff]   ;;  %v9391_v54 = vld [vmem:[#allocation2 + $0x64] sm:$0xf] }
 0x156   : > { %v4822_v51 = vrot.slane %v4820_v50, 5  ;;  %v4789_v50 = vsel %vm8244_vm2, %v4784_v60, %v9288_v36  ;;  %v4844_v47 = vshll.u32 %v9335_v2, 16  ;;  %v6403_v49 = vrot.slane %v2160_v46, 9  ;;  %v8090_v60 = vld [vmem:[#allocation2 + $0xb0] sm:$0x1]  ;;  %v8008_v46 = vld [vmem:[#allocation2 + $0xc0] sm:$0xff]  }
 0x157   : > { %7353 = vmatpush3.bf16.msra.mxu1 %v7999_v43  ;;  %v4817_v43 = vor.u32 %v4816_v25, %v9310_v17  ;;  %v4775_v25 = vsel %vm8244_vm2, %v4770_v37, %v9315_v58  ;;  %v9353_v58 = vsel %vm8671_vm4, %v6401_v1, %v2283_v34  ;;  %v9357_v37 = vsel %vm8671_vm4, %v2285_v18, %v2286_v14 }
 0x158   : > { %7354 = vmatprep.subr.bf16.mxu1 %v8003_v29  ;;  %v9366_v34 = vcombine.low %v4765_v41, %v4775_v25  ;;  %v9370_v1 = vsel %vm8671_vm4, %v6402_v13, %v2290_v44  ;;  %v9374_v45 = vsel %vm8671_vm4, %v2292_v12, %v2293_v10  ;;  %v2300_v36 = vrot.slane %v8090_v60, 5  ;;  %v2161_v41 = vld [vmem:[#allocation2 + $0xb4] sm:$0xe]  ;;  %v4677_v12 = vld [vmem:[#allocation2 + $0x6c] sm:$0xf] }
 0x159   : > { %v4818_v11 = vrot.slane %v4817_v43, 4  ;;  %7531 = vmatmul.mubr.bf16.gmra.mrb[20].mxu0 %v8002_v27  ;;  %v4674_v43 = vld [vmem:[#allocation2 + $0x60] sm:$0xf]  ;;  %v4813_v8 = vsel %vm8244_vm2, %v4808_v38, %v9310_v17  ;;  %v4841_v13 = vor.u32 %v4840_v20, %v9343_v32  ;;  %v2299_v44 = vrot.slane %v2297_v28, 4  ;;  %v8006_v27 = vld [vmem:[#allocation2 + $0xb4] sm:$0xff]  }
 0x15a   : > { %7323 = vmatmul.mubr.bf16.gmra.mrb[4].mxu1 %v10104_v3  ;;  %7534 = vmatprep.mubr.bf16.mxu0 %v8004_v26  ;;  %v9385_v18 = vcombine.low %v4789_v50, %v4799_v4  ;;  %v9389_v14 = vrot.slane %v4831_v57, 4  ;;  %v4849_v33 = vshrl.u32 %v4674_v43, 16  ;;  %v10106_v17 = vcombine.low %v9159_v24, %v9176_v52  ;;  %v9404_v26 = vld [vmem:[#allocation2 + $0x68] sm:$0x1]  ;;  %v8091_v38 = vld [vmem:[#allocation2 + $0xb8] sm:$0xf] }
 0x15b   : > { %7326 = vmatprep.mubr.bf16.mxu1 %v10105_v59  ;;  %7355 = vmatpush3.bf16.msra.mxu1 %v8003_v29  ;;  %v9398_v10 = vrot.slane %v4844_v47, 5  ;;  %v9402_v59 = vsel %vm8671_vm4, %v6403_v49, %v2297_v28  ;;  %10108 = vst [vmem:[#allocation7_spill] sm:$0xff] %v9404_v26  ;;  %v4852_v25 = vshll.u32 %v4674_v43, 16  ;;  %v6404_v52 = vrot.slane %v2161_v41, 9  ;;  %v9411_v20 = vld [vmem:[#allocation2 + $0xbc] sm:$0x1] }
 0x15c   : > { %7356 = vmatprep.subr.bf16.mxu1 %v8007_v40  ;;  %10107 = vst [vmem:[#allocation6_spill] sm:$0xff] %v9402_v59  ;;  %v9414_v57 = vld [vmem:[#allocation2 + $0x70] sm:$0xf]  ;;  %v4862_v4 = vshrl.u32 %v9391_v54, 16  ;;  %v4680_v47 = vld [vmem:[#allocation2 + $0x78] sm:$0xf] }
 0x15d   : > { %10110 = vst [vmem:[#allocation8_spill] sm:$0xff] %v9414_v57  ;;  %v8015_v50 = vld [vmem:[%s10077_s3 + $0xf0] sm:$0xff]   ;;  %v4851_v43 = vrot.slane %v4849_v33, 4  ;;  %v4868_v60 = vshll.u32 %v9404_v26, 16  ;;  %v9434_v41 = vld [vmem:[#allocation2 + $0x7c] sm:$0xf] }
 0x15e   : > { %10112 = vst [vmem:[#allocation10_spill] sm:$0xff] %v9434_v41  ;;  %v4906_v7 = vshll.u32 %v9434_v41, 16  ;;  %v4910_v49 = vshrl.u32 %v9434_v41, 16  ;;  %v4686_v29 = vld [vmem:[#allocation2 + $0x90] sm:$0xf] }
 0x15f   : > { %7357 = vmatpush3.bf16.msra.mxu1 %v8007_v40  ;;  %v4823_v40 = vsel %vm8244_vm2, %v4818_v11, %v4822_v51  ;;  %v10109_v51 = vcombine.low %v9180_v30, %v9189_v19  ;;  %v2304_v11 = vrot.slane %v8091_v38, 5  ;;  %v9419_v30 = vrot.slane %v4841_v13, 4 }
 0x160   : > { %7358 = vmatprep.subr.bf16.mxu1 %v8011_v15  ;;  %v9409_v24 = vcombine.low %v4813_v8, %v4823_v40  ;;  %v9423_v19 = vsel %vm8671_vm4, %v2299_v44, %v2300_v36  ;;  %v4873_v8 = vshrl.u32 %v4677_v12, 16  ;;  %v4854_v40 = vrot.slane %v4852_v25, 5  ;;  %v8010_v25 = vld [vmem:[#allocation2 + $0xcc] sm:$0xff]  }
 0x161   : > { %10111 = vst [vmem:[#allocation9_spill] sm:$0xff] %v9423_v19  ;;  %7535 = vmatmul.mubr.bf16.gmra.mrb[24].mxu0 %v8006_v27  ;;  %v4876_v13 = vshll.u32 %v4677_v12, 16  ;;  %v4882_v36 = vshll.u32 %v9414_v57, 16  ;;  %v4886_v44 = vshrl.u32 %v9414_v57, 16  ;;  %v9440_v33 = vsel %vm8671_vm4, %v6404_v52, %v2304_v11  ;;  %v4683_v27 = vld [vmem:[#allocation2 + $0x84] sm:$0xf] }
 0x162   : > { %7327 = vmatmul.mubr.bf16.gmra.mrb[8].mxu1 %v10106_v17  ;;  %7538 = vmatprep.mubr.bf16.mxu0 %v8008_v46  ;;  %v4900_v38 = vshll.u32 %v4680_v47, 16  ;;  %v9446_v12 = vrot.slane %v2304_v11, 4  ;;  %v4864_v17 = vrot.slane %v4862_v4, 4  ;;  %v9453_v52 = vld [vmem:[#allocation2 + $0x88] sm:$0xf]  ;;  %v9455_v3 = vrot.slane %v4868_v60, 5 }
 0x163   : > { %7330 = vmatprep.mubr.bf16.mxu1 %v10109_v51  ;;  %7359 = vmatpush3.bf16.msra.mxu1 %v8011_v15  ;;  %v4858_v15 = vshll.u32 %v9391_v54, 16  ;;  %v4897_v51 = vshrl.u32 %v4680_v47, 16  ;;  %v4875_v47 = vrot.slane %v4873_v8, 4  ;;  %v10113_v11 = vcombine.low %v9193_v62, %v9204_v6  ;;  %v9464_v19 = vld [vmem:[#allocation2 + $0x94] sm:$0xf] }
 0x164   : > { %7360 = vmatprep.subr.bf16.mxu1 %v8013_v61  ;;  %v4855_v28 = vor.u32 %v4854_v40, %v4851_v43  ;;  %v4878_v57 = vrot.slane %v4876_v13, 5  ;;  %v4888_v4 = vrot.slane %v4886_v44, 4  ;;  %10114 = vst [vmem:[#allocation11_spill] sm:$0xff] %v9464_v19  ;;  %v10115_v60 = vcombine.low %v9197_v42, %v9208_v16  ;;  %v9469_v8 = vld [vmem:[#allocation2 + $0x74] sm:$0x1] }
 0x165   : > { %v9451_v46 = vrot.slane %v4858_v15, 5  ;;  %v9462_v15 = vrot.slane %v4882_v36, 5  ;;  %v4899_v41 = vrot.slane %v4897_v51, 4  ;;  %v4902_v59 = vrot.slane %v4900_v38, 5 }
 0x166   : > { %v4921_v26 = vshrl.u32 %v4683_v27, 16  ;;  %v4924_v62 = vshll.u32 %v4683_v27, 16  ;;  %v4930_v6 = vshll.u32 %v9453_v52, 16  ;;  %v4934_v43 = vshrl.u32 %v9453_v52, 16 }
 0x167   : > { %7361 = vmatpush3.bf16.msra.mxu1 %v8013_v61  ;;  %v8017_v61 = vld [vmem:[%s10077_s3 + $0xf8] sm:$0xff]   ;;  %v4945_v40 = vshrl.u32 %v4686_v29, 16  ;;  %v4948_v13 = vshll.u32 %v4686_v29, 16  ;;  %v9473_v36 = vrot.slane %v4906_v7, 5  ;;  %v4912_v44 = vrot.slane %v4910_v49, 4 }
 0x168   : > { %7362 = vmatprep.subr.bf16.mxu1 %v8015_v50  ;;  %v4954_v42 = vshll.u32 %v9464_v19, 16  ;;  %v4958_v16 = vshrl.u32 %v9464_v19, 16  ;;  %v4879_v51 = vor.u32 %v4878_v57, %v4875_v47  ;;  %v4889_v38 = vor.u32 %v4888_v4, %v9462_v15  ;;  %v4689_v19 = vld [vmem:[#allocation2 + $0x9c] sm:$0xf] }
 0x169   : > { %7539 = vmatmul.mubr.bf16.gmra.mrb[28].mxu0 %v8010_v25  ;;  %v4892_v27 = vshll.u32 %v9469_v8, 16  ;;  %v9483_v29 = vrot.slane %v4855_v28, 4  ;;  %v4903_v7 = vor.u32 %v4902_v59, %v4899_v41  ;;  %v4923_v49 = vrot.slane %v4921_v26, 4  ;;  %v9488_v25 = vld [vmem:[%s10077_s3 + $0x100] sm:$0xff]   ;;  %v9495_v59 = vld [vmem:[#allocation2 + $0x8c] sm:$0x1] }
 0x16a   : > { %7331 = vmatmul.mubr.bf16.gmra.mrb[12].mxu1 %v10113_v11  ;;  %v9480_v11 = vld [vmem:[#allocation2 + $0x80] sm:$0x1]  ;;  %7558 = vmatprep.mubr.bf16.mxu0 %v9249_v53  ;;  %10116 = vst [vmem:[#allocation12_spill] sm:$0xff] %v9488_v25  ;;  %v9491_v57 = vrot.slane %v4930_v6, 5  ;;  %v4947_v47 = vrot.slane %v4945_v40, 4  ;;  %v4950_v4 = vrot.slane %v4948_v13, 5  ;;  %v4913_v53 = vor.u32 %v4912_v44, %v9473_v36 }
 0x16b   : > { %7334 = vmatprep.mubr.bf16.mxu1 %v10115_v60  ;;  %7363 = vmatpush3.bf16.msra.mxu1 %v8015_v50  ;;  %v4865_v50 = vor.u32 %v4864_v17, %v9451_v46  ;;  %v4926_v60 = vrot.slane %v4924_v62, 5  ;;  %v4936_v17 = vrot.slane %v4934_v43, 4  ;;  %v4916_v28 = vshll.u32 %v9480_v11, 16  ;;  %v9502_v40 = vld [vmem:[#allocation2 + $0x98] sm:$0x1] }
 0x16c   : > { %7364 = vmatprep.subr.bf16.mxu1 %v8017_v61  ;;  %v9497_v26 = vrot.slane %v4954_v42, 5  ;;  %v4960_v41 = vrot.slane %v4958_v16, 4  ;;  %v4880_v6 = vrot.slane %v4879_v51, 4  ;;  %v4894_v43 = vrot.slane %v4892_v27, 5  ;;  %v9519_v27 = vld [vmem:[#allocation2 + $0xa0] sm:$0xf] }
 0x16d   : > { %v4866_v62 = vrot.slane %v4865_v50, 4  ;;  %v10118_v13 = vcombine.low %v9253_v63, %v9263_v55  ;;  %v10119_v44 = vrot.slane %v9411_v20, 5  ;;  %v4904_v16 = vrot.slane %v4903_v7, 4  ;;  %v8014_v50 = vld [vmem:[%s10077_s3 + $0x208] sm:$0xff]  }
 0x16e   : > { %v4927_v51 = vor.u32 %v4926_v60, %v4923_v49  ;;  %v4940_v63 = vshll.u32 %v9495_v59, 16  ;;  %v4951_v55 = vor.u32 %v4950_v4, %v4947_v47  ;;  %v4914_v20 = vrot.slane %v4913_v53, 4 }
 0x16f   : > { %7365 = vmatpush3.bf16.msra.mxu1 %v8017_v61  ;;  %v10117_v61 = vcombine.low %v9225_v5, %v9229_v39  ;;  %v9512_v42 = vsel %vm8671_vm4, %v9446_v12, %v10119_v44  ;;  %v4969_v5 = vshrl.u32 %v4689_v19, 16  ;;  %v4972_v39 = vshll.u32 %v4689_v19, 16 }
 0x170   : > { %7638 = vmatprep.subr.bf16.mxu1 %v9488_v25  ;;  %v4890_v25 = vrot.slane %v4889_v38, 4  ;;  %v4937_v38 = vor.u32 %v4936_v17, %v9491_v57  ;;  %v4961_v12 = vor.u32 %v4960_v41, %v9497_v26  ;;  %v4964_v7 = vshll.u32 %v9502_v40, 16 }
 0x171   : > { %7559 = vmatmul.mubr.bf16.vlgmr.msra.gmra.mrb[0].mxu0 %v9297_v9  ;;  %v4861_v19 = vsel %vm8244_vm2, %v9483_v29, %v9451_v46  ;;  %v4871_v49 = vsel %vm8244_vm2, %v4866_v62, %v9455_v3  ;;  %v4885_v60 = vsel %vm8244_vm2, %v4880_v6, %v9462_v15  ;;  %v8016_v9 = vld [vmem:[%s10077_s3 + $0x210] sm:$0xff]   ;;  %v4971_v46 = vrot.slane %v4969_v5, 4 }
 0x172   : > { %7335 = vmatmul.mubr.bf16.gmra.mrb[16].mxu1 %v10117_v61  ;;  %v4918_v61 = vrot.slane %v4916_v28, 5  ;;  %v4895_v17 = vsel %vm8244_vm2, %v4890_v25, %v4894_v43  ;;  %7591 = vmatpush3.bf16.msra.mxu0 %v9277_v56  ;;  %v4974_v29 = vrot.slane %v4972_v39, 5  ;;  %v4978_v47 = vshll.u32 %v9519_v27, 16  ;;  %v5414_v39 = vld [vmem:[#allocation2 + $0x48] sm:$0xe] }
 0x173   : > { %7338 = vmatprep.mubr.bf16.mxu1 %v10118_v13  ;;  %7562 = vmatprep.mubr.bf16.mxu0 %v9366_v34  ;;  %v4982_v3 = vshrl.u32 %v9519_v27, 16  ;;  %v9543_v4 = vrot.slane %v4927_v51, 4  ;;  %v9545_v15 = vrot.slane %v4937_v38, 4  ;;  %v9547_v25 = vrot.slane %v4940_v63, 5  ;;  %v4692_v34 = vld [vmem:[#allocation2 + $0xa8] sm:$0xf] }
 0x174   : > { %7592 = vmatprep.subr.bf16.mxu0 %v8014_v50  ;;  %v9549_v56 = vrot.slane %v4951_v55, 4  ;;  %v4909_v53 = vsel %vm8244_vm2, %v4904_v16, %v9473_v36  ;;  %v4919_v28 = vsel %vm8244_vm2, %v4914_v20, %v4918_v61  ;;  %v9556_v41 = vrot.slane %v4961_v12, 4  ;;  %v5415_v38 = vld [vmem:[#allocation2 + $0x54] sm:$0xe]  ;;  %v8018_v63 = vld [vmem:[%s10077_s3 + $0x218] sm:$0xff]  }
 0x175   : > { %v9558_v62 = vrot.slane %v4964_v7, 5  ;;  %v10120_v6 = vcombine.low %v9283_v0, %v9301_v48  ;;  %v10121_v43 = vsel %vm8244_vm2, %v9419_v30, %v9398_v10  ;;  %v10122_v36 = vsel %vm8244_vm2, %v9389_v14, %v9343_v32  ;;  %v9581_v0 = vld [vmem:[#allocation2 + $0xa4] sm:$0x1]  ;;  %v9583_v48 = vld [vmem:[#allocation2 + $0xac] sm:$0xf] }
 0x176   : > { %v9573_v13 = vcombine.low %v10122_v36, %v10121_v43  ;;  %v6436_v44 = vcombine.low %v9440_v33, %v9512_v42  ;;  %v9577_v16 = vcombine.low %v4861_v19, %v4871_v49  ;;  %v9579_v5 = vcombine.low %v4885_v60, %v4895_v17  ;;  %7593 = vmatpush3.bf16.msra.mxu0 %v8014_v50  ;;  %v5416_v19 = vld [vmem:[#allocation2 + $0x60] sm:$0xe]  ;;  %v8030_v33 = vld [vmem:[%s10077_s3 + $0x238] sm:$0xff]  }
 0x177   : > { %v10123_v10 = vcombine.low %v9353_v58, %v9357_v37  ;;  %v4975_v32 = vor.u32 %v4974_v29, %v4971_v46  ;;  %v9588_v14 = vrot.slane %v4978_v47, 5  ;;  %v9590_v30 = vrot.slane %v4982_v3, 4  ;;  %7594 = vmatprep.subr.bf16.mxu0 %v8016_v9 }
 0x178   : > { %v4993_v51 = vshrl.u32 %v4692_v34, 16  ;;  %v9595_v55 = vcombine.low %v4909_v53, %v4919_v28  ;;  %v4933_v58 = vsel %vm8244_vm2, %v9543_v4, %v9491_v57  ;;  %v4943_v37 = vsel %vm8244_vm2, %v9545_v15, %v9547_v25 }
 0x179   : > { %v4988_v61 = vshll.u32 %v9581_v0, 16  ;;  %v4996_v12 = vshll.u32 %v4692_v34, 16  ;;  %v6665_v7 = vrot.slane %v5414_v39, 9  ;;  %7563 = vmatmul.mubr.bf16.gmra.mrb[4].mxu0 %v9385_v18  ;;  %v5002_v49 = vshll.u32 %v9583_v48, 16  ;;  %v5417_v18 = vld [vmem:[#allocation2 + $0x6c] sm:$0xe] }
 0x17a   : > { %7339 = vmatmul.mubr.bf16.gmra.mrb[20].mxu1 %v10120_v6  ;;  %v5504_v60 = vrot.slane %v9259_v22, 5  ;;  %v5507_v17 = vrot.slane %v9308_v23, 5  ;;  %v6666_v46 = vrot.slane %v5415_v38, 9  ;;  %7566 = vmatprep.mubr.bf16.mxu0 %v9409_v24  ;;  %v9619_v29 = vrot.slane %v4975_v32, 4  ;;  %v8021_v22 = vld [vmem:[%s10077_s3 + $0x220] sm:$0xff]  }
 0x17b   : > { %7342 = vmatprep.mubr.bf16.mxu1 %v10123_v10  ;;  %7595 = vmatpush3.bf16.msra.mxu0 %v8016_v9  ;;  %v4985_v47 = vor.u32 %v9590_v30, %v9588_v14  ;;  %v9623_v3 = vrot.slane %v4993_v51, 4  ;;  %v5511_v34 = vrot.slane %v9312_v21, 5  ;;  %v5514_v9 = vrot.slane %v9335_v2, 5  ;;  %v4695_v6 = vld [vmem:[#allocation2 + $0xb4] sm:$0xf]  ;;  %v10125_v30 = vld [vmem:[#allocation7_spill] sm:$0xff] }
 0x17c   : > { %7596 = vmatprep.subr.bf16.mxu0 %v8018_v63  ;;  %v9631_v23 = vsel %vm8671_vm4, %v6665_v7, %v5504_v60  ;;  %v5506_v24 = vrot.slane %v5504_v60, 4  ;;  %v6667_v53 = vrot.slane %v5416_v19, 9  ;;  %v9634_v28 = vrot.slane %v4996_v12, 5  ;;  %v9644_v10 = vld [vmem:[#allocation2 + $0xb0] sm:$0x1]  ;;  %v10127_v7 = vld [vmem:[#allocation9_spill] sm:$0xff] }
 0x17d   : > { %v9638_v21 = vsel %vm8671_vm4, %v6666_v46, %v5511_v34  ;;  %v5513_v43 = vrot.slane %v5511_v34, 4  ;;  %v5518_v36 = vrot.slane %v9391_v54, 5  ;;  %v10124_v39 = vcombine.low %v9370_v1, %v9374_v45  ;;  %v10126_v12 = vld [vmem:[#allocation6_spill] sm:$0xff]  ;;  %v10129_v34 = vld [vmem:[#allocation8_spill] sm:$0xff] }
 0x17e   : > { %v5006_v32 = vshrl.u32 %v9583_v48, 16  ;;  %v9649_v2 = vsel %vm8671_vm4, %v5506_v24, %v5507_v17  ;;  %v5521_v51 = vrot.slane %v10125_v30, 5  ;;  %v6668_v38 = vrot.slane %v5417_v18, 9  ;;  %v8024_v17 = vld [vmem:[%s10077_s3 + $0x228] sm:$0xff]   ;;  %v9686_v30 = vld [vmem:[#allocation2 + $0xb8] sm:$0xf] }
 0x17f   : > { %v10128_v19 = vcombine.low %v10126_v12, %v10127_v7  ;;  %7597 = vmatpush3.bf16.msra.mxu0 %v8018_v63  ;;  %v9659_v45 = vsel %vm8671_vm4, %v5513_v43, %v5514_v9  ;;  %v9663_v54 = vsel %vm8671_vm4, %v6667_v53, %v5518_v36  ;;  %v5520_v60 = vrot.slane %v5518_v36, 4 }
 0x180   : > { %7598 = vmatprep.subr.bf16.mxu0 %v8021_v22  ;;  %v9668_v46 = vrot.slane %v4988_v61, 5  ;;  %v5525_v18 = vrot.slane %v10129_v34, 5  ;;  %v5528_v24 = vrot.slane %v9469_v8, 5  ;;  %v9674_v9 = vrot.slane %v5002_v49, 5  ;;  %v5418_v34 = vld [vmem:[#allocation2 + $0x78] sm:$0xe] }
 0x181   : > { %v5012_v53 = vshll.u32 %v9644_v10, 16  ;;  %v5017_v43 = vshrl.u32 %v4695_v6, 16  ;;  %v9679_v36 = vsel %vm8671_vm4, %v5520_v60, %v5521_v51  ;;  %7567 = vmatmul.mubr.bf16.gmra.mrb[8].mxu0 %v9573_v13  ;;  %v8019_v51 = vld [vmem:[#allocation2 + $0xc] sm:$0xff]   ;;  %v9695_v13 = vrot.slane %v4985_v47, 4  ;;  %v10131_v47 = vld [vmem:[#allocation4_spill] sm:$0xff] }
 0x182   : > { %7343 = vmatmul.mubr.bf16.gmra.mrb[24].mxu1 %v10124_v39  ;;  %v3044_v39 = vld [vmem:[#allocation2 + $0x78] sm:$0xf]  ;;  %v9692_v49 = vsel %vm8671_vm4, %v6668_v38, %v5525_v18  ;;  %v5527_v12 = vrot.slane %v5525_v18, 4  ;;  %7570 = vmatprep.mubr.bf16.mxu0 %v9577_v16  ;;  %v4999_v7 = vor.u32 %v9634_v28, %v9623_v3  ;;  %v5020_v60 = vshll.u32 %v4695_v6, 16  ;;  %v8027_v8 = vld [vmem:[%s10077_s3 + $0x230] sm:$0xff]  }
 0x183   : > { %7346 = vmatprep.mubr.bf16.mxu1 %v10128_v19  ;;  %7599 = vmatpush3.bf16.msra.mxu0 %v8021_v22  ;;  %v5008_v19 = vrot.slane %v5006_v32, 4  ;;  %v3282_v16 = vshrl.u32 %v3044_v39, 16  ;;  %v3285_v18 = vshll.u32 %v3044_v39, 16  ;;  %v10130_v22 = vld [vmem:[#allocation5_spill] sm:$0xff]  ;;  %v5419_v3 = vld [vmem:[#allocation2 + $0x84] sm:$0xe]  ;;  %v10136_v15 = vsel %vm8244_vm2, %v9549_v56, %v9497_v26 }
 0x184   : > { %7600 = vmatprep.subr.bf16.mxu0 %v8024_v17  ;;  %v9704_v38 = vsel %vm8671_vm4, %v5527_v12, %v5528_v24  ;;  %v3304_v63 = vsel %vm8244_vm2, %v10131_v47, %v10130_v22  ;;  %v9710_v28 = vrot.slane %v5012_v53, 5  ;;  %v9712_v6 = vrot.slane %v5017_v43, 4  ;;  %v10132_v61 = vld [vmem:[#allocation10_spill] sm:$0xff]  ;;  %v4698_v22 = vld [vmem:[#allocation2 + $0xc0] sm:$0xf] }
 0x185   : > { %v5026_v32 = vshll.u32 %v9686_v30, 16  ;;  %v6700_v1 = vcombine.low %v9692_v49, %v9704_v38  ;;  %v3284_v24 = vrot.slane %v3282_v16, 4  ;;  %v3287_v39 = vrot.slane %v3285_v18, 5  ;;  %v8020_v18 = vld [vmem:[#allocation2 + $0x18] sm:$0xff]   ;;  %v8119_v49 = vld [vmem:[#allocation2 + $0xb0] sm:$0x1] }
 0x186   : > { %v6669_v12 = vrot.slane %v5418_v34, 9  ;;  %v5532_v50 = vrot.slane %v10132_v61, 5  ;;  %v5022_v53 = vrot.slane %v5020_v60, 5  ;;  %v5030_v43 = vshrl.u32 %v9686_v30, 16  ;;  %v9738_v34 = vld [vmem:[#allocation2 + $0xc4] sm:$0xf] }
 0x187   : > { %7601 = vmatpush3.bf16.msra.mxu0 %v8024_v17  ;;  %v5535_v47 = vrot.slane %v9480_v11, 5  ;;  %v6670_v20 = vrot.slane %v5419_v3, 9  ;;  %v3288_v42 = vor.u32 %v3287_v39, %v3284_v24  ;;  %v5539_v17 = vrot.slane %v9453_v52, 5 }
 0x188   : > { %7602 = vmatprep.subr.bf16.mxu0 %v8027_v8  ;;  %v5534_v61 = vrot.slane %v5532_v50, 4  ;;  %v9735_v11 = vrot.slane %v4999_v7, 4  ;;  %v5009_v60 = vor.u32 %v5008_v19, %v9674_v9  ;;  %v5542_v16 = vrot.slane %v9495_v59, 5  ;;  %v9755_v19 = vld [vmem:[#allocation2 + $0xbc] sm:$0x1] }
 0x189   : > { %7571 = vmatmul.mubr.bf16.gmra.mrb[12].mxu0 %v9579_v5  ;;  %v5041_v3 = vshrl.u32 %v4698_v22, 16  ;;  %v3289_v24 = vrot.slane %v3288_v42, 4  ;;  %v9753_v59 = vsel %vm8671_vm4, %v6670_v20, %v5539_v17  ;;  %v5541_v5 = vrot.slane %v5539_v17, 4  ;;  %v10134_v17 = vld [vmem:[#allocation12_spill] sm:$0xff] }
 0x18a   : > { %7347 = vmatmul.mubr.bf16.gmra.mrb[28].mxu1 %v6436_v44  ;;  %v9728_v44 = vsel %vm8671_vm4, %v6669_v12, %v5532_v50  ;;  %v5044_v50 = vshll.u32 %v4698_v22, 16  ;;  %v9744_v52 = vsel %vm8671_vm4, %v5534_v61, %v5535_v47  ;;  %7574 = vmatprep.mubr.bf16.mxu0 %v9595_v55  ;;  %v5023_v39 = vor.u32 %v5022_v53, %v9712_v6  ;;  %v5420_v61 = vld [vmem:[#allocation2 + $0x90] sm:$0xe] }
 0x18b   : > { %7366 = vmatprep.mubr.bf16.mxu1 %v8019_v51  ;;  %v4991_v51 = vsel %vm8244_vm2, %v9695_v13, %v9668_v46  ;;  %v8022_v46 = vld [vmem:[#allocation2 + $0x24] sm:$0xff]   ;;  %v9747_v13 = vrot.slane %v5026_v32, 5  ;;  %7603 = vmatpush3.bf16.msra.mxu0 %v8027_v8  ;;  %v6701_v7 = vcombine.low %v9728_v44, %v9744_v52  ;;  %v5050_v12 = vshll.u32 %v9738_v34, 16  ;;  %v10133_v32 = vld [vmem:[#allocation3_spill] sm:$0xff] }
 0x18c   : > { %v5054_v55 = vshrl.u32 %v9738_v34, 16  ;;  %7604 = vmatprep.subr.bf16.mxu0 %v8030_v33  ;;  %v3294_v8 = vsel %vm8244_vm2, %v3289_v24, %v10133_v32  ;;  %v5010_v22 = vrot.slane %v5009_v60, 4  ;;  %v5032_v47 = vrot.slane %v5030_v43, 4 }
 0x18d   : > { %v9763_v42 = vcombine.low %v3294_v8, %v3304_v63  ;;  %v9767_v20 = vsel %vm8671_vm4, %v5541_v5, %v5542_v16  ;;  %v6646_v6 = vcombine.low %v4933_v58, %v4943_v37  ;;  %v5043_v53 = vrot.slane %v5041_v3, 4  ;;  %v4701_v37 = vld [vmem:[#allocation2 + $0xcc] sm:$0xf]  ;;  %v9815_v3 = vld [vmem:[#allocation2 + $0xc8] sm:$0x1] }
 0x18e   : > { %v5046_v63 = vrot.slane %v5044_v50, 5  ;;  %v6702_v43 = vcombine.low %v9753_v59, %v9767_v20  ;;  %v10135_v60 = vsel %vm8244_vm2, %v9556_v41, %v9558_v62  ;;  %v10137_v4 = vsel %vm8244_vm2, %v9619_v29, %v9588_v14  ;;  %v8094_v16 = vld [vmem:[%s10077_s3 + $0x108] sm:$0xff]   ;;  %v9807_v62 = vld [vmem:[#allocation2 + $0xd0] sm:$0xf]  ;;  %v10138_v50 = vld [vmem:[#allocation11_spill] sm:$0xff] }
 0x18f   : > { %v6647_v57 = vcombine.low %v10136_v15, %v10135_v60  ;;  %v6648_v25 = vcombine.low %v10137_v4, %v4991_v51  ;;  %v5036_v58 = vshll.u32 %v9755_v19, 16  ;;  %v5005_v26 = vsel %vm8244_vm2, %v9735_v11, %v9674_v9  ;;  %7605 = vmatpush3.bf16.msra.mxu0 %v8030_v33  ;;  %v5421_v9 = vld [vmem:[#allocation2 + $0x9c] sm:$0xe]  ;;  %v8023_v11 = vld [vmem:[#allocation2 + $0x30] sm:$0xff]  }
 0x190   : > { %v9805_v56 = vrot.slane %v5050_v12, 5  ;;  %v5056_v41 = vrot.slane %v5054_v55, 4  ;;  %v6671_v14 = vrot.slane %v5420_v61, 9  ;;  %v5015_v29 = vsel %vm8244_vm2, %v5010_v22, %v9710_v28  ;;  %v8025_v55 = vld [vmem:[#allocation2 + $0x3c] sm:$0xff]   ;;  %v8095_v22 = vld [vmem:[%s10077_s3 + $0x110] sm:$0xff]  }
 0x191   : > { %v9812_v51 = vrot.slane %v5023_v39, 4  ;;  %v5546_v24 = vrot.slane %v10138_v50, 5  ;;  %7575 = vmatmul.mubr.bf16.gmra.mrb[16].mxu0 %v6646_v6  ;;  %v5065_v5 = vshrl.u32 %v4701_v37, 16  ;;  %v5068_v12 = vshll.u32 %v4701_v37, 16 }
 0x192   : > { %7367 = vmatmul.mubr.bf16.vlgmr.msra.gmra.mrb[0].mxu1 %v8020_v18  ;;  %v5033_v18 = vor.u32 %v5032_v47, %v9747_v13  ;;  %v5549_v33 = vrot.slane %v9502_v40, 5  ;;  %7578 = vmatprep.mubr.bf16.mxu0 %v6647_v57  ;;  %v5074_v28 = vshll.u32 %v9807_v62, 16  ;;  %v5078_v39 = vshrl.u32 %v9807_v62, 16 }
 0x193   : > { %7646 = vmatpush3.bf16.msra.mxu1 %v10134_v17  ;;  %7370 = vmatprep.mubr.bf16.mxu1 %v8022_v46  ;;  %v5047_v46 = vor.u32 %v5046_v63, %v5043_v53  ;;  %v9823_v32 = vsel %vm8671_vm4, %v6671_v14, %v5546_v24  ;;  %v5548_v8 = vrot.slane %v5546_v24, 4  ;;  %v5057_v47 = vor.u32 %v5056_v41, %v9805_v56 }
 0x194   : > { %7639 = vmatprep.subr.bf16.mxu1 %v8094_v16  ;;  %v5060_v40 = vshll.u32 %v9815_v3, 16  ;;  %v6672_v61 = vrot.slane %v5421_v9, 9  ;;  %v5553_v6 = vrot.slane %v9519_v27, 5  ;;  %v6649_v53 = vcombine.low %v5005_v26, %v5015_v29  ;;  %v9842_v27 = vld [vmem:[#allocation2 + $0xd4] sm:$0x1] }
 0x195   : > { %v5038_v63 = vrot.slane %v5036_v58, 5  ;;  %v9833_v17 = vsel %vm8671_vm4, %v5548_v8, %v5549_v33  ;;  %v5556_v60 = vrot.slane %v9581_v0, 5  ;;  %v5034_v15 = vrot.slane %v5033_v18, 4  ;;  %v8096_v0 = vld [vmem:[%s10077_s3 + $0x118] sm:$0xff]   ;;  %v5422_v9 = vld [vmem:[#allocation2 + $0xa8] sm:$0xe] }
 0x196   : > { %v6703_v57 = vcombine.low %v9823_v32, %v9833_v17  ;;  %v9840_v4 = vsel %vm8671_vm4, %v6672_v61, %v5553_v6  ;;  %v5555_v37 = vrot.slane %v5553_v6, 4  ;;  %v5067_v58 = vrot.slane %v5065_v5, 4  ;;  %v5410_v33 = vld [vmem:[#allocation2 + $0x18] sm:$0xe] }
 0x197   : > { %7647 = vmatpush3.bf16.msra.mxu1 %v8094_v16  ;;  %v5070_v16 = vrot.slane %v5068_v12, 5  ;;  %v9844_v26 = vrot.slane %v5074_v28, 5  ;;  %v5080_v41 = vrot.slane %v5078_v39, 4  ;;  %v5048_v14 = vrot.slane %v5047_v46, 4 }
 0x198   : > { %7640 = vmatprep.subr.bf16.mxu1 %v8095_v22  ;;  %v5058_v29 = vrot.slane %v5057_v47, 4  ;;  %v5062_v18 = vrot.slane %v5060_v40, 5  ;;  %v9851_v50 = vsel %vm8671_vm4, %v5555_v37, %v5556_v60  ;;  %v5029_v5 = vsel %vm8244_vm2, %v9812_v51, %v9747_v13  ;;  %v8097_v13 = vld [vmem:[%s10077_s3 + $0x120] sm:$0xff]   ;;  %v8098_v51 = vld [vmem:[#allocation2 + $0x1c] sm:$0xf] }
 0x199   : > { %v6704_v24 = vcombine.low %v9840_v4, %v9851_v50  ;;  %7579 = vmatmul.mubr.bf16.gmra.mrb[20].mxu0 %v6648_v25  ;;  %v5039_v46 = vsel %vm8244_vm2, %v5034_v15, %v5038_v63  ;;  %v5084_v12 = vshll.u32 %v9842_v27, 16  ;;  %v5071_v28 = vor.u32 %v5070_v16, %v5067_v58  ;;  %v5423_v40 = vld [vmem:[#allocation2 + $0xb4] sm:$0xe]  ;;  %v8099_v63 = vld [vmem:[#allocation2 + $0x20] sm:$0x1] }
 0x19a   : > { %7371 = vmatmul.mubr.bf16.gmra.mrb[4].mxu1 %v8023_v11  ;;  %v8026_v11 = vld [vmem:[#allocation2 + $0x48] sm:$0xff]   ;;  %7582 = vmatprep.mubr.bf16.mxu0 %v6649_v53  ;;  %v5081_v39 = vor.u32 %v5080_v41, %v9844_v26  ;;  %v5053_v25 = vsel %vm8244_vm2, %v5048_v14, %v9805_v56  ;;  %v5063_v8 = vsel %vm8244_vm2, %v5058_v29, %v5062_v18  ;;  %v6673_v47 = vrot.slane %v5422_v9, 9  ;;  %v8029_v9 = vld [vmem:[#allocation2 + $0x60] sm:$0xff]  }
 0x19b   : > { %7374 = vmatprep.mubr.bf16.mxu1 %v8025_v55  ;;  %7648 = vmatpush3.bf16.msra.mxu1 %v8095_v22  ;;  %v8028_v55 = vld [vmem:[#allocation2 + $0x54] sm:$0xff]   ;;  %v5476_v22 = vrot.slane %v8098_v51, 5  ;;  %v6650_v61 = vcombine.low %v5029_v5, %v5039_v46  ;;  %v6661_v6 = vrot.slane %v5410_v33, 9  ;;  %v5086_v53 = vrot.slane %v5084_v12, 5  ;;  %v8100_v14 = vld [vmem:[%s10077_s3 + $0x128] sm:$0xff]  }
 0x19c   : > { %7641 = vmatprep.subr.bf16.mxu1 %v8096_v0  ;;  %v5479_v60 = vrot.slane %v8099_v63, 5  ;;  %v5560_v56 = vrot.slane %v9583_v48, 5  ;;  %v5563_v15 = vrot.slane %v9644_v10, 5  ;;  %v6651_v37 = vcombine.low %v5053_v25, %v5063_v8  ;;  %v8101_v5 = vld [vmem:[#allocation2 + $0x28] sm:$0xf] }
 0x19d   : > { %v5072_v58 = vrot.slane %v5071_v28, 4  ;;  %v5082_v16 = vrot.slane %v5081_v39, 4  ;;  %v6674_v41 = vrot.slane %v5423_v40, 9  ;;  %v5567_v48 = vrot.slane %v9686_v30, 5  ;;  %v8031_v28 = vld [vmem:[#allocation2 + $0x6c] sm:$0xff]  }
 0x19e   : > { %v9878_v29 = vsel %vm8671_vm4, %v6673_v47, %v5560_v56  ;;  %v5562_v18 = vrot.slane %v5560_v56, 4  ;;  %v5570_v10 = vrot.slane %v9755_v19, 5  ;;  %v5483_v46 = vrot.slane %v8101_v5, 5  ;;  %v8102_v39 = vld [vmem:[#allocation2 + $0x34] sm:$0xf] }
 0x19f   : > { %7649 = vmatpush3.bf16.msra.mxu1 %v8096_v0  ;;  %v5478_v0 = vrot.slane %v5476_v22, 4  ;;  %v9888_v33 = vsel %vm8671_vm4, %v6674_v41, %v5567_v48  ;;  %v5077_v30 = vsel %vm8244_vm2, %v5072_v58, %v9844_v26  ;;  %v5087_v19 = vsel %vm8244_vm2, %v5082_v16, %v5086_v53  ;;  %v5412_v47 = vld [vmem:[#allocation2 + $0x30] sm:$0xe]  ;;  %v8105_v16 = vld [vmem:[#allocation2 + $0x38] sm:$0x1] }
 0x1a0   : > { %7642 = vmatprep.subr.bf16.mxu1 %v8097_v13  ;;  %v9884_v12 = vsel %vm8671_vm4, %v5562_v18, %v5563_v15  ;;  %v5490_v25 = vrot.slane %v8102_v39, 5  ;;  %v8103_v26 = vld [vmem:[%s10077_s3 + $0x130] sm:$0xff]   ;;  %v6652_v63 = vcombine.low %v5077_v30, %v5087_v19  ;;  %v5493_v41 = vrot.slane %v8105_v16, 5  ;;  %v5425_v18 = vld [vmem:[#allocation2 + $0xcc] sm:$0xe]  ;;  %v8033_v39 = vld [vmem:[#allocation2 + $0x84] sm:$0xff]  }
 0x1a1   : > { %7583 = vmatmul.mubr.bf16.gmra.mrb[24].mxu0 %v6650_v61  ;;  %v6705_v8 = vcombine.low %v9878_v29, %v9884_v12  ;;  %v5480_v51 = vsel %vm8671_vm4, %v5478_v0, %v5479_v60  ;;  %v5424_v60 = vld [vmem:[#allocation2 + $0xc0] sm:$0xe]  ;;  %v8106_v0 = vld [vmem:[%s10077_s3 + $0x138] sm:$0xff]   ;;  %v5574_v19 = vrot.slane %v9738_v34, 5  ;;  %v5581_v34 = vrot.slane %v9807_v62, 5 }
 0x1a2   : > { %7375 = vmatmul.mubr.bf16.gmra.mrb[8].mxu1 %v8026_v11  ;;  %v5411_v11 = vld [vmem:[#allocation2 + $0x24] sm:$0xe]  ;;  %7586 = vmatprep.mubr.bf16.mxu0 %v6651_v37  ;;  %v6663_v37 = vrot.slane %v5412_v47, 9  ;;  %v5492_v58 = vrot.slane %v5490_v25, 4  ;;  %v5413_v5 = vld [vmem:[#allocation2 + $0x3c] sm:$0xe] }
 0x1a3   : > { %7378 = vmatprep.mubr.bf16.mxu1 %v8028_v55  ;;  %7650 = vmatpush3.bf16.msra.mxu1 %v8097_v13  ;;  %v5569_v55 = vrot.slane %v5567_v48, 4  ;;  %v5477_v13 = vsel %vm8671_vm4, %v6661_v6, %v5476_v22  ;;  %v6662_v61 = vrot.slane %v5411_v11, 9  ;;  %v5485_v22 = vrot.slane %v5483_v46, 4  ;;  %v8104_v6 = vld [vmem:[#allocation2 + $0x2c] sm:$0x1] }
 0x1a4   : > { %7643 = vmatprep.subr.bf16.mxu1 %v8100_v14  ;;  %v5486_v56 = vrot.slane %v8104_v6, 5  ;;  %v6693_v15 = vcombine.low %v5477_v13, %v5480_v51  ;;  %v5491_v13 = vsel %vm8671_vm4, %v6663_v37, %v5490_v25  ;;  %v6676_v47 = vrot.slane %v5425_v18, 9  ;;  %v8108_v6 = vld [vmem:[#allocation2 + $0x44] sm:$0x1] }
 0x1a5   : > { %v9906_v40 = vsel %vm8671_vm4, %v5569_v55, %v5570_v10  ;;  %v5484_v48 = vsel %vm8671_vm4, %v6662_v61, %v5483_v46  ;;  %v6675_v10 = vrot.slane %v5424_v60, 9  ;;  %v8107_v55 = vld [vmem:[#allocation2 + $0x40] sm:$0xf]  ;;  %v5494_v46 = vsel %vm8671_vm4, %v5492_v58, %v5493_v41 }
 0x1a6   : > { %v6706_v53 = vcombine.low %v9888_v33, %v9906_v40  ;;  %v5487_v11 = vsel %vm8671_vm4, %v5485_v22, %v5486_v56  ;;  %v5497_v30 = vrot.slane %v8107_v55, 5  ;;  %v6664_v22 = vrot.slane %v5413_v5, 9 }
 0x1a7   : > { %7651 = vmatpush3.bf16.msra.mxu1 %v8100_v14  ;;  %v3041_v14 = vld [vmem:[#allocation2 + $0x6c] sm:$0xf]  ;;  %v9925_v61 = vsel %vm8671_vm4, %v6675_v10, %v5574_v19  ;;  %v5500_v56 = vrot.slane %v8108_v6, 5  ;;  %v5584_v25 = vrot.slane %v9842_v27, 5  ;;  %v6695_v41 = vcombine.low %v5491_v13, %v5494_v46  ;;  %v3050_v6 = vld [vmem:[#allocation2 + $0x90] sm:$0xf] }
 0x1a8   : > { %7644 = vmatprep.subr.bf16.mxu1 %v8103_v26  ;;  %v3258_v51 = vshrl.u32 %v3041_v14, 16  ;;  %v5499_v60 = vrot.slane %v5497_v30, 4  ;;  %v3397_v38 = vshll.u32 %v8119_v49, 16 }
 0x1a9   : > { %7587 = vmatmul.mubr.bf16.gmra.mrb[28].mxu0 %v6652_v63  ;;  %v5576_v63 = vrot.slane %v5574_v19, 4 }
 0x1aa   : > { %7379 = vmatmul.mubr.bf16.gmra.mrb[12].mxu1 %v8029_v9  ;;  %v8032_v9 = vld [vmem:[#allocation2 + $0x78] sm:$0xff]   ;;  %7606 = vmatprep.mubr.bf16.mxu0 %v6693_v15  ;;  %v8109_v15 = vld [vmem:[#allocation2 + $0x70] sm:$0xf]  ;;  %v3260_v27 = vrot.slane %v3258_v51, 4  ;;  %v8110_v51 = vld [vmem:[#allocation2 + $0x74] sm:$0x1] }
 0x1ab   : > { %7382 = vmatprep.mubr.bf16.mxu1 %v8031_v28  ;;  %7652 = vmatpush3.bf16.msra.mxu1 %v8103_v26  ;;  %v5577_v28 = vrot.slane %v9815_v3, 5  ;;  %v3261_v26 = vshll.u32 %v3041_v14, 16  ;;  %v6694_v3 = vcombine.low %v5484_v48, %v5487_v11  ;;  %v3267_v37 = vshll.u32 %v8109_v15, 16 }
 0x1ac   : > { %7645 = vmatprep.subr.bf16.mxu1 %v8106_v0  ;;  %v3271_v58 = vshrl.u32 %v8109_v15, 16  ;;  %v5583_v14 = vrot.slane %v5581_v34, 4  ;;  %v5498_v48 = vsel %vm8671_vm4, %v6664_v22, %v5497_v30  ;;  %v5501_v11 = vsel %vm8671_vm4, %v5499_v60, %v5500_v56  ;;  %v8036_v56 = vld [vmem:[#allocation2 + $0xa8] sm:$0xff]  }
 0x1ad   : > { %v9931_v16 = vsel %vm8671_vm4, %v5576_v63, %v5577_v28  ;;  %v3263_v18 = vrot.slane %v3261_v26, 5  ;;  %v3269_v5 = vrot.slane %v3267_v37, 5  ;;  %v8035_v28 = vld [vmem:[#allocation2 + $0x9c] sm:$0xff]   ;;  %v6696_v46 = vcombine.low %v5498_v48, %v5501_v11 }
 0x1ae   : > { %v6707_v62 = vcombine.low %v9925_v61, %v9931_v16  ;;  %v9943_v10 = vsel %vm8671_vm4, %v5583_v14, %v5584_v25  ;;  %v3273_v55 = vrot.slane %v3271_v58, 4  ;;  %v3053_v58 = vld [vmem:[#allocation2 + $0x9c] sm:$0xf]  ;;  %v8037_v14 = vld [vmem:[#allocation2 + $0xb4] sm:$0xff]   ;;  %v3330_v48 = vshrl.u32 %v3050_v6, 16 }
 0x1af   : > { %7653 = vmatpush3.bf16.msra.mxu1 %v8106_v0  ;;  %v9937_v0 = vsel %vm8671_vm4, %v6676_v47, %v5581_v34  ;;  %v3264_v13 = vor.u32 %v3263_v18, %v3260_v27  ;;  %v3277_v47 = vshll.u32 %v8110_v51, 16  ;;  %v8111_v34 = vld [vmem:[#allocation2 + $0x88] sm:$0xf]  ;;  %v8114_v51 = vld [vmem:[#allocation2 + $0xa0] sm:$0xf] }
 0x1b0   : > { %v6708_v19 = vcombine.low %v9937_v0, %v9943_v10  ;;  %v3274_v30 = vor.u32 %v3273_v55, %v3269_v5  ;;  %v3315_v31 = vshll.u32 %v8111_v34, 16  ;;  %v8112_v55 = vld [vmem:[#allocation2 + $0x94] sm:$0xf] }
 0x1b1   : > { %7607 = vmatmul.mubr.bf16.vlgmr.msra.gmra.mrb[0].mxu0 %v6694_v3  ;;  %v3319_v3 = vshrl.u32 %v8111_v34, 16  ;;  %v3265_v22 = vrot.slane %v3264_v13, 4  ;;  %v3279_v60 = vrot.slane %v3277_v47, 5  ;;  %v3354_v13 = vshrl.u32 %v3053_v58, 16 }
 0x1b2   : > { %7383 = vmatmul.mubr.bf16.gmra.mrb[16].mxu1 %v8032_v9  ;;  %v8034_v9 = vld [vmem:[#allocation2 + $0x90] sm:$0xff]   ;;  %7610 = vmatprep.mubr.bf16.mxu0 %v6695_v41  ;;  %v3275_v25 = vrot.slane %v3274_v30, 4  ;;  %v10139_v41 = vcombine.low %v9631_v23, %v9649_v2  ;;  %v9952_v27 = vrot.slane %v3315_v31, 5  ;;  %v8113_v23 = vld [vmem:[#allocation2 + $0x8c] sm:$0x1]  ;;  %v3363_v47 = vshll.u32 %v8114_v51, 16 }
 0x1b3   : > { %7386 = vmatprep.mubr.bf16.mxu1 %v8033_v39  ;;  %v3047_v39 = vld [vmem:[#allocation2 + $0x84] sm:$0xf]  ;;  %v3321_v18 = vrot.slane %v3319_v3, 4  ;;  %v3270_v11 = vsel %vm8244_vm2, %v3265_v22, %v3269_v5  ;;  %v3325_v2 = vshll.u32 %v8113_v23, 16  ;;  %v3332_v31 = vrot.slane %v3330_v48, 4 }
 0x1b4   : > { %v3306_v26 = vshrl.u32 %v3047_v39, 16  ;;  %v3309_v63 = vshll.u32 %v3047_v39, 16  ;;  %v3343_v39 = vshrl.u32 %v8112_v55, 16  ;;  %v3280_v30 = vsel %vm8244_vm2, %v3275_v25, %v3279_v60  ;;  %v8038_v25 = vld [vmem:[#allocation2 + $0xc0] sm:$0xff]  }
 0x1b5   : > { %v3322_v34 = vor.u32 %v3321_v18, %v9952_v27  ;;  %v6509_v60 = vcombine.low %v3270_v11, %v3280_v30  ;;  %v3059_v30 = vld [vmem:[#allocation2 + $0xb4] sm:$0xf] }
 0x1b6   : > { %v3308_v15 = vrot.slane %v3306_v26, 4  ;;  %v3311_v37 = vrot.slane %v3309_v63, 5  ;;  %v3367_v26 = vshrl.u32 %v8114_v51, 16  ;;  %v3345_v22 = vrot.slane %v3343_v39, 4  ;;  %v8117_v51 = vld [vmem:[#allocation2 + $0xac] sm:$0xf] }
 0x1b7   : > { %v3323_v48 = vrot.slane %v3322_v34, 4 }
 0x1b8   : > { %v3312_v63 = vor.u32 %v3311_v37, %v3308_v15  ;;  %v3056_v15 = vld [vmem:[#allocation2 + $0xa8] sm:$0xf]  ;;  %v10141_v37 = vcombine.low %v9663_v54, %v9679_v36  ;;  %v3391_v54 = vshrl.u32 %v8117_v51, 16 }
 0x1b9   : > { %7611 = vmatmul.mubr.bf16.gmra.mrb[4].mxu0 %v6696_v46  ;;  %v3357_v46 = vshll.u32 %v3053_v58, 16  ;;  %v3378_v11 = vshrl.u32 %v3056_v15, 16 }
 0x1ba   : > { %7387 = vmatmul.mubr.bf16.gmra.mrb[20].mxu1 %v8034_v9  ;;  %7614 = vmatprep.mubr.bf16.mxu0 %v10139_v41  ;;  %v3333_v9 = vshll.u32 %v3050_v6, 16  ;;  %v3356_v6 = vrot.slane %v3354_v13, 4  ;;  %v3327_v41 = vrot.slane %v3325_v2, 5  ;;  %v3313_v18 = vrot.slane %v3312_v63, 4 }
 0x1bb   : > { %7390 = vmatprep.mubr.bf16.mxu1 %v8035_v28  ;;  %v3339_v28 = vshll.u32 %v8112_v55, 16  ;;  %v3359_v58 = vrot.slane %v3357_v46, 5  ;;  %v9964_v55 = vrot.slane %v3363_v47, 5  ;;  %v3381_v2 = vshll.u32 %v3056_v15, 16 }
 0x1bc   : > { %v3335_v5 = vrot.slane %v3333_v9, 5  ;;  %v3387_v47 = vshll.u32 %v8117_v51, 16  ;;  %v3318_v36 = vsel %vm8244_vm2, %v3313_v18, %v9952_v27  ;;  %v3380_v15 = vrot.slane %v3378_v11, 4 }
 0x1bd   : > { %v9959_v3 = vrot.slane %v3339_v28, 5  ;;  %v8115_v28 = vld [vmem:[#allocation2 + $0x98] sm:$0x1]  ;;  %v3383_v27 = vrot.slane %v3381_v2, 5  ;;  %v3393_v18 = vrot.slane %v3391_v54, 4 }
 0x1be   : > { %v3336_v9 = vor.u32 %v3335_v5, %v3332_v31  ;;  %v3349_v39 = vshll.u32 %v8115_v28, 16  ;;  %v3402_v31 = vshrl.u32 %v3059_v30, 16  ;;  %v3405_v5 = vshll.u32 %v3059_v30, 16 }
 0x1bf   : > { %v3346_v13 = vor.u32 %v3345_v22, %v9959_v3  ;;  %v8118_v22 = vld [vmem:[#allocation2 + $0xb8] sm:$0xf] }
 0x1c0   : > { %v3337_v63 = vrot.slane %v3336_v9, 4  ;;  %v3351_v34 = vrot.slane %v3349_v39, 5  ;;  %v3407_v9 = vrot.slane %v3405_v5, 5 }
 0x1c2   : > { %7391 = vmatmul.mubr.bf16.gmra.mrb[24].mxu1 %v8036_v56  ;;  %v10140_v56 = vcombine.low %v9638_v21, %v9659_v45  ;;  %v3360_v21 = vor.u32 %v3359_v58, %v3356_v6  ;;  %v8116_v45 = vld [vmem:[#allocation2 + $0xa4] sm:$0x1]  ;;  %v3411_v6 = vshll.u32 %v8118_v22, 16  ;;  %v3415_v58 = vshrl.u32 %v8118_v22, 16 }
 0x1c3   : > { %7394 = vmatprep.mubr.bf16.mxu1 %v8037_v14  ;;  %v3369_v14 = vrot.slane %v3367_v26, 4  ;;  %v3373_v46 = vshll.u32 %v8116_v45, 16  ;;  %v3328_v26 = vsel %vm8244_vm2, %v3323_v48, %v3327_v41  ;;  %v3404_v48 = vrot.slane %v3402_v31, 4 }
 0x1c4   : > { %7615 = vmatmul.mubr.bf16.gmra.mrb[8].mxu0 %v10140_v56  ;;  %v3347_v56 = vrot.slane %v3346_v13, 4  ;;  %v6511_v41 = vcombine.low %v3318_v36, %v3328_v26  ;;  %v3413_v28 = vrot.slane %v3411_v6, 5  ;;  %v3417_v39 = vrot.slane %v3415_v58, 4  ;;  %v3062_v13 = vld [vmem:[#allocation2 + $0xc0] sm:$0xf] }
 0x1c5   : > { %7618 = vmatprep.mubr.bf16.mxu0 %v10141_v37  ;;  %v3370_v23 = vor.u32 %v3369_v14, %v9964_v55  ;;  %v3375_v14 = vrot.slane %v3373_v46, 5  ;;  %v3389_v37 = vrot.slane %v3387_v47, 5  ;;  %v3426_v46 = vshrl.u32 %v3062_v13, 16  ;;  %v8121_v47 = vld [vmem:[#allocation2 + $0xbc] sm:$0x1] }
 0x1c6   : > { %v3429_v11 = vshll.u32 %v3062_v13, 16  ;;  %v3408_v2 = vor.u32 %v3407_v9, %v3404_v48  ;;  %v3418_v51 = vor.u32 %v3417_v39, %v3413_v28  ;;  %v3421_v54 = vshll.u32 %v8121_v47, 16 }
 0x1c7   : > { %v3394_v45 = vor.u32 %v3393_v18, %v3389_v37 }
 0x1c8   : > { %v3431_v31 = vrot.slane %v3429_v11, 5  ;;  %v3409_v6 = vrot.slane %v3408_v2, 4  ;;  %v3419_v58 = vrot.slane %v3418_v51, 4 }
 0x1c9   : > { %v3395_v26 = vrot.slane %v3394_v45, 4 }
 0x1ca   : > { %7395 = vmatmul.mubr.bf16.gmra.mrb[28].mxu1 %v8038_v25  ;;  %v3361_v25 = vrot.slane %v3360_v21, 4  ;;  %v3342_v21 = vsel %vm8244_vm2, %v3337_v63, %v9959_v3  ;;  %v8120_v3 = vld [vmem:[#allocation2 + $0xc4] sm:$0xf]  ;;  %v3399_v63 = vrot.slane %v3397_v38, 5  ;;  %v3414_v17 = vsel %vm8244_vm2, %v3409_v6, %v3413_v28 }
 0x1cb   : > { %7430 = vmatprep.mubr.bf16.mxu1 %v6509_v60  ;;  %v3371_v60 = vrot.slane %v3370_v23, 4  ;;  %v3435_v30 = vshll.u32 %v8120_v3, 16  ;;  %v3439_v23 = vshrl.u32 %v8120_v3, 16 }
 0x1cc   : > { %7619 = vmatmul.mubr.bf16.gmra.mrb[12].mxu0 %v6700_v1  ;;  %v3352_v1 = vsel %vm8244_vm2, %v3347_v56, %v3351_v34  ;;  %v3366_v44 = vsel %vm8244_vm2, %v3361_v25, %v9964_v55  ;;  %v3428_v34 = vrot.slane %v3426_v46, 4  ;;  %v3423_v56 = vrot.slane %v3421_v54, 5 }
 0x1cd   : > { %7622 = vmatprep.mubr.bf16.mxu0 %v6701_v7  ;;  %v3376_v52 = vsel %vm8244_vm2, %v3371_v60, %v3375_v14  ;;  %v3384_v7 = vor.u32 %v3383_v27, %v3380_v15  ;;  %v3437_v5 = vrot.slane %v3435_v30, 5  ;;  %v3441_v22 = vrot.slane %v3439_v23, 4  ;;  %v8122_v14 = vld [vmem:[#allocation2 + $0xc8] sm:$0x1] }
 0x1ce   : > { %v6513_v55 = vcombine.low %v3366_v44, %v3376_v52  ;;  %v3400_v20 = vsel %vm8244_vm2, %v3395_v26, %v3399_v63  ;;  %v3445_v32 = vshll.u32 %v8122_v14, 16 }
 0x1cf   : > { %v3385_v36 = vrot.slane %v3384_v7, 4  ;;  %v3442_v25 = vor.u32 %v3441_v22, %v3437_v5 }
 0x1d0   : > { %v3447_v18 = vrot.slane %v3445_v32, 5 }
 0x1d1   : > { %v3390_v59 = vsel %vm8244_vm2, %v3385_v36, %v3389_v37  ;;  %v3443_v37 = vrot.slane %v3442_v25, 4 }
 0x1d2   : > { %7431 = vmatmul.mubr.bf16.vlgmr.msra.gmra.mrb[16].mxu1 %v9763_v42  ;;  %v6512_v42 = vcombine.low %v3342_v21, %v3352_v1  ;;  %v6514_v15 = vcombine.low %v3390_v59, %v3400_v20 }
 0x1d3   : > { %7434 = vmatprep.mubr.bf16.mxu1 %v6511_v41  ;;  %v3448_v48 = vsel %vm8244_vm2, %v3443_v37, %v3447_v18 }
 0x1d4   : > { %7623 = vmatmul.mubr.bf16.gmra.mrb[16].mxu0 %v6702_v43  ;;  %v3432_v43 = vor.u32 %v3431_v31, %v3428_v34 }
 0x1d5   : > { %7626 = vmatprep.mubr.bf16.mxu0 %v6703_v57  ;;  %v3424_v57 = vsel %vm8244_vm2, %v3419_v58, %v3423_v56 }
 0x1d6   : > { %v6515_v60 = vcombine.low %v3414_v17, %v3424_v57  ;;  %v3433_v27 = vrot.slane %v3432_v43, 4 }
 0x1d8   : > { %v3438_v41 = vsel %vm8244_vm2, %v3433_v27, %v3437_v5 }
 0x1d9   : > { %v6516_v4 = vcombine.low %v3438_v41, %v3448_v48 }
 0x1da   : > { %7435 = vmatmul.mubr.bf16.gmra.mrb[20].mxu1 %v6512_v42 }
 0x1db   : > { %7438 = vmatprep.mubr.bf16.mxu1 %v6513_v55 }
 0x1dc   : > { %7627 = vmatmul.mubr.bf16.gmra.mrb[20].mxu0 %v6704_v24 }
 0x1dd   : > { %7630 = vmatprep.mubr.bf16.mxu0 %v6705_v8 }
 0x1e2   : > { %7439 = vmatmul.mubr.bf16.gmra.mrb[24].mxu1 %v6514_v15 }
 0x1e3   : > { %7442 = vmatprep.mubr.bf16.mxu1 %v6515_v60 }
 0x1e4   : > { %7631 = vmatmul.mubr.bf16.gmra.mrb[24].mxu0 %v6706_v53 }
 0x1e5   : > { %7634 = vmatprep.mubr.bf16.mxu0 %v6707_v62 }
 0x1ea   : > { %7443 = vmatmul.mubr.bf16.gmra.mrb[28].mxu1 %v6516_v4 }
 0x1ec   : > { %7635 = vmatmul.mubr.bf16.gmra.mrb[28].mxu0 %v6708_v19 }
 0x265   : > { %v7368_v50 = vpop.f32.mrb[0].mxu1 }
 0x266   : > { %v2858_v24 = vpop.f32.mrb[1].mxu1 }
 0x267   : > { %v7369_v29 = vpop.f32.mrb[2].mxu1 }
 0x268   : > { %v2861_v35 = vpop.f32.mrb[3].mxu1 }
 0x26d   : > { %v7372_v12 = vpop.f32.mrb[4].mxu1 }
 0x26e   : > { %v2874_v8 = vpop.f32.mrb[5].mxu1 }
 0x26f   : > { %v7373_v9 = vpop.f32.mrb[6].mxu1 }
 0x270   : > { %v2877_v33 = vpop.f32.mrb[7].mxu1 }
 0x275   : > { %v7376_v40 = vpop.f32.mrb[8].mxu1 }
 0x276   : > { %v2890_v53 = vpop.f32.mrb[9].mxu1 }
 0x277   : > { %v7377_v28 = vpop.f32.mrb[10].mxu1 }
 0x278   : > { %v10026_v39 = vpop.f32.mrb[11].mxu1 }
 0x27d   : > { %v10028_v61 = vpop.f32.mrb[12].mxu1 }
 0x27e   : > { %v10030_v16 = vpop.f32.mrb[13].mxu1 }
 0x27f   : > { %v10032_v62 = vpop.f32.mrb[14].mxu1 }
 0x280   : > { %v10035_v0 = vpop.f32.mrb[15].mxu1 }
 0x284   : > { %v7608_v10 = vpop.f32.mrb[0].mxu0 }
 0x285   : > { %v7654_v19 = vadd.f32 %v7608_v10, %v7368_v50  ;;  %v5749_v13 = vpop.f32.mrb[1].mxu0 }
 0x286   : > { %v7655_v21 = vadd.f32 %v5749_v13, %v2858_v24  ;;  %v7609_v1 = vpop.f32.mrb[2].mxu0 }
 0x287   : > { %v7656_v49 = vadd.f32 %v7609_v1, %v7369_v29  ;;  %v5752_v38 = vpop.f32.mrb[3].mxu0  ;;  %v6108_v3 = vmul.f32 %v7654_v19, %v7654_v19 }
 0x288   : > { %v7657_v44 = vadd.f32 %v5752_v38, %v2861_v35  ;;  %v6106_v7 = vmul.f32 %v7655_v21, %v7655_v21 }
 0x289   : > { %v6888_v52 = vpack.c.bf16 %v7656_v49, %v7654_v19  ;;  %v6109_v54 = vmul.f32 %v7656_v49, %v7656_v49 }
 0x28a   : > { %v6883_v45 = vpack.c.bf16 %v7657_v44, %v7655_v21  ;;  %v6068_v46 = vadd.f32 %v7657_v44, %v7655_v21  ;;  %v6107_v11 = vmul.f32 %v7657_v44, %v7657_v44 }
 0x28b   : > { %6975 = vst [vmem:[%s10040_s17 + $0x8] sm:$0xff] %v6888_v52  }
 0x28c   : > { %6884 = vst [vmem:[%s10040_s17] sm:$0xff] %v6883_v45   ;;  %v6069_v30 = vadd.f32 %v7654_v19, %v6068_v46  ;;  %v6138_v23 = vadd.f32 %v6107_v11, %v6106_v7  ;;  %v7612_v2 = vpop.f32.mrb[4].mxu0 }
 0x28d   : > { %v7658_v51 = vadd.f32 %v7612_v2, %v7372_v12  ;;  %v5765_v47 = vpop.f32.mrb[5].mxu0 }
 0x28e   : > { %v6139_v42 = vadd.f32 %v6138_v23, %v6108_v3  ;;  %v7659_v55 = vadd.f32 %v5765_v47, %v2874_v8  ;;  %v6070_v36 = vadd.f32 %v7656_v49, %v6069_v30  ;;  %v7613_v26 = vpop.f32.mrb[6].mxu0 }
 0x28f   : > { %v7660_v63 = vadd.f32 %v7613_v26, %v7373_v9  ;;  %v5768_v34 = vpop.f32.mrb[7].mxu0  ;;  %v6112_v25 = vmul.f32 %v7658_v51, %v7658_v51 }
 0x290   : > { %v6071_v31 = vadd.f32 %v7659_v55, %v6070_v36  ;;  %v6110_v5 = vmul.f32 %v7659_v55, %v7659_v55  ;;  %v6140_v22 = vadd.f32 %v6139_v42, %v6109_v54  ;;  %v7661_v6 = vadd.f32 %v5768_v34, %v2877_v33 }
 0x291   : > { %v6898_v58 = vpack.c.bf16 %v7660_v63, %v7658_v51  ;;  %v6113_v60 = vmul.f32 %v7660_v63, %v7660_v63 }
 0x292   : > { %v6141_v56 = vadd.f32 %v6140_v22, %v6110_v5  ;;  %v6893_v59 = vpack.c.bf16 %v7661_v6, %v7659_v55  ;;  %v6072_v20 = vadd.f32 %v7661_v6, %v6071_v31  ;;  %v6111_v43 = vmul.f32 %v7661_v6, %v7661_v6 }
 0x293   : > { %6977 = vst [vmem:[%s10040_s17 + $0x18] sm:$0xff] %v6898_v58  }
 0x294   : > { %6976 = vst [vmem:[%s10040_s17 + $0x10] sm:$0xff] %v6893_v59   ;;  %v6073_v14 = vadd.f32 %v7658_v51, %v6072_v20  ;;  %v6142_v32 = vadd.f32 %v6141_v56, %v6111_v43 }
 0x296   : > { %v6143_v27 = vadd.f32 %v6142_v32, %v6112_v25  ;;  %v6074_v18 = vadd.f32 %v7660_v63, %v6073_v14 }
 0x297   : > { %v7616_v17 = vpop.f32.mrb[8].mxu0 }
 0x298   : > { %v7662_v57 = vadd.f32 %v7616_v17, %v7376_v40  ;;  %v5781_v15 = vpop.f32.mrb[9].mxu0  ;;  %v6144_v29 = vadd.f32 %v6143_v27, %v6113_v60 }
 0x299   : > { %v7663_v37 = vadd.f32 %v5781_v15, %v2890_v53  ;;  %v7617_v41 = vpop.f32.mrb[10].mxu0 }
 0x29a   : > { %v7664_v48 = vadd.f32 %v7617_v41, %v7377_v28  ;;  %v5784_v4 = vpop.f32.mrb[11].mxu0  ;;  %v6116_v10 = vmul.f32 %v7662_v57, %v7662_v57 }
 0x29b   : > { %v6075_v50 = vadd.f32 %v7663_v37, %v6074_v18  ;;  %v6114_v24 = vmul.f32 %v7663_v37, %v7663_v37  ;;  %v7665_v35 = vadd.f32 %v5784_v4, %v10026_v39 }
 0x29c   : > { %v6908_v12 = vpack.c.bf16 %v7664_v48, %v7662_v57  ;;  %v6117_v1 = vmul.f32 %v7664_v48, %v7664_v48 }
 0x29d   : > { %v6145_v8 = vadd.f32 %v6144_v29, %v6114_v24  ;;  %v6903_v9 = vpack.c.bf16 %v7665_v35, %v7663_v37  ;;  %v6076_v33 = vadd.f32 %v7665_v35, %v6075_v50  ;;  %v6115_v40 = vmul.f32 %v7665_v35, %v7665_v35 }
 0x29e   : > { %6979 = vst [vmem:[%s10040_s17 + $0x28] sm:$0xff] %v6908_v12  }
 0x29f   : > { %6978 = vst [vmem:[%s10040_s17 + $0x20] sm:$0xff] %v6903_v9   ;;  %v6077_v19 = vadd.f32 %v7662_v57, %v6076_v33  ;;  %v6146_v53 = vadd.f32 %v6145_v8, %v6115_v40  ;;  %v7620_v13 = vpop.f32.mrb[12].mxu0 }
 0x2a0   : > { %v7666_v21 = vadd.f32 %v7620_v13, %v10028_v61  ;;  %v5797_v28 = vpop.f32.mrb[13].mxu0 }
 0x2a1   : > { %v6147_v49 = vadd.f32 %v6146_v53, %v6116_v10  ;;  %v7667_v38 = vadd.f32 %v5797_v28, %v10030_v16  ;;  %v6078_v44 = vadd.f32 %v7664_v48, %v6077_v19  ;;  %v7621_v39 = vpop.f32.mrb[14].mxu0 }
 0x2a2   : > { %v7668_v52 = vadd.f32 %v7621_v39, %v10032_v62  ;;  %v5800_v7 = vpop.f32.mrb[15].mxu0  ;;  %v6120_v55 = vmul.f32 %v7666_v21, %v7666_v21 }
 0x2a3   : > { %v6079_v45 = vadd.f32 %v7667_v38, %v6078_v44  ;;  %v6118_v46 = vmul.f32 %v7667_v38, %v7667_v38  ;;  %v6148_v11 = vadd.f32 %v6147_v49, %v6117_v1  ;;  %v7669_v3 = vadd.f32 %v5800_v7, %v10035_v0 }
 0x2a4   : > { %v6918_v23 = vpack.c.bf16 %v7668_v52, %v7666_v21  ;;  %v6121_v31 = vmul.f32 %v7668_v52, %v7668_v52 }
 0x2a5   : > { %v7432_v30 = vpop.f32.mrb[16].mxu1  ;;  %v6149_v2 = vadd.f32 %v6148_v11, %v6118_v46  ;;  %v6913_v51 = vpack.c.bf16 %v7669_v3, %v7667_v38  ;;  %v6080_v47 = vadd.f32 %v7669_v3, %v6079_v45  ;;  %v6119_v54 = vmul.f32 %v7669_v3, %v7669_v3 }
 0x2a6   : > { %v3676_v61 = vpop.f32.mrb[17].mxu1  ;;  %6981 = vst [vmem:[%s10040_s17 + $0x38] sm:$0xff] %v6918_v23  }
 0x2a7   : > { %v7433_v16 = vpop.f32.mrb[18].mxu1  ;;  %6980 = vst [vmem:[%s10040_s17 + $0x30] sm:$0xff] %v6913_v51   ;;  %v6081_v62 = vadd.f32 %v7666_v21, %v6080_v47  ;;  %v6150_v36 = vadd.f32 %v6149_v2, %v6119_v54  ;;  %v7624_v26 = vpop.f32.mrb[16].mxu0 }
 0x2a8   : > { %v3679_v42 = vpop.f32.mrb[19].mxu1  ;;  %v7670_v63 = vadd.f32 %v7624_v26, %v7432_v30  ;;  %v5813_v34 = vpop.f32.mrb[17].mxu0 }
 0x2a9   : > { %v6151_v5 = vadd.f32 %v6150_v36, %v6120_v55  ;;  %v7671_v0 = vadd.f32 %v5813_v34, %v3676_v61  ;;  %v6082_v22 = vadd.f32 %v7668_v52, %v6081_v62  ;;  %v7625_v6 = vpop.f32.mrb[18].mxu0 }
 0x2aa   : > { %v7672_v58 = vadd.f32 %v7625_v6, %v7433_v16  ;;  %v5816_v56 = vpop.f32.mrb[19].mxu0  ;;  %v6124_v41 = vmul.f32 %v7670_v63, %v7670_v63 }
 0x2ab   : > { %v6083_v59 = vadd.f32 %v7671_v0, %v6082_v22  ;;  %v6122_v20 = vmul.f32 %v7671_v0, %v7671_v0  ;;  %v6152_v43 = vadd.f32 %v6151_v5, %v6121_v31  ;;  %v7673_v25 = vadd.f32 %v5816_v56, %v3679_v42 }
 0x2ac   : > { %v6928_v32 = vpack.c.bf16 %v7672_v58, %v7670_v63  ;;  %v6125_v35 = vmul.f32 %v7672_v58, %v7672_v58 }
 0x2ad   : > { %v7436_v14 = vpop.f32.mrb[20].mxu1  ;;  %v6153_v57 = vadd.f32 %v6152_v43, %v6122_v20  ;;  %v6923_v15 = vpack.c.bf16 %v7673_v25, %v7671_v0  ;;  %v6084_v60 = vadd.f32 %v7673_v25, %v6083_v59  ;;  %v6123_v27 = vmul.f32 %v7673_v25, %v7673_v25 }
 0x2ae   : > { %v3692_v17 = vpop.f32.mrb[21].mxu1  ;;  %6983 = vst [vmem:[%s10040_s17 + $0x48] sm:$0xff] %v6928_v32  }
 0x2af   : > { %v7437_v37 = vpop.f32.mrb[22].mxu1  ;;  %6982 = vst [vmem:[%s10040_s17 + $0x40] sm:$0xff] %v6923_v15   ;;  %v6085_v48 = vadd.f32 %v7670_v63, %v6084_v60  ;;  %v6154_v4 = vadd.f32 %v6153_v57, %v6123_v27  ;;  %v7628_v50 = vpop.f32.mrb[20].mxu0 }
 0x2b0   : > { %v3695_v18 = vpop.f32.mrb[23].mxu1  ;;  %v7674_v24 = vadd.f32 %v7628_v50, %v7436_v14  ;;  %v5829_v29 = vpop.f32.mrb[21].mxu0 }
 0x2b1   : > { %v6155_v12 = vadd.f32 %v6154_v4, %v6124_v41  ;;  %v7675_v8 = vadd.f32 %v5829_v29, %v3692_v17  ;;  %v6086_v9 = vadd.f32 %v7672_v58, %v6085_v48  ;;  %v7629_v33 = vpop.f32.mrb[22].mxu0 }
 0x2b2   : > { %v7676_v40 = vadd.f32 %v7629_v33, %v7437_v37  ;;  %v5832_v10 = vpop.f32.mrb[23].mxu0  ;;  %v6128_v46 = vmul.f32 %v7674_v24, %v7674_v24 }
 0x2b3   : > { %v6087_v19 = vadd.f32 %v7675_v8, %v6086_v9  ;;  %v6126_v53 = vmul.f32 %v7675_v8, %v7675_v8  ;;  %v6156_v13 = vadd.f32 %v6155_v12, %v6125_v35  ;;  %v7677_v21 = vadd.f32 %v5832_v10, %v3695_v18 }
 0x2b4   : > { %v6938_v1 = vpack.c.bf16 %v7676_v40, %v7674_v24  ;;  %v6129_v2 = vmul.f32 %v7676_v40, %v7676_v40 }
 0x2b5   : > { %v7440_v28 = vpop.f32.mrb[24].mxu1  ;;  %v6157_v38 = vadd.f32 %v6156_v13, %v6126_v53  ;;  %v6933_v44 = vpack.c.bf16 %v7677_v21, %v7675_v8  ;;  %v6088_v39 = vadd.f32 %v7677_v21, %v6087_v19  ;;  %v6127_v52 = vmul.f32 %v7677_v21, %v7677_v21 }
 0x2b6   : > { %v3708_v49 = vpop.f32.mrb[25].mxu1  ;;  %6985 = vst [vmem:[%s10040_s17 + $0x58] sm:$0xff] %v6938_v1  }
 0x2b7   : > { %v7441_v7 = vpop.f32.mrb[26].mxu1  ;;  %6984 = vst [vmem:[%s10040_s17 + $0x50] sm:$0xff] %v6933_v44   ;;  %v6089_v11 = vadd.f32 %v7674_v24, %v6088_v39  ;;  %v6158_v3 = vadd.f32 %v6157_v38, %v6127_v52  ;;  %v7632_v30 = vpop.f32.mrb[24].mxu0 }
 0x2b8   : > { %v3711_v45 = vpop.f32.mrb[27].mxu1  ;;  %v7678_v23 = vadd.f32 %v7632_v30, %v7440_v28  ;;  %v5845_v61 = vpop.f32.mrb[25].mxu0 }
 0x2b9   : > { %v6159_v51 = vadd.f32 %v6158_v3, %v6128_v46  ;;  %v7679_v47 = vadd.f32 %v5845_v61, %v3708_v49  ;;  %v6090_v54 = vadd.f32 %v7676_v40, %v6089_v11  ;;  %v7633_v16 = vpop.f32.mrb[26].mxu0 }
 0x2ba   : > { %v7680_v42 = vadd.f32 %v7633_v16, %v7441_v7  ;;  %v5848_v55 = vpop.f32.mrb[27].mxu0  ;;  %v6132_v20 = vmul.f32 %v7678_v23, %v7678_v23 }
 0x2bb   : > { %v6091_v62 = vadd.f32 %v7679_v47, %v6090_v54  ;;  %v6130_v36 = vmul.f32 %v7679_v47, %v7679_v47  ;;  %v6160_v26 = vadd.f32 %v6159_v51, %v6129_v2  ;;  %v7681_v63 = vadd.f32 %v5848_v55, %v3711_v45 }
 0x2bc   : > { %v6948_v31 = vpack.c.bf16 %v7680_v42, %v7678_v23  ;;  %v6133_v57 = vmul.f32 %v7680_v42, %v7680_v42 }
 0x2bd   : > { %v7444_v34 = vpop.f32.mrb[28].mxu1  ;;  %v6161_v0 = vadd.f32 %v6160_v26, %v6130_v36  ;;  %v6943_v22 = vpack.c.bf16 %v7681_v63, %v7679_v47  ;;  %v6092_v6 = vadd.f32 %v7681_v63, %v6091_v62  ;;  %v6131_v58 = vmul.f32 %v7681_v63, %v7681_v63 }
 0x2be   : > { %v3724_v5 = vpop.f32.mrb[29].mxu1  ;;  %6987 = vst [vmem:[%s10040_s17 + $0x68] sm:$0xff] %v6948_v31  }
 0x2bf   : > { %v7445_v56 = vpop.f32.mrb[30].mxu1  ;;  %6986 = vst [vmem:[%s10040_s17 + $0x60] sm:$0xff] %v6943_v22   ;;  %v6093_v43 = vadd.f32 %v7678_v23, %v6092_v6  ;;  %v6162_v25 = vadd.f32 %v6161_v0, %v6131_v58  ;;  %v7636_v14 = vpop.f32.mrb[28].mxu0 }
 0x2c0   : > { %v3727_v59 = vpop.f32.mrb[31].mxu1  ;;  %v7682_v32 = vadd.f32 %v7636_v14, %v7444_v34  ;;  %v5861_v17 = vpop.f32.mrb[29].mxu0 }
 0x2c1   : > { %v6163_v15 = vadd.f32 %v6162_v25, %v6132_v20  ;;  %v7683_v60 = vadd.f32 %v5861_v17, %v3724_v5  ;;  %v6094_v27 = vadd.f32 %v7680_v42, %v6093_v43  ;;  %v7637_v37 = vpop.f32.mrb[30].mxu0 }
 0x2c2   : > { %v7684_v18 = vadd.f32 %v7637_v37, %v7445_v56  ;;  %v5864_v41 = vpop.f32.mrb[31].mxu0  ;;  %v6136_v33 = vmul.f32 %v7682_v32, %v7682_v32 }
 0x2c3   : > { %v6095_v48 = vadd.f32 %v7683_v60, %v6094_v27  ;;  %v6134_v4 = vmul.f32 %v7683_v60, %v7683_v60  ;;  %v6164_v50 = vadd.f32 %v6163_v15, %v6133_v57  ;;  %v7685_v24 = vadd.f32 %v5864_v41, %v3727_v59 }
 0x2c4   : > { %v6958_v29 = vpack.c.bf16 %v7684_v18, %v7682_v32  ;;  %v6137_v19 = vmul.f32 %v7684_v18, %v7684_v18 }
 0x2c5   : > { %v6165_v35 = vadd.f32 %v6164_v50, %v6134_v4  ;;  %v6953_v12 = vpack.c.bf16 %v7685_v24, %v7683_v60  ;;  %v6096_v8 = vadd.f32 %v7685_v24, %v6095_v48  ;;  %v6135_v9 = vmul.f32 %v7685_v24, %v7685_v24 }
 0x2c6   : > { %6989 = vst [vmem:[%s10040_s17 + $0x78] sm:$0xff] %v6958_v29  }
 0x2c7   : > { %6988 = vst [vmem:[%s10040_s17 + $0x70] sm:$0xff] %v6953_v12   ;;  %v6097_v40 = vadd.f32 %v7682_v32, %v6096_v8  ;;  %v6166_v10 = vadd.f32 %v6165_v35, %v6135_v9 }
 0x2c9   : > { %v6098_v53 = vadd.f32 %v7684_v18, %v6097_v40  ;;  %v6167_v13 = vadd.f32 %v6166_v10, %v6136_v33 }
 0x2cb   : > { %v6099_v21 = vrot.slane %v6098_v53, 4  ;;  %v6168_v28 = vadd.f32 %v6167_v13, %v6137_v19 }
 0x2cd   : > { %v6100_v1 = vadd.f32 %v6099_v21, %v6098_v53  ;;  %v6169_v49 = vrot.slane %v6168_v28, 4 }
 0x2cf   : > { %v6101_v38 = vrot.slane %v6100_v1, 2  ;;  %v6170_v44 = vadd.f32 %v6169_v49, %v6168_v28 }
 0x2d1   : > { %v6102_v39 = vadd.f32 %v6101_v38, %v6100_v1  ;;  %v6171_v52 = vrot.slane %v6170_v44, 2 }
 0x2d3   : > { %v6103_v7 = vrot.slane %v6102_v39, 1  ;;  %v6172_v45 = vadd.f32 %v6171_v52, %v6170_v44 }
 0x2d5   : > { %v6104_v46 = vadd.f32 %v6103_v7, %v6102_v39  ;;  %v6173_v11 = vrot.slane %v6172_v45, 1 }
 0x2d7   : > { %6105 = vst [vmem:[%s266_s27] sm:$0x1] %v6104_v46  ;;  %v6174_v3 = vadd.f32 %v6173_v11, %v6172_v45 }
 0x2d9   : > { %6175 = vst [vmem:[%s269_s23] sm:$0x1] %v6174_v3 }
 0x2da PF: > { %s17_s21 = sadd.s32 1, %s8129_s21  }
 0x2db   : > { %p14_p5 = scmp.ge.s32.totalorder %s17_s21, 4  }
 0x2dd   :  { %16 = sbr.rel (!%p14_p5) target bundleno = 1 (0x1), region = 100 }

</bundles_post_ra>
